<compile_context>
chip_gen: v7x
topology: tpu7x:2x2x1
jax: 0.10.0
libtpu: 0.0.40
codegen_flags: <defaults>
</compile_context>

<pallas_src>
import functools
import numpy as np

import jax
import jax.numpy as jnp
from jax.experimental import pallas as pl
from jax.experimental.pallas import tpu as pltpu

VMEM_SPEC = pl.BlockSpec(memory_space=pltpu.MemorySpace.VMEM)


def _call(kernel, out_shape, *args):
    return pl.pallas_call(
        kernel,
        out_shape=jax.ShapeDtypeStruct(out_shape, jnp.float32),
        in_specs=[VMEM_SPEC] * len(args),
        out_specs=VMEM_SPEC,
    )(*args)


# --------------------------------------------------------------------------------------
# Pallas kernels (all arrays are tiny -> whole-array VMEM blocks, no grid tiling)
# --------------------------------------------------------------------------------------

def _cbr_kernel(taps_ref, w_ref, gamma_ref, beta_ref, alpha_ref, o_ref, *, eps):
    # Fused Conv3x3 (im2col stack already built) + BatchNorm (training-mode batch
    # stats, biased variance) + PReLU.  Output (Cout, M) is lane-dense; BN reduction
    # runs along the lane axis.
    y = jnp.dot(w_ref[...], taps_ref[...], preferred_element_type=jnp.float32)
    m = y.shape[1]
    mean = jnp.sum(y, axis=1, keepdims=True) * (1.0 / m)
    yc = y - mean
    var = jnp.sum(yc * yc, axis=1, keepdims=True) * (1.0 / m)
    z = gamma_ref[...] * yc * jax.lax.rsqrt(var + eps) + beta_ref[...]
    o_ref[...] = jnp.where(z >= 0.0, z, alpha_ref[...] * z)


def _conv1x1_bias_kernel(x_ref, w_ref, b_ref, o_ref):
    # 1x1 conv with bias: (Cout, Cin) x (Cin, M) + (Cout, 1)
    o_ref[...] = (
        jnp.dot(w_ref[...], x_ref[...], preferred_element_type=jnp.float32) + b_ref[...]
    )


def _conv1x1_bias_upadd_kernel(x_ref, w_ref, b_ref, src_ref, up_ref, o_ref):
    # Fused FPN step: lateral 1x1(+bias) on x, plus bilinear upsample of src expressed
    # as a matmul with a precomputed (M_in, M_out) interpolation matrix, plus add.
    lat = jnp.dot(w_ref[...], x_ref[...], preferred_element_type=jnp.float32) + b_ref[...]
    up = jnp.dot(src_ref[...], up_ref[...], preferred_element_type=jnp.float32)
    o_ref[...] = lat + up


def _dsconv_kernel(taps_ref, dw_ref, pw_ref, o_ref):
    # DepthwiseSeparableConv: depthwise 3x3 (tap multiply-accumulate) + pointwise 1x1.
    # taps: (9, Cin, M); dw: (9, Cin, 1); pw: (Cout, Cin).
    acc = taps_ref[0] * dw_ref[0]
    for t in range(1, 9):
        acc = acc + taps_ref[t] * dw_ref[t]
    o_ref[...] = jnp.dot(pw_ref[...], acc, preferred_element_type=jnp.float32)


def _dsconv_add_kernel(taps_ref, dw_ref, pw_ref, res_ref, o_ref):
    # DepthwiseSeparableConv + residual add (PAN bottom-up path), fused.
    acc = taps_ref[0] * dw_ref[0]
    for t in range(1, 9):
        acc = acc + taps_ref[t] * dw_ref[t]
    o_ref[...] = res_ref[...] + jnp.dot(
        pw_ref[...], acc, preferred_element_type=jnp.float32)


def _spp_kernel(x_ref, w1_ref, b1_ref, w2_ref, b2_ref, wc_ref, row_ref, img_ref,
                o_ref, *, n, h, w):
    # Fused SPP: cv1 (1x1+bias) -> max pools k=5,9,13 (stride 1, -inf padding) built
    # in-kernel from masked pltpu.roll lane shifts -> cv2 (1x1+bias) as 4 accumulated
    # K-chunk dots (replaces the channel concat).
    m = n * h * w
    neg = jnp.float32(-jnp.inf)

    y = jnp.dot(w1_ref[...], x_ref[...], preferred_element_type=jnp.float32) + b1_ref[...]

    wc = wc_ref[...]     # (1, M) int32: w coordinate of each flat position
    row = row_ref[...]   # (1, M) int32: global row id (n*H + h)
    img = img_ref[...]   # (1, M) int32: image id n

    # Validity masks are derived from index arrays rolled with the *same* shift as the
    # data, so they are correct for either rotation direction and exclude wrap-around
    # and row/image-boundary crossings (PyTorch MaxPool2d pads with -inf).
    w_shifts = []
    for d in (1, 2):                       # radius-2 window along W (lane axis)
        for s in (d % m, (m - d) % m):
            rr = pltpu.roll(row, shift=s, axis=1)
            rw = pltpu.roll(wc, shift=s, axis=1)
            ok = jnp.logical_and(rr == row, jnp.abs(rw - wc) == d)
            w_shifts.append((s, ok))
    h_shifts = []
    for d in (1, 2):                       # radius-2 window along H (shift by +-d*W)
        for s in ((d * w) % m, (m - d * w) % m):
            ri = pltpu.roll(img, shift=s, axis=1)
            rw = pltpu.roll(wc, shift=s, axis=1)
            rr = pltpu.roll(row, shift=s, axis=1)
            ok = jnp.logical_and(jnp.logical_and(ri == img, rw == wc),
                                 jnp.abs(rr - row) == d)
            h_shifts.append((s, ok))

    def radius2(p):
        # separable 5x5 max (radius 2 in W then H); iterating gives radius 4, 6 exactly
        out = p
        for s, ok in w_shifts:
            out = jnp.maximum(out, jnp.where(ok, pltpu.roll(p, shift=s, axis=1), neg))
        p2 = out
        out = p2
        for s, ok in h_shifts:
            out = jnp.maximum(out, jnp.where(ok, pltpu.roll(p2, shift=s, axis=1), neg))
        return out

    # cv2(concat([y, p5, p9, p13])) as 4 accumulated K-chunk matmuls.
    acc = jnp.dot(w2_ref[0], y, preferred_element_type=jnp.float32) + b2_ref[...]
    p = y
    for i in range(3):
        p = radius2(p)                     # k=5 -> k=9 -> k=13
        acc = acc + jnp.dot(w2_ref[i + 1], p, preferred_element_type=jnp.float32)
    o_ref[...] = acc


# --------------------------------------------------------------------------------------
# Plain-JAX glue: 3x3 tap extraction and bilinear interpolation matrices
# --------------------------------------------------------------------------------------

def extract_taps_cm(x_cm, n, h, w, stride):
    """3x3 / pad=1 tap extraction in the (C, M) layout.

    Returns (taps, Ho, Wo) where taps is (9, C, N*Ho*Wo) with tap index t = 3*ky + kx.
    """
    c = x_cm.shape[0]
    x4 = x_cm.reshape(c, n, h, w)
    xp = jnp.pad(x4, ((0, 0), (0, 0), (1, 1), (1, 1)))
    ho = (h + 2 - 3) // stride + 1
    wo = (w + 2 - 3) // stride + 1
    taps = []
    for ky in range(3):
        for kx in range(3):
            t = jax.lax.slice(
                xp,
                (0, 0, ky, kx),
                (c, n, ky + (ho - 1) * stride + 1, kx + (wo - 1) * stride + 1),
                (1, 1, stride, stride),
            )
            taps.append(t.reshape(c, n * ho * wo))
    return jnp.stack(taps, axis=0), ho, wo


def _interp_matrix(out_size, in_size):
    # Row weights matching F.interpolate(mode='bilinear', align_corners=False)
    m = np.zeros((out_size, in_size), np.float32)
    scale = in_size / out_size
    for i in range(out_size):
        src = max((i + 0.5) * scale - 0.5, 0.0)
        i0 = min(int(np.floor(src)), in_size - 1)
        i1 = min(i0 + 1, in_size - 1)
        frac = src - i0
        m[i, i0] += 1.0 - frac
        m[i, i1] += frac
    return m


def _upsample_matrix_t(n, h_in, w_in, h_out, w_out):
    # (M_in, M_out) matrix U^T so that upsampled = X_cm @ U^T (block-diagonal over N).
    uh = _interp_matrix(h_out, h_in)
    uw = _interp_matrix(w_out, w_in)
    u_sp = np.einsum("pi,qj->pqij", uh, uw).reshape(h_out * w_out, h_in * w_in)
    so, si = h_out * w_out, h_in * w_in
    u = np.zeros((n * so, n * si), np.float32)
    for b in range(n):
        u[b * so:(b + 1) * so, b * si:(b + 1) * si] = u_sp
    return jnp.asarray(u.T)


# --------------------------------------------------------------------------------------
# Module forward (mirrors DetectHead.forward) in the (C, M) layout
# --------------------------------------------------------------------------------------

def cbr_forward(x_cm, n, h, w, prm, stride):
    cin = x_cm.shape[0]
    taps, ho, wo = extract_taps_cm(x_cm, n, h, w, stride)
    mo = n * ho * wo
    out = _call(functools.partial(_cbr_kernel, eps=1e-5),
                (prm["w"].shape[0], mo),
                taps.reshape(9 * cin, mo), prm["w"], prm["gamma"], prm["beta"],
                prm["alpha"])
    return out, ho, wo


def spp_forward(x_cm, n, h, w, prm):
    m = n * h * w
    ar = np.arange(m, dtype=np.int32)
    wcoord = jnp.asarray((ar % w).reshape(1, m))
    rowid = jnp.asarray((ar // w).reshape(1, m))
    imgid = jnp.asarray((ar // (h * w)).reshape(1, m))
    cout = prm["b2"].shape[0]
    return _call(functools.partial(_spp_kernel, n=n, h=h, w=w), (cout, m),
                 x_cm, prm["w1"], prm["b1"], prm["w2"], prm["b2"],
                 wcoord, rowid, imgid)


def dsconv_forward(x_cm, n, h, w, prm, stride=1, residual=None):
    taps, ho, wo = extract_taps_cm(x_cm, n, h, w, stride)
    cout = prm["pw"].shape[0]
    mo = n * ho * wo
    if residual is None:
        out = _call(_dsconv_kernel, (cout, mo), taps, prm["dw"], prm["pw"])
    else:
        out = _call(_dsconv_add_kernel, (cout, mo), taps, prm["dw"], prm["pw"], residual)
    return out, ho, wo


def fpn_forward(feats, n, prm):
    (p5, h5, w5), (p4, h4, w4), (p3, h3, w3) = feats   # [P5, P4, P3]
    c3 = prm["lat"][0]["w"].shape[0]
    m5, m4, m3 = n * h5 * w5, n * h4 * w4, n * h3 * w3
    lat0, lat1, lat2 = prm["lat"][0], prm["lat"][1], prm["lat"][2]

    M5 = _call(_conv1x1_bias_kernel, (c3, m5), p5, lat2["w"], lat2["b"])

    u54 = _upsample_matrix_t(n, h5, w5, h4, w4)        # (m5, m4)
    M4 = _call(_conv1x1_bias_upadd_kernel, (c3, m4), p4, lat1["w"], lat1["b"], M5, u54)

    u43 = _upsample_matrix_t(n, h4, w4, h3, w3)        # (m4, m3)
    M3 = _call(_conv1x1_bias_upadd_kernel, (c3, m3), p3, lat0["w"], lat0["b"], M4, u43)

    O5, _, _ = dsconv_forward(M5, n, h5, w5, prm["out"][2], stride=1)
    O4, _, _ = dsconv_forward(M4, n, h4, w4, prm["out"][1], stride=1)
    O3, _, _ = dsconv_forward(M3, n, h3, w3, prm["out"][0], stride=1)
    return [(O3, h3, w3), (O4, h4, w4), (O5, h5, w5)]


def pan_forward(feats, n, prm):
    (p5, h5, w5), (p4, h4, w4), (p3, h3, w3) = feats   # [P5, P4, P3]
    b3 = p3
    b4, _, _ = dsconv_forward(b3, n, h3, w3, prm["bu"][0], stride=2, residual=p4)
    b5, _, _ = dsconv_forward(b4, n, h4, w4, prm["bu"][1], stride=2, residual=p5)
    b3, _, _ = dsconv_forward(b3, n, h3, w3, prm["sm"][0], stride=1)
    b4, _, _ = dsconv_forward(b4, n, h4, w4, prm["sm"][1], stride=1)
    b5, _, _ = dsconv_forward(b5, n, h5, w5, prm["sm"][2], stride=1)
    return [(b3, h3, w3), (b4, h4, w4), (b5, h5, w5)]


def detect_head_forward(params, output_encoder):
    x_nchw, _, _ = output_encoder                      # only the first tensor is used
    n, c, h, w = x_nchw.shape
    # NCHW -> lane-dense (C, N*H*W)
    x_cm = jnp.transpose(x_nchw, (1, 0, 2, 3)).reshape(c, n * h * w).astype(jnp.float32)

    out1, h1, w1 = cbr_forward(x_cm, n, h, w, params["cbr1"], stride=2)
    out2, h2, w2 = cbr_forward(out1, n, h1, w1, params["cbr2"], stride=2)
    out2 = spp_forward(out2, n, h2, w2, params["spp"])

    # FPN inputs are [P5, P4, P3] = [out2, out1, x]
    o3, o4, o5 = fpn_forward([(out2, h2, w2), (out1, h1, w1), (x_cm, h, w)],
                             n, params["fpn"])
    # PAN inputs are [P5, P4, P3] = [O5, O4, O3]
    b3, b4, b5 = pan_forward([o5, o4, o3], n, params["pan"])

    outs = []
    for cm, hh, ww in (b3, b4, b5):                    # back to NCHW
        cc = cm.shape[0]
        outs.append(jnp.transpose(cm.reshape(cc, n, hh, ww), (1, 0, 2, 3)))
    return outs


# --------------------------------------------------------------------------------------
# Deterministic parameter initialization (synthetic; kernel-friendly layouts)
#   cbr w:  (Cout, 9*Cin)   == PyTorch (Cout, Cin, 3, 3) with column (3*ky+kx)*Cin + ci
#   ds dw:  (9, C, 1)       == PyTorch (C, 1, 3, 3) depthwise weight, tap-major
#   ds pw / 1x1 w: (Cout, Cin)
# --------------------------------------------------------------------------------------

def init_params(key, c4, c3):
    ks = iter(jax.random.split(key, 64))

    def nrm(shape, s=0.1):
        return jax.random.normal(next(ks), shape, jnp.float32) * s

    def cbr(c):
        return dict(w=nrm((c, 9 * c)),
                    gamma=1.0 + nrm((c, 1), 0.05),
                    beta=nrm((c, 1), 0.05),
                    alpha=jnp.full((c, 1), 0.25, jnp.float32))   # PReLU default init

    def ds(cin, cout):
        return dict(dw=nrm((9, cin, 1)), pw=nrm((cout, cin)))

    c_ = c4 // 2
    return dict(
        cbr1=cbr(c4),
        cbr2=cbr(c4),
        spp=dict(w1=nrm((c_, c4)), b1=nrm((c_, 1), 0.05),
                 w2=nrm((4, c4, c_)), b2=nrm((c4, 1), 0.05)),
        fpn=dict(lat=[dict(w=nrm((c3, c4)), b=nrm((c3, 1), 0.05)) for _ in range(3)],
                 out=[ds(c3, c3) for _ in range(3)]),
        pan=dict(bu=[ds(c3, c3) for _ in range(2)],
                 sm=[ds(c3, c3) for _ in range(3)]),
    )


if __name__ == "__main__":
    key = jax.random.PRNGKey(0)
    k_in, k_par = jax.random.split(key)

    # model_cfg['chanels'][4] = 16, model_cfg['chanels'][3] = 8
    C4, C3 = 16, 8
    N, H, W = 2, 16, 16

    x = jax.random.normal(k_in, (N, C4, H, W), jnp.float32)      # PyTorch-style NCHW
    params = init_params(k_par, C4, C3)

    fwd = jax.jit(lambda p, xx: detect_head_forward(p, (xx, xx, xx)))
    outs = jax.block_until_ready(fwd(params, x))

    assert outs[0].shape == (N, C3, H, W)
    assert outs[1].shape == (N, C3, H // 2, W // 2)
    assert outs[2].shape == (N, C3, H // 4, W // 4)
    assert all(bool(jnp.all(jnp.isfinite(o))) for o in outs)
    print("KERNEL_OK")
</pallas_src>

<mosaic_0001>
module attributes {stable_mosaic.version = 11 : i64} {
  func.func @_cbr_kernel(%arg0: memref<144x128xf32, #tpu.memory_space<vmem>>, %arg1: memref<16x144xf32, #tpu.memory_space<vmem>>, %arg2: memref<16x1xf32, #tpu.memory_space<vmem>>, %arg3: memref<16x1xf32, #tpu.memory_space<vmem>>, %arg4: memref<16x1xf32, #tpu.memory_space<vmem>>, %arg5: memref<16x128xf32, #tpu.memory_space<vmem>>) attributes {dimension_semantics = [], scalar_prefetch = 0 : i64, scratch_operands = 0 : i64, tpu.core_type = #tpu.core_type<tc>} {
    %c0 = arith.constant 0 : index
    %c0_0 = arith.constant 0 : index
    %0 = vector.load %arg1[%c0, %c0_0] : memref<16x144xf32, #tpu.memory_space<vmem>>, vector<16x144xf32>
    %c0_1 = arith.constant 0 : index
    %c0_2 = arith.constant 0 : index
    %1 = vector.load %arg0[%c0_1, %c0_2] : memref<144x128xf32, #tpu.memory_space<vmem>>, vector<144x128xf32>
    %cst = arith.constant dense<0.000000e+00> : vector<16x128xf32>
    %2 = tpu.matmul %0, %1, %cst {dimension_numbers = #tpu.dot_dimension_numbers<[1], [0], [0], [1], [0, 0, 1, 1], [], []>} : vector<16x144xf32>, vector<144x128xf32>, vector<16x128xf32> -> vector<16x128xf32>
    %cst_3 = arith.constant dense<0.000000e+00> : vector<16xf32>
    %3 = vector.multi_reduction <add>, %2, %cst_3 [1] : vector<16x128xf32> to vector<16xf32>
    %4 = vector.shape_cast %3 : vector<16xf32> to vector<16x1xf32>
    %cst_4 = arith.constant 7.812500e-03 : f32
    %5 = vector.broadcast %cst_4 : f32 to vector<16x1xf32>
    %6 = arith.mulf %4, %5 : vector<16x1xf32>
    %7 = vector.broadcast %6 : vector<16x1xf32> to vector<16x128xf32>
    %8 = arith.subf %2, %7 : vector<16x128xf32>
    %9 = arith.mulf %8, %8 : vector<16x128xf32>
    %cst_5 = arith.constant dense<0.000000e+00> : vector<16xf32>
    %10 = vector.multi_reduction <add>, %9, %cst_5 [1] : vector<16x128xf32> to vector<16xf32>
    %11 = vector.shape_cast %10 : vector<16xf32> to vector<16x1xf32>
    %cst_6 = arith.constant 7.812500e-03 : f32
    %12 = vector.broadcast %cst_6 : f32 to vector<16x1xf32>
    %13 = arith.mulf %11, %12 : vector<16x1xf32>
    %c0_7 = arith.constant 0 : index
    %c0_8 = arith.constant 0 : index
    %14 = vector.load %arg2[%c0_7, %c0_8] : memref<16x1xf32, #tpu.memory_space<vmem>>, vector<16x1xf32>
    %15 = vector.broadcast %14 : vector<16x1xf32> to vector<16x128xf32>
    %16 = arith.mulf %15, %8 : vector<16x128xf32>
    %cst_9 = arith.constant 9.99999974E-6 : f32
    %17 = vector.broadcast %cst_9 : f32 to vector<16x1xf32>
    %18 = arith.addf %13, %17 : vector<16x1xf32>
    %19 = math.rsqrt %18 : vector<16x1xf32>
    %20 = vector.broadcast %19 : vector<16x1xf32> to vector<16x128xf32>
    %21 = arith.mulf %16, %20 : vector<16x128xf32>
    %c0_10 = arith.constant 0 : index
    %c0_11 = arith.constant 0 : index
    %22 = vector.load %arg3[%c0_10, %c0_11] : memref<16x1xf32, #tpu.memory_space<vmem>>, vector<16x1xf32>
    %23 = vector.broadcast %22 : vector<16x1xf32> to vector<16x128xf32>
    %24 = arith.addf %21, %23 : vector<16x128xf32>
    %cst_12 = arith.constant 0.000000e+00 : f32
    %25 = vector.broadcast %cst_12 : f32 to vector<16x128xf32>
    %26 = arith.cmpf oge, %24, %25 : vector<16x128xf32>
    %c0_13 = arith.constant 0 : index
    %c0_14 = arith.constant 0 : index
    %27 = vector.load %arg4[%c0_13, %c0_14] : memref<16x1xf32, #tpu.memory_space<vmem>>, vector<16x1xf32>
    %28 = vector.broadcast %27 : vector<16x1xf32> to vector<16x128xf32>
    %29 = arith.mulf %28, %24 : vector<16x128xf32>
    %30 = arith.select %26, %24, %29 : vector<16x128xi1>, vector<16x128xf32>
    %c0_15 = arith.constant 0 : index
    %c0_16 = arith.constant 0 : index
    %31 = vector.load %arg5[%c0_15, %c0_16] : memref<16x128xf32, #tpu.memory_space<vmem>>, vector<16x128xf32>
    tpu.vector_store %arg5[%c0_15, %c0_16], %30 {strides = array<i32>} : memref<16x128xf32, #tpu.memory_space<vmem>>, vector<16x128xf32>,
    return
  }
}

module attributes {stable_mosaic.version = 11 : i64} {
  func.func @_cbr_kernel(%arg0: memref<144x32xf32, #tpu.memory_space<vmem>>, %arg1: memref<16x144xf32, #tpu.memory_space<vmem>>, %arg2: memref<16x1xf32, #tpu.memory_space<vmem>>, %arg3: memref<16x1xf32, #tpu.memory_space<vmem>>, %arg4: memref<16x1xf32, #tpu.memory_space<vmem>>, %arg5: memref<16x32xf32, #tpu.memory_space<vmem>>) attributes {dimension_semantics = [], scalar_prefetch = 0 : i64, scratch_operands = 0 : i64, tpu.core_type = #tpu.core_type<tc>} {
    %c0 = arith.constant 0 : index
    %c0_0 = arith.constant 0 : index
    %0 = vector.load %arg1[%c0, %c0_0] : memref<16x144xf32, #tpu.memory_space<vmem>>, vector<16x144xf32>
    %c0_1 = arith.constant 0 : index
    %c0_2 = arith.constant 0 : index
    %1 = vector.load %arg0[%c0_1, %c0_2] : memref<144x32xf32, #tpu.memory_space<vmem>>, vector<144x32xf32>
    %cst = arith.constant dense<0.000000e+00> : vector<16x32xf32>
    %2 = tpu.matmul %0, %1, %cst {dimension_numbers = #tpu.dot_dimension_numbers<[1], [0], [0], [1], [0, 0, 1, 1], [], []>} : vector<16x144xf32>, vector<144x32xf32>, vector<16x32xf32> -> vector<16x32xf32>
    %cst_3 = arith.constant dense<0.000000e+00> : vector<16xf32>
    %3 = vector.multi_reduction <add>, %2, %cst_3 [1] : vector<16x32xf32> to vector<16xf32>
    %4 = vector.shape_cast %3 : vector<16xf32> to vector<16x1xf32>
    %cst_4 = arith.constant 3.125000e-02 : f32
    %5 = vector.broadcast %cst_4 : f32 to vector<16x1xf32>
    %6 = arith.mulf %4, %5 : vector<16x1xf32>
    %7 = vector.broadcast %6 : vector<16x1xf32> to vector<16x32xf32>
    %8 = arith.subf %2, %7 : vector<16x32xf32>
    %9 = arith.mulf %8, %8 : vector<16x32xf32>
    %cst_5 = arith.constant dense<0.000000e+00> : vector<16xf32>
    %10 = vector.multi_reduction <add>, %9, %cst_5 [1] : vector<16x32xf32> to vector<16xf32>
    %11 = vector.shape_cast %10 : vector<16xf32> to vector<16x1xf32>
    %cst_6 = arith.constant 3.125000e-02 : f32
    %12 = vector.broadcast %cst_6 : f32 to vector<16x1xf32>
    %13 = arith.mulf %11, %12 : vector<16x1xf32>
    %c0_7 = arith.constant 0 : index
    %c0_8 = arith.constant 0 : index
    %14 = vector.load %arg2[%c0_7, %c0_8] : memref<16x1xf32, #tpu.memory_space<vmem>>, vector<16x1xf32>
    %15 = vector.broadcast %14 : vector<16x1xf32> to vector<16x32xf32>
    %16 = arith.mulf %15, %8 : vector<16x32xf32>
    %cst_9 = arith.constant 9.99999974E-6 : f32
    %17 = vector.broadcast %cst_9 : f32 to vector<16x1xf32>
    %18 = arith.addf %13, %17 : vector<16x1xf32>
    %19 = math.rsqrt %18 : vector<16x1xf32>
    %20 = vector.broadcast %19 : vector<16x1xf32> to vector<16x32xf32>
    %21 = arith.mulf %16, %20 : vector<16x32xf32>
    %c0_10 = arith.constant 0 : index
    %c0_11 = arith.constant 0 : index
    %22 = vector.load %arg3[%c0_10, %c0_11] : memref<16x1xf32, #tpu.memory_space<vmem>>, vector<16x1xf32>
    %23 = vector.broadcast %22 : vector<16x1xf32> to vector<16x32xf32>
    %24 = arith.addf %21, %23 : vector<16x32xf32>
    %cst_12 = arith.constant 0.000000e+00 : f32
    %25 = vector.broadcast %cst_12 : f32 to vector<16x32xf32>
    %26 = arith.cmpf oge, %24, %25 : vector<16x32xf32>
    %c0_13 = arith.constant 0 : index
    %c0_14 = arith.constant 0 : index
    %27 = vector.load %arg4[%c0_13, %c0_14] : memref<16x1xf32, #tpu.memory_space<vmem>>, vector<16x1xf32>
    %28 = vector.broadcast %27 : vector<16x1xf32> to vector<16x32xf32>
    %29 = arith.mulf %28, %24 : vector<16x32xf32>
    %30 = arith.select %26, %24, %29 : vector<16x32xi1>, vector<16x32xf32>
    %c0_15 = arith.constant 0 : index
    %c0_16 = arith.constant 0 : index
    %31 = vector.load %arg5[%c0_15, %c0_16] : memref<16x32xf32, #tpu.memory_space<vmem>>, vector<16x32xf32>
    tpu.vector_store %arg5[%c0_15, %c0_16], %30 {strides = array<i32>} : memref<16x32xf32, #tpu.memory_space<vmem>>, vector<16x32xf32>,
    return
  }
}

module attributes {stable_mosaic.version = 11 : i64} {
  func.func @_conv1x1_bias_kernel(%arg0: memref<16x32xf32, #tpu.memory_space<vmem>>, %arg1: memref<8x16xf32, #tpu.memory_space<vmem>>, %arg2: memref<8x1xf32, #tpu.memory_space<vmem>>, %arg3: memref<8x32xf32, #tpu.memory_space<vmem>>) attributes {dimension_semantics = [], scalar_prefetch = 0 : i64, scratch_operands = 0 : i64, tpu.core_type = #tpu.core_type<tc>} {
    %c0 = arith.constant 0 : index
    %c0_0 = arith.constant 0 : index
    %0 = vector.load %arg1[%c0, %c0_0] : memref<8x16xf32, #tpu.memory_space<vmem>>, vector<8x16xf32>
    %c0_1 = arith.constant 0 : index
    %c0_2 = arith.constant 0 : index
    %1 = vector.load %arg0[%c0_1, %c0_2] : memref<16x32xf32, #tpu.memory_space<vmem>>, vector<16x32xf32>
    %cst = arith.constant dense<0.000000e+00> : vector<8x32xf32>
    %2 = tpu.matmul %0, %1, %cst {dimension_numbers = #tpu.dot_dimension_numbers<[1], [0], [0], [1], [0, 0, 1, 1], [], []>} : vector<8x16xf32>, vector<16x32xf32>, vector<8x32xf32> -> vector<8x32xf32>
    %c0_3 = arith.constant 0 : index
    %c0_4 = arith.constant 0 : index
    %3 = vector.load %arg2[%c0_3, %c0_4] : memref<8x1xf32, #tpu.memory_space<vmem>>, vector<8x1xf32>
    %4 = vector.broadcast %3 : vector<8x1xf32> to vector<8x32xf32>
    %5 = arith.addf %2, %4 : vector<8x32xf32>
    %c0_5 = arith.constant 0 : index
    %c0_6 = arith.constant 0 : index
    %6 = vector.load %arg3[%c0_5, %c0_6] : memref<8x32xf32, #tpu.memory_space<vmem>>, vector<8x32xf32>
    tpu.vector_store %arg3[%c0_5, %c0_6], %5 {strides = array<i32>} : memref<8x32xf32, #tpu.memory_space<vmem>>, vector<8x32xf32>,
    return
  }
}

module attributes {stable_mosaic.version = 11 : i64} {
  func.func @_spp_kernel(%arg0: memref<16x32xf32, #tpu.memory_space<vmem>>, %arg1: memref<8x16xf32, #tpu.memory_space<vmem>>, %arg2: memref<8x1xf32, #tpu.memory_space<vmem>>, %arg3: memref<4x16x8xf32, #tpu.memory_space<vmem>>, %arg4: memref<16x1xf32, #tpu.memory_space<vmem>>, %arg5: memref<1x32xi32, #tpu.memory_space<vmem>>, %arg6: memref<1x32xi32, #tpu.memory_space<vmem>>, %arg7: memref<1x32xi32, #tpu.memory_space<vmem>>, %arg8: memref<16x32xf32, #tpu.memory_space<vmem>>) attributes {dimension_semantics = [], scalar_prefetch = 0 : i64, scratch_operands = 0 : i64, tpu.core_type = #tpu.core_type<tc>} {
    %c0 = arith.constant 0 : index
    %c0_0 = arith.constant 0 : index
    %0 = vector.load %arg1[%c0, %c0_0] : memref<8x16xf32, #tpu.memory_space<vmem>>, vector<8x16xf32>
    %c0_1 = arith.constant 0 : index
    %c0_2 = arith.constant 0 : index
    %1 = vector.load %arg0[%c0_1, %c0_2] : memref<16x32xf32, #tpu.memory_space<vmem>>, vector<16x32xf32>
    %cst = arith.constant dense<0.000000e+00> : vector<8x32xf32>
    %2 = tpu.matmul %0, %1, %cst {dimension_numbers = #tpu.dot_dimension_numbers<[1], [0], [0], [1], [0, 0, 1, 1], [], []>} : vector<8x16xf32>, vector<16x32xf32>, vector<8x32xf32> -> vector<8x32xf32>
    %c0_3 = arith.constant 0 : index
    %c0_4 = arith.constant 0 : index
    %3 = vector.load %arg2[%c0_3, %c0_4] : memref<8x1xf32, #tpu.memory_space<vmem>>, vector<8x1xf32>
    %4 = vector.broadcast %3 : vector<8x1xf32> to vector<8x32xf32>
    %5 = arith.addf %2, %4 : vector<8x32xf32>
    %c0_5 = arith.constant 0 : index
    %c0_6 = arith.constant 0 : index
    %6 = vector.load %arg5[%c0_5, %c0_6] : memref<1x32xi32, #tpu.memory_space<vmem>>, vector<1x32xi32>
    %c0_7 = arith.constant 0 : index
    %c0_8 = arith.constant 0 : index
    %7 = vector.load %arg6[%c0_7, %c0_8] : memref<1x32xi32, #tpu.memory_space<vmem>>, vector<1x32xi32>
    %c0_9 = arith.constant 0 : index
    %c0_10 = arith.constant 0 : index
    %8 = vector.load %arg7[%c0_9, %c0_10] : memref<1x32xi32, #tpu.memory_space<vmem>>, vector<1x32xi32>
    %c1_i32 = arith.constant 1 : i32
    %9 = tpu.dynamic_rotate %7 by %c1_i32 dim 1 : vector<1x32xi32>, i32 -> vector<1x32xi32>
    %c1_i32_11 = arith.constant 1 : i32
    %10 = tpu.dynamic_rotate %6 by %c1_i32_11 dim 1 : vector<1x32xi32>, i32 -> vector<1x32xi32>
    %11 = arith.cmpi eq, %9, %7 : vector<1x32xi32>
    %12 = arith.subi %10, %6 : vector<1x32xi32>
    %13 = math.absi %12 : vector<1x32xi32>
    %c1_i32_12 = arith.constant 1 : i32
    %14 = vector.broadcast %c1_i32_12 : i32 to vector<1x32xi32>
    %15 = arith.cmpi eq, %13, %14 : vector<1x32xi32>
    %16 = arith.andi %11, %15 : vector<1x32xi1>
    %c31_i32 = arith.constant 31 : i32
    %17 = tpu.dynamic_rotate %7 by %c31_i32 dim 1 : vector<1x32xi32>, i32 -> vector<1x32xi32>
    %c31_i32_13 = arith.constant 31 : i32
    %18 = tpu.dynamic_rotate %6 by %c31_i32_13 dim 1 : vector<1x32xi32>, i32 -> vector<1x32xi32>
    %19 = arith.cmpi eq, %17, %7 : vector<1x32xi32>
    %20 = arith.subi %18, %6 : vector<1x32xi32>
    %21 = math.absi %20 : vector<1x32xi32>
    %c1_i32_14 = arith.constant 1 : i32
    %22 = vector.broadcast %c1_i32_14 : i32 to vector<1x32xi32>
    %23 = arith.cmpi eq, %21, %22 : vector<1x32xi32>
    %24 = arith.andi %19, %23 : vector<1x32xi1>
    %c2_i32 = arith.constant 2 : i32
    %25 = tpu.dynamic_rotate %7 by %c2_i32 dim 1 : vector<1x32xi32>, i32 -> vector<1x32xi32>
    %c2_i32_15 = arith.constant 2 : i32
    %26 = tpu.dynamic_rotate %6 by %c2_i32_15 dim 1 : vector<1x32xi32>, i32 -> vector<1x32xi32>
    %27 = arith.cmpi eq, %25, %7 : vector<1x32xi32>
    %28 = arith.subi %26, %6 : vector<1x32xi32>
    %29 = math.absi %28 : vector<1x32xi32>
    %c2_i32_16 = arith.constant 2 : i32
    %30 = vector.broadcast %c2_i32_16 : i32 to vector<1x32xi32>
    %31 = arith.cmpi eq, %29, %30 : vector<1x32xi32>
    %32 = arith.andi %27, %31 : vector<1x32xi1>
    %c30_i32 = arith.constant 30 : i32
    %33 = tpu.dynamic_rotate %7 by %c30_i32 dim 1 : vector<1x32xi32>, i32 -> vector<1x32xi32>
    %c30_i32_17 = arith.constant 30 : i32
    %34 = tpu.dynamic_rotate %6 by %c30_i32_17 dim 1 : vector<1x32xi32>, i32 -> vector<1x32xi32>
    %35 = arith.cmpi eq, %33, %7 : vector<1x32xi32>
    %36 = arith.subi %34, %6 : vector<1x32xi32>
    %37 = math.absi %36 : vector<1x32xi32>
    %c2_i32_18 = arith.constant 2 : i32
    %38 = vector.broadcast %c2_i32_18 : i32 to vector<1x32xi32>
    %39 = arith.cmpi eq, %37, %38 : vector<1x32xi32>
    %40 = arith.andi %35, %39 : vector<1x32xi1>
    %c4_i32 = arith.constant 4 : i32
    %41 = tpu.dynamic_rotate %8 by %c4_i32 dim 1 : vector<1x32xi32>, i32 -> vector<1x32xi32>
    %c4_i32_19 = arith.constant 4 : i32
    %42 = tpu.dynamic_rotate %6 by %c4_i32_19 dim 1 : vector<1x32xi32>, i32 -> vector<1x32xi32>
    %c4_i32_20 = arith.constant 4 : i32
    %43 = tpu.dynamic_rotate %7 by %c4_i32_20 dim 1 : vector<1x32xi32>, i32 -> vector<1x32xi32>
    %44 = arith.cmpi eq, %41, %8 : vector<1x32xi32>
    %45 = arith.cmpi eq, %42, %6 : vector<1x32xi32>
    %46 = arith.andi %44, %45 : vector<1x32xi1>
    %47 = arith.subi %43, %7 : vector<1x32xi32>
    %48 = math.absi %47 : vector<1x32xi32>
    %c1_i32_21 = arith.constant 1 : i32
    %49 = vector.broadcast %c1_i32_21 : i32 to vector<1x32xi32>
    %50 = arith.cmpi eq, %48, %49 : vector<1x32xi32>
    %51 = arith.andi %46, %50 : vector<1x32xi1>
    %c28_i32 = arith.constant 28 : i32
    %52 = tpu.dynamic_rotate %8 by %c28_i32 dim 1 : vector<1x32xi32>, i32 -> vector<1x32xi32>
    %c28_i32_22 = arith.constant 28 : i32
    %53 = tpu.dynamic_rotate %6 by %c28_i32_22 dim 1 : vector<1x32xi32>, i32 -> vector<1x32xi32>
    %c28_i32_23 = arith.constant 28 : i32
    %54 = tpu.dynamic_rotate %7 by %c28_i32_23 dim 1 : vector<1x32xi32>, i32 -> vector<1x32xi32>
    %55 = arith.cmpi eq, %52, %8 : vector<1x32xi32>
    %56 = arith.cmpi eq, %53, %6 : vector<1x32xi32>
    %57 = arith.andi %55, %56 : vector<1x32xi1>
    %58 = arith.subi %54, %7 : vector<1x32xi32>
    %59 = math.absi %58 : vector<1x32xi32>
    %c1_i32_24 = arith.constant 1 : i32
    %60 = vector.broadcast %c1_i32_24 : i32 to vector<1x32xi32>
    %61 = arith.cmpi eq, %59, %60 : vector<1x32xi32>
    %62 = arith.andi %57, %61 : vector<1x32xi1>
    %c8_i32 = arith.constant 8 : i32
    %63 = tpu.dynamic_rotate %8 by %c8_i32 dim 1 : vector<1x32xi32>, i32 -> vector<1x32xi32>
    %c8_i32_25 = arith.constant 8 : i32
    %64 = tpu.dynamic_rotate %6 by %c8_i32_25 dim 1 : vector<1x32xi32>, i32 -> vector<1x32xi32>
    %c8_i32_26 = arith.constant 8 : i32
    %65 = tpu.dynamic_rotate %7 by %c8_i32_26 dim 1 : vector<1x32xi32>, i32 -> vector<1x32xi32>
    %66 = arith.cmpi eq, %63, %8 : vector<1x32xi32>
    %67 = arith.cmpi eq, %64, %6 : vector<1x32xi32>
    %68 = arith.andi %66, %67 : vector<1x32xi1>
    %69 = arith.subi %65, %7 : vector<1x32xi32>
    %70 = math.absi %69 : vector<1x32xi32>
    %c2_i32_27 = arith.constant 2 : i32
    %71 = vector.broadcast %c2_i32_27 : i32 to vector<1x32xi32>
    %72 = arith.cmpi eq, %70, %71 : vector<1x32xi32>
    %73 = arith.andi %68, %72 : vector<1x32xi1>
    %c24_i32 = arith.constant 24 : i32
    %74 = tpu.dynamic_rotate %8 by %c24_i32 dim 1 : vector<1x32xi32>, i32 -> vector<1x32xi32>
    %c24_i32_28 = arith.constant 24 : i32
    %75 = tpu.dynamic_rotate %6 by %c24_i32_28 dim 1 : vector<1x32xi32>, i32 -> vector<1x32xi32>
    %c24_i32_29 = arith.constant 24 : i32
    %76 = tpu.dynamic_rotate %7 by %c24_i32_29 dim 1 : vector<1x32xi32>, i32 -> vector<1x32xi32>
    %77 = arith.cmpi eq, %74, %8 : vector<1x32xi32>
    %78 = arith.cmpi eq, %75, %6 : vector<1x32xi32>
    %79 = arith.andi %77, %78 : vector<1x32xi1>
    %80 = arith.subi %76, %7 : vector<1x32xi32>
    %81 = math.absi %80 : vector<1x32xi32>
    %c2_i32_30 = arith.constant 2 : i32
    %82 = vector.broadcast %c2_i32_30 : i32 to vector<1x32xi32>
    %83 = arith.cmpi eq, %81, %82 : vector<1x32xi32>
    %84 = arith.andi %79, %83 : vector<1x32xi1>
    %c0_31 = arith.constant 0 : index
    %c0_32 = arith.constant 0 : index
    %c0_33 = arith.constant 0 : index
    %85 = vector.load %arg3[%c0_31, %c0_32, %c0_33] : memref<4x16x8xf32, #tpu.memory_space<vmem>>, vector<1x16x8xf32>
    %86 = vector.shape_cast %85 : vector<1x16x8xf32> to vector<16x8xf32>
    %cst_34 = arith.constant dense<0.000000e+00> : vector<16x32xf32>
    %87 = tpu.matmul %86, %5, %cst_34 {dimension_numbers = #tpu.dot_dimension_numbers<[1], [0], [0], [1], [0, 0, 1, 1], [], []>} : vector<16x8xf32>, vector<8x32xf32>, vector<16x32xf32> -> vector<16x32xf32>
    %c0_35 = arith.constant 0 : index
    %c0_36 = arith.constant 0 : index
    %88 = vector.load %arg4[%c0_35, %c0_36] : memref<16x1xf32, #tpu.memory_space<vmem>>, vector<16x1xf32>
    %89 = vector.broadcast %88 : vector<16x1xf32> to vector<16x32xf32>
    %90 = arith.addf %87, %89 : vector<16x32xf32>
    %c1_i32_37 = arith.constant 1 : i32
    %91 = tpu.dynamic_rotate %5 by %c1_i32_37 dim 1 : vector<8x32xf32>, i32 -> vector<8x32xf32>
    %cst_38 = arith.constant 0xFF800000 : f32
    %92 = vector.shape_cast %16 : vector<1x32xi1> to vector<1x32xi1>
    %93 = vector.broadcast %92 : vector<1x32xi1> to vector<8x32xi1>
    %94 = vector.broadcast %cst_38 : f32 to vector<8x32xf32>
    %95 = arith.select %93, %91, %94 : vector<8x32xi1>, vector<8x32xf32>
    %96 = arith.maximumf %5, %95 : vector<8x32xf32>
    %c31_i32_39 = arith.constant 31 : i32
    %97 = tpu.dynamic_rotate %5 by %c31_i32_39 dim 1 : vector<8x32xf32>, i32 -> vector<8x32xf32>
    %cst_40 = arith.constant 0xFF800000 : f32
    %98 = vector.shape_cast %24 : vector<1x32xi1> to vector<1x32xi1>
    %99 = vector.broadcast %98 : vector<1x32xi1> to vector<8x32xi1>
    %100 = vector.broadcast %cst_40 : f32 to vector<8x32xf32>
    %101 = arith.select %99, %97, %100 : vector<8x32xi1>, vector<8x32xf32>
    %102 = arith.maximumf %96, %101 : vector<8x32xf32>
    %c2_i32_41 = arith.constant 2 : i32
    %103 = tpu.dynamic_rotate %5 by %c2_i32_41 dim 1 : vector<8x32xf32>, i32 -> vector<8x32xf32>
    %cst_42 = arith.constant 0xFF800000 : f32
    %104 = vector.shape_cast %32 : vector<1x32xi1> to vector<1x32xi1>
    %105 = vector.broadcast %104 : vector<1x32xi1> to vector<8x32xi1>
    %106 = vector.broadcast %cst_42 : f32 to vector<8x32xf32>
    %107 = arith.select %105, %103, %106 : vector<8x32xi1>, vector<8x32xf32>
    %108 = arith.maximumf %102, %107 : vector<8x32xf32>
    %c30_i32_43 = arith.constant 30 : i32
    %109 = tpu.dynamic_rotate %5 by %c30_i32_43 dim 1 : vector<8x32xf32>, i32 -> vector<8x32xf32>
    %cst_44 = arith.constant 0xFF800000 : f32
    %110 = vector.shape_cast %40 : vector<1x32xi1> to vector<1x32xi1>
    %111 = vector.broadcast %110 : vector<1x32xi1> to vector<8x32xi1>
    %112 = vector.broadcast %cst_44 : f32 to vector<8x32xf32>
    %113 = arith.select %111, %109, %112 : vector<8x32xi1>, vector<8x32xf32>
    %114 = arith.maximumf %108, %113 : vector<8x32xf32>
    %c4_i32_45 = arith.constant 4 : i32
    %115 = tpu.dynamic_rotate %114 by %c4_i32_45 dim 1 : vector<8x32xf32>, i32 -> vector<8x32xf32>
    %cst_46 = arith.constant 0xFF800000 : f32
    %116 = vector.shape_cast %51 : vector<1x32xi1> to vector<1x32xi1>
    %117 = vector.broadcast %116 : vector<1x32xi1> to vector<8x32xi1>
    %118 = vector.broadcast %cst_46 : f32 to vector<8x32xf32>
    %119 = arith.select %117, %115, %118 : vector<8x32xi1>, vector<8x32xf32>
    %120 = arith.maximumf %114, %119 : vector<8x32xf32>
    %c28_i32_47 = arith.constant 28 : i32
    %121 = tpu.dynamic_rotate %114 by %c28_i32_47 dim 1 : vector<8x32xf32>, i32 -> vector<8x32xf32>
    %cst_48 = arith.constant 0xFF800000 : f32
    %122 = vector.shape_cast %62 : vector<1x32xi1> to vector<1x32xi1>
    %123 = vector.broadcast %122 : vector<1x32xi1> to vector<8x32xi1>
    %124 = vector.broadcast %cst_48 : f32 to vector<8x32xf32>
    %125 = arith.select %123, %121, %124 : vector<8x32xi1>, vector<8x32xf32>
    %126 = arith.maximumf %120, %125 : vector<8x32xf32>
    %c8_i32_49 = arith.constant 8 : i32
    %127 = tpu.dynamic_rotate %114 by %c8_i32_49 dim 1 : vector<8x32xf32>, i32 -> vector<8x32xf32>
    %cst_50 = arith.constant 0xFF800000 : f32
    %128 = vector.shape_cast %73 : vector<1x32xi1> to vector<1x32xi1>
    %129 = vector.broadcast %128 : vector<1x32xi1> to vector<8x32xi1>
    %130 = vector.broadcast %cst_50 : f32 to vector<8x32xf32>
    %131 = arith.select %129, %127, %130 : vector<8x32xi1>, vector<8x32xf32>
    %132 = arith.maximumf %126, %131 : vector<8x32xf32>
    %c24_i32_51 = arith.constant 24 : i32
    %133 = tpu.dynamic_rotate %114 by %c24_i32_51 dim 1 : vector<8x32xf32>, i32 -> vector<8x32xf32>
    %cst_52 = arith.constant 0xFF800000 : f32
    %134 = vector.shape_cast %84 : vector<1x32xi1> to vector<1x32xi1>
    %135 = vector.broadcast %134 : vector<1x32xi1> to vector<8x32xi1>
    %136 = vector.broadcast %cst_52 : f32 to vector<8x32xf32>
    %137 = arith.select %135, %133, %136 : vector<8x32xi1>, vector<8x32xf32>
    %138 = arith.maximumf %132, %137 : vector<8x32xf32>
    %c1 = arith.constant 1 : index
    %c0_53 = arith.constant 0 : index
    %c0_54 = arith.constant 0 : index
    %139 = vector.load %arg3[%c1, %c0_53, %c0_54] : memref<4x16x8xf32, #tpu.memory_space<vmem>>, vector<1x16x8xf32>
    %140 = vector.shape_cast %139 : vector<1x16x8xf32> to vector<16x8xf32>
    %cst_55 = arith.constant dense<0.000000e+00> : vector<16x32xf32>
    %141 = tpu.matmul %140, %138, %cst_55 {dimension_numbers = #tpu.dot_dimension_numbers<[1], [0], [0], [1], [0, 0, 1, 1], [], []>} : vector<16x8xf32>, vector<8x32xf32>, vector<16x32xf32> -> vector<16x32xf32>
    %142 = arith.addf %90, %141 : vector<16x32xf32>
    %c1_i32_56 = arith.constant 1 : i32
    %143 = tpu.dynamic_rotate %138 by %c1_i32_56 dim 1 : vector<8x32xf32>, i32 -> vector<8x32xf32>
    %cst_57 = arith.constant 0xFF800000 : f32
    %144 = vector.shape_cast %16 : vector<1x32xi1> to vector<1x32xi1>
    %145 = vector.broadcast %144 : vector<1x32xi1> to vector<8x32xi1>
    %146 = vector.broadcast %cst_57 : f32 to vector<8x32xf32>
    %147 = arith.select %145, %143, %146 : vector<8x32xi1>, vector<8x32xf32>
    %148 = arith.maximumf %138, %147 : vector<8x32xf32>
    %c31_i32_58 = arith.constant 31 : i32
    %149 = tpu.dynamic_rotate %138 by %c31_i32_58 dim 1 : vector<8x32xf32>, i32 -> vector<8x32xf32>
    %cst_59 = arith.constant 0xFF800000 : f32
    %150 = vector.shape_cast %24 : vector<1x32xi1> to vector<1x32xi1>
    %151 = vector.broadcast %150 : vector<1x32xi1> to vector<8x32xi1>
    %152 = vector.broadcast %cst_59 : f32 to vector<8x32xf32>
    %153 = arith.select %151, %149, %152 : vector<8x32xi1>, vector<8x32xf32>
    %154 = arith.maximumf %148, %153 : vector<8x32xf32>
    %c2_i32_60 = arith.constant 2 : i32
    %155 = tpu.dynamic_rotate %138 by %c2_i32_60 dim 1 : vector<8x32xf32>, i32 -> vector<8x32xf32>
    %cst_61 = arith.constant 0xFF800000 : f32
    %156 = vector.shape_cast %32 : vector<1x32xi1> to vector<1x32xi1>
    %157 = vector.broadcast %156 : vector<1x32xi1> to vector<8x32xi1>
    %158 = vector.broadcast %cst_61 : f32 to vector<8x32xf32>
    %159 = arith.select %157, %155, %158 : vector<8x32xi1>, vector<8x32xf32>
    %160 = arith.maximumf %154, %159 : vector<8x32xf32>
    %c30_i32_62 = arith.constant 30 : i32
    %161 = tpu.dynamic_rotate %138 by %c30_i32_62 dim 1 : vector<8x32xf32>, i32 -> vector<8x32xf32>
    %cst_63 = arith.constant 0xFF800000 : f32
    %162 = vector.shape_cast %40 : vector<1x32xi1> to vector<1x32xi1>
    %163 = vector.broadcast %162 : vector<1x32xi1> to vector<8x32xi1>
    %164 = vector.broadcast %cst_63 : f32 to vector<8x32xf32>
    %165 = arith.select %163, %161, %164 : vector<8x32xi1>, vector<8x32xf32>
    %166 = arith.maximumf %160, %165 : vector<8x32xf32>
    %c4_i32_64 = arith.constant 4 : i32
    %167 = tpu.dynamic_rotate %166 by %c4_i32_64 dim 1 : vector<8x32xf32>, i32 -> vector<8x32xf32>
    %cst_65 = arith.constant 0xFF800000 : f32
    %168 = vector.shape_cast %51 : vector<1x32xi1> to vector<1x32xi1>
    %169 = vector.broadcast %168 : vector<1x32xi1> to vector<8x32xi1>
    %170 = vector.broadcast %cst_65 : f32 to vector<8x32xf32>
    %171 = arith.select %169, %167, %170 : vector<8x32xi1>, vector<8x32xf32>
    %172 = arith.maximumf %166, %171 : vector<8x32xf32>
    %c28_i32_66 = arith.constant 28 : i32
    %173 = tpu.dynamic_rotate %166 by %c28_i32_66 dim 1 : vector<8x32xf32>, i32 -> vector<8x32xf32>
    %cst_67 = arith.constant 0xFF800000 : f32
    %174 = vector.shape_cast %62 : vector<1x32xi1> to vector<1x32xi1>
    %175 = vector.broadcast %174 : vector<1x32xi1> to vector<8x32xi1>
    %176 = vector.broadcast %cst_67 : f32 to vector<8x32xf32>
    %177 = arith.select %175, %173, %176 : vector<8x32xi1>, vector<8x32xf32>
    %178 = arith.maximumf %172, %177 : vector<8x32xf32>
    %c8_i32_68 = arith.constant 8 : i32
    %179 = tpu.dynamic_rotate %166 by %c8_i32_68 dim 1 : vector<8x32xf32>, i32 -> vector<8x32xf32>
    %cst_69 = arith.constant 0xFF800000 : f32
    %180 = vector.shape_cast %73 : vector<1x32xi1> to vector<1x32xi1>
    %181 = vector.broadcast %180 : vector<1x32xi1> to vector<8x32xi1>
    %182 = vector.broadcast %cst_69 : f32 to vector<8x32xf32>
    %183 = arith.select %181, %179, %182 : vector<8x32xi1>, vector<8x32xf32>
    %184 = arith.maximumf %178, %183 : vector<8x32xf32>
    %c24_i32_70 = arith.constant 24 : i32
    %185 = tpu.dynamic_rotate %166 by %c24_i32_70 dim 1 : vector<8x32xf32>, i32 -> vector<8x32xf32>
    %cst_71 = arith.constant 0xFF800000 : f32
    %186 = vector.shape_cast %84 : vector<1x32xi1> to vector<1x32xi1>
    %187 = vector.broadcast %186 : vector<1x32xi1> to vector<8x32xi1>
    %188 = vector.broadcast %cst_71 : f32 to vector<8x32xf32>
    %189 = arith.select %187, %185, %188 : vector<8x32xi1>, vector<8x32xf32>
    %190 = arith.maximumf %184, %189 : vector<8x32xf32>
    %c2 = arith.constant 2 : index
    %c0_72 = arith.constant 0 : index
    %c0_73 = arith.constant 0 : index
    %191 = vector.load %arg3[%c2, %c0_72, %c0_73] : memref<4x16x8xf32, #tpu.memory_space<vmem>>, vector<1x16x8xf32>
    %192 = vector.shape_cast %191 : vector<1x16x8xf32> to vector<16x8xf32>
    %cst_74 = arith.constant dense<0.000000e+00> : vector<16x32xf32>
    %193 = tpu.matmul %192, %190, %cst_74 {dimension_numbers = #tpu.dot_dimension_numbers<[1], [0], [0], [1], [0, 0, 1, 1], [], []>} : vector<16x8xf32>, vector<8x32xf32>, vector<16x32xf32> -> vector<16x32xf32>
    %194 = arith.addf %142, %193 : vector<16x32xf32>
    %c1_i32_75 = arith.constant 1 : i32
    %195 = tpu.dynamic_rotate %190 by %c1_i32_75 dim 1 : vector<8x32xf32>, i32 -> vector<8x32xf32>
    %cst_76 = arith.constant 0xFF800000 : f32
    %196 = vector.shape_cast %16 : vector<1x32xi1> to vector<1x32xi1>
    %197 = vector.broadcast %196 : vector<1x32xi1> to vector<8x32xi1>
    %198 = vector.broadcast %cst_76 : f32 to vector<8x32xf32>
    %199 = arith.select %197, %195, %198 : vector<8x32xi1>, vector<8x32xf32>
    %200 = arith.maximumf %190, %199 : vector<8x32xf32>
    %c31_i32_77 = arith.constant 31 : i32
    %201 = tpu.dynamic_rotate %190 by %c31_i32_77 dim 1 : vector<8x32xf32>, i32 -> vector<8x32xf32>
    %cst_78 = arith.constant 0xFF800000 : f32
    %202 = vector.shape_cast %24 : vector<1x32xi1> to vector<1x32xi1>
    %203 = vector.broadcast %202 : vector<1x32xi1> to vector<8x32xi1>
    %204 = vector.broadcast %cst_78 : f32 to vector<8x32xf32>
    %205 = arith.select %203, %201, %204 : vector<8x32xi1>, vector<8x32xf32>
    %206 = arith.maximumf %200, %205 : vector<8x32xf32>
    %c2_i32_79 = arith.constant 2 : i32
    %207 = tpu.dynamic_rotate %190 by %c2_i32_79 dim 1 : vector<8x32xf32>, i32 -> vector<8x32xf32>
    %cst_80 = arith.constant 0xFF800000 : f32
    %208 = vector.shape_cast %32 : vector<1x32xi1> to vector<1x32xi1>
    %209 = vector.broadcast %208 : vector<1x32xi1> to vector<8x32xi1>
    %210 = vector.broadcast %cst_80 : f32 to vector<8x32xf32>
    %211 = arith.select %209, %207, %210 : vector<8x32xi1>, vector<8x32xf32>
    %212 = arith.maximumf %206, %211 : vector<8x32xf32>
    %c30_i32_81 = arith.constant 30 : i32
    %213 = tpu.dynamic_rotate %190 by %c30_i32_81 dim 1 : vector<8x32xf32>, i32 -> vector<8x32xf32>
    %cst_82 = arith.constant 0xFF800000 : f32
    %214 = vector.shape_cast %40 : vector<1x32xi1> to vector<1x32xi1>
    %215 = vector.broadcast %214 : vector<1x32xi1> to vector<8x32xi1>
    %216 = vector.broadcast %cst_82 : f32 to vector<8x32xf32>
    %217 = arith.select %215, %213, %216 : vector<8x32xi1>, vector<8x32xf32>
    %218 = arith.maximumf %212, %217 : vector<8x32xf32>
    %c4_i32_83 = arith.constant 4 : i32
    %219 = tpu.dynamic_rotate %218 by %c4_i32_83 dim 1 : vector<8x32xf32>, i32 -> vector<8x32xf32>
    %cst_84 = arith.constant 0xFF800000 : f32
    %220 = vector.shape_cast %51 : vector<1x32xi1> to vector<1x32xi1>
    %221 = vector.broadcast %220 : vector<1x32xi1> to vector<8x32xi1>
    %222 = vector.broadcast %cst_84 : f32 to vector<8x32xf32>
    %223 = arith.select %221, %219, %222 : vector<8x32xi1>, vector<8x32xf32>
    %224 = arith.maximumf %218, %223 : vector<8x32xf32>
    %c28_i32_85 = arith.constant 28 : i32
    %225 = tpu.dynamic_rotate %218 by %c28_i32_85 dim 1 : vector<8x32xf32>, i32 -> vector<8x32xf32>
    %cst_86 = arith.constant 0xFF800000 : f32
    %226 = vector.shape_cast %62 : vector<1x32xi1> to vector<1x32xi1>
    %227 = vector.broadcast %226 : vector<1x32xi1> to vector<8x32xi1>
    %228 = vector.broadcast %cst_86 : f32 to vector<8x32xf32>
    %229 = arith.select %227, %225, %228 : vector<8x32xi1>, vector<8x32xf32>
    %230 = arith.maximumf %224, %229 : vector<8x32xf32>
    %c8_i32_87 = arith.constant 8 : i32
    %231 = tpu.dynamic_rotate %218 by %c8_i32_87 dim 1 : vector<8x32xf32>, i32 -> vector<8x32xf32>
    %cst_88 = arith.constant 0xFF800000 : f32
    %232 = vector.shape_cast %73 : vector<1x32xi1> to vector<1x32xi1>
    %233 = vector.broadcast %232 : vector<1x32xi1> to vector<8x32xi1>
    %234 = vector.broadcast %cst_88 : f32 to vector<8x32xf32>
    %235 = arith.select %233, %231, %234 : vector<8x32xi1>, vector<8x32xf32>
    %236 = arith.maximumf %230, %235 : vector<8x32xf32>
    %c24_i32_89 = arith.constant 24 : i32
    %237 = tpu.dynamic_rotate %218 by %c24_i32_89 dim 1 : vector<8x32xf32>, i32 -> vector<8x32xf32>
    %cst_90 = arith.constant 0xFF800000 : f32
    %238 = vector.shape_cast %84 : vector<1x32xi1> to vector<1x32xi1>
    %239 = vector.broadcast %238 : vector<1x32xi1> to vector<8x32xi1>
    %240 = vector.broadcast %cst_90 : f32 to vector<8x32xf32>
    %241 = arith.select %239, %237, %240 : vector<8x32xi1>, vector<8x32xf32>
    %242 = arith.maximumf %236, %241 : vector<8x32xf32>
    %c3 = arith.constant 3 : index
    %c0_91 = arith.constant 0 : index
    %c0_92 = arith.constant 0 : index
    %243 = vector.load %arg3[%c3, %c0_91, %c0_92] : memref<4x16x8xf32, #tpu.memory_space<vmem>>, vector<1x16x8xf32>
    %244 = vector.shape_cast %243 : vector<1x16x8xf32> to vector<16x8xf32>
    %cst_93 = arith.constant dense<0.000000e+00> : vector<16x32xf32>
    %245 = tpu.matmul %244, %242, %cst_93 {dimension_numbers = #tpu.dot_dimension_numbers<[1], [0], [0], [1], [0, 0, 1, 1], [], []>} : vector<16x8xf32>, vector<8x32xf32>, vector<16x32xf32> -> vector<16x32xf32>
    %246 = arith.addf %194, %245 : vector<16x32xf32>
    %c0_94 = arith.constant 0 : index
    %c0_95 = arith.constant 0 : index
    %247 = vector.load %arg8[%c0_94, %c0_95] : memref<16x32xf32, #tpu.memory_space<vmem>>, vector<16x32xf32>
    tpu.vector_store %arg8[%c0_94, %c0_95], %246 {strides = array<i32>} : memref<16x32xf32, #tpu.memory_space<vmem>>, vector<16x32xf32>,
    return
  }
}

module attributes {stable_mosaic.version = 11 : i64} {
  func.func @_conv1x1_bias_upadd_kernel(%arg0: memref<16x128xf32, #tpu.memory_space<vmem>>, %arg1: memref<8x16xf32, #tpu.memory_space<vmem>>, %arg2: memref<8x1xf32, #tpu.memory_space<vmem>>, %arg3: memref<8x32xf32, #tpu.memory_space<vmem>>, %arg4: memref<32x128xf32, #tpu.memory_space<vmem>>, %arg5: memref<8x128xf32, #tpu.memory_space<vmem>>) attributes {dimension_semantics = [], scalar_prefetch = 0 : i64, scratch_operands = 0 : i64, tpu.core_type = #tpu.core_type<tc>} {
    %c0 = arith.constant 0 : index
    %c0_0 = arith.constant 0 : index
    %0 = vector.load %arg1[%c0, %c0_0] : memref<8x16xf32, #tpu.memory_space<vmem>>, vector<8x16xf32>
    %c0_1 = arith.constant 0 : index
    %c0_2 = arith.constant 0 : index
    %1 = vector.load %arg0[%c0_1, %c0_2] : memref<16x128xf32, #tpu.memory_space<vmem>>, vector<16x128xf32>
    %cst = arith.constant dense<0.000000e+00> : vector<8x128xf32>
    %2 = tpu.matmul %0, %1, %cst {dimension_numbers = #tpu.dot_dimension_numbers<[1], [0], [0], [1], [0, 0, 1, 1], [], []>} : vector<8x16xf32>, vector<16x128xf32>, vector<8x128xf32> -> vector<8x128xf32>
    %c0_3 = arith.constant 0 : index
    %c0_4 = arith.constant 0 : index
    %3 = vector.load %arg2[%c0_3, %c0_4] : memref<8x1xf32, #tpu.memory_space<vmem>>, vector<8x1xf32>
    %4 = vector.broadcast %3 : vector<8x1xf32> to vector<8x128xf32>
    %5 = arith.addf %2, %4 : vector<8x128xf32>
    %c0_5 = arith.constant 0 : index
    %c0_6 = arith.constant 0 : index
    %6 = vector.load %arg3[%c0_5, %c0_6] : memref<8x32xf32, #tpu.memory_space<vmem>>, vector<8x32xf32>
    %c0_7 = arith.constant 0 : index
    %c0_8 = arith.constant 0 : index
    %7 = vector.load %arg4[%c0_7, %c0_8] : memref<32x128xf32, #tpu.memory_space<vmem>>, vector<32x128xf32>
    %cst_9 = arith.constant dense<0.000000e+00> : vector<8x128xf32>
    %8 = tpu.matmul %6, %7, %cst_9 {dimension_numbers = #tpu.dot_dimension_numbers<[1], [0], [0], [1], [0, 0, 1, 1], [], []>} : vector<8x32xf32>, vector<32x128xf32>, vector<8x128xf32> -> vector<8x128xf32>
    %9 = arith.addf %5, %8 : vector<8x128xf32>
    %c0_10 = arith.constant 0 : index
    %c0_11 = arith.constant 0 : index
    %10 = vector.load %arg5[%c0_10, %c0_11] : memref<8x128xf32, #tpu.memory_space<vmem>>, vector<8x128xf32>
    tpu.vector_store %arg5[%c0_10, %c0_11], %9 {strides = array<i32>} : memref<8x128xf32, #tpu.memory_space<vmem>>, vector<8x128xf32>,
    return
  }
}

module attributes {stable_mosaic.version = 11 : i64} {
  func.func @_conv1x1_bias_upadd_kernel(%arg0: memref<16x512xf32, #tpu.memory_space<vmem>>, %arg1: memref<8x16xf32, #tpu.memory_space<vmem>>, %arg2: memref<8x1xf32, #tpu.memory_space<vmem>>, %arg3: memref<8x128xf32, #tpu.memory_space<vmem>>, %arg4: memref<128x512xf32, #tpu.memory_space<vmem>>, %arg5: memref<8x512xf32, #tpu.memory_space<vmem>>) attributes {dimension_semantics = [], scalar_prefetch = 0 : i64, scratch_operands = 0 : i64, tpu.core_type = #tpu.core_type<tc>} {
    %c0 = arith.constant 0 : index
    %c0_0 = arith.constant 0 : index
    %0 = vector.load %arg1[%c0, %c0_0] : memref<8x16xf32, #tpu.memory_space<vmem>>, vector<8x16xf32>
    %c0_1 = arith.constant 0 : index
    %c0_2 = arith.constant 0 : index
    %1 = vector.load %arg0[%c0_1, %c0_2] : memref<16x512xf32, #tpu.memory_space<vmem>>, vector<16x512xf32>
    %cst = arith.constant dense<0.000000e+00> : vector<8x512xf32>
    %2 = tpu.matmul %0, %1, %cst {dimension_numbers = #tpu.dot_dimension_numbers<[1], [0], [0], [1], [0, 0, 1, 1], [], []>} : vector<8x16xf32>, vector<16x512xf32>, vector<8x512xf32> -> vector<8x512xf32>
    %c0_3 = arith.constant 0 : index
    %c0_4 = arith.constant 0 : index
    %3 = vector.load %arg2[%c0_3, %c0_4] : memref<8x1xf32, #tpu.memory_space<vmem>>, vector<8x1xf32>
    %4 = vector.broadcast %3 : vector<8x1xf32> to vector<8x512xf32>
    %5 = arith.addf %2, %4 : vector<8x512xf32>
    %c0_5 = arith.constant 0 : index
    %c0_6 = arith.constant 0 : index
    %6 = vector.load %arg3[%c0_5, %c0_6] : memref<8x128xf32, #tpu.memory_space<vmem>>, vector<8x128xf32>
    %c0_7 = arith.constant 0 : index
    %c0_8 = arith.constant 0 : index
    %7 = vector.load %arg4[%c0_7, %c0_8] : memref<128x512xf32, #tpu.memory_space<vmem>>, vector<128x512xf32>
    %cst_9 = arith.constant dense<0.000000e+00> : vector<8x512xf32>
    %8 = tpu.matmul %6, %7, %cst_9 {dimension_numbers = #tpu.dot_dimension_numbers<[1], [0], [0], [1], [0, 0, 1, 1], [], []>} : vector<8x128xf32>, vector<128x512xf32>, vector<8x512xf32> -> vector<8x512xf32>
    %9 = arith.addf %5, %8 : vector<8x512xf32>
    %c0_10 = arith.constant 0 : index
    %c0_11 = arith.constant 0 : index
    %10 = vector.load %arg5[%c0_10, %c0_11] : memref<8x512xf32, #tpu.memory_space<vmem>>, vector<8x512xf32>
    tpu.vector_store %arg5[%c0_10, %c0_11], %9 {strides = array<i32>} : memref<8x512xf32, #tpu.memory_space<vmem>>, vector<8x512xf32>,
    return
  }
}

module attributes {stable_mosaic.version = 11 : i64} {
  func.func @_dsconv_kernel(%arg0: memref<9x8x512xf32, #tpu.memory_space<vmem>>, %arg1: memref<9x8x1xf32, #tpu.memory_space<vmem>>, %arg2: memref<8x8xf32, #tpu.memory_space<vmem>>, %arg3: memref<8x512xf32, #tpu.memory_space<vmem>>) attributes {dimension_semantics = [], scalar_prefetch = 0 : i64, scratch_operands = 0 : i64, tpu.core_type = #tpu.core_type<tc>} {
    %c0 = arith.constant 0 : index
    %c0_0 = arith.constant 0 : index
    %c0_1 = arith.constant 0 : index
    %0 = vector.load %arg0[%c0, %c0_0, %c0_1] : memref<9x8x512xf32, #tpu.memory_space<vmem>>, vector<1x8x512xf32>
    %1 = vector.shape_cast %0 : vector<1x8x512xf32> to vector<8x512xf32>
    %c0_2 = arith.constant 0 : index
    %c0_3 = arith.constant 0 : index
    %c0_4 = arith.constant 0 : index
    %2 = vector.load %arg1[%c0_2, %c0_3, %c0_4] : memref<9x8x1xf32, #tpu.memory_space<vmem>>, vector<1x8x1xf32>
    %3 = vector.shape_cast %2 : vector<1x8x1xf32> to vector<8x1xf32>
    %4 = vector.broadcast %3 : vector<8x1xf32> to vector<8x512xf32>
    %5 = arith.mulf %1, %4 : vector<8x512xf32>
    %c1 = arith.constant 1 : index
    %c0_5 = arith.constant 0 : index
    %c0_6 = arith.constant 0 : index
    %6 = vector.load %arg0[%c1, %c0_5, %c0_6] : memref<9x8x512xf32, #tpu.memory_space<vmem>>, vector<1x8x512xf32>
    %7 = vector.shape_cast %6 : vector<1x8x512xf32> to vector<8x512xf32>
    %c1_7 = arith.constant 1 : index
    %c0_8 = arith.constant 0 : index
    %c0_9 = arith.constant 0 : index
    %8 = vector.load %arg1[%c1_7, %c0_8, %c0_9] : memref<9x8x1xf32, #tpu.memory_space<vmem>>, vector<1x8x1xf32>
    %9 = vector.shape_cast %8 : vector<1x8x1xf32> to vector<8x1xf32>
    %10 = vector.broadcast %9 : vector<8x1xf32> to vector<8x512xf32>
    %11 = arith.mulf %7, %10 : vector<8x512xf32>
    %12 = arith.addf %5, %11 : vector<8x512xf32>
    %c2 = arith.constant 2 : index
    %c0_10 = arith.constant 0 : index
    %c0_11 = arith.constant 0 : index
    %13 = vector.load %arg0[%c2, %c0_10, %c0_11] : memref<9x8x512xf32, #tpu.memory_space<vmem>>, vector<1x8x512xf32>
    %14 = vector.shape_cast %13 : vector<1x8x512xf32> to vector<8x512xf32>
    %c2_12 = arith.constant 2 : index
    %c0_13 = arith.constant 0 : index
    %c0_14 = arith.constant 0 : index
    %15 = vector.load %arg1[%c2_12, %c0_13, %c0_14] : memref<9x8x1xf32, #tpu.memory_space<vmem>>, vector<1x8x1xf32>
    %16 = vector.shape_cast %15 : vector<1x8x1xf32> to vector<8x1xf32>
    %17 = vector.broadcast %16 : vector<8x1xf32> to vector<8x512xf32>
    %18 = arith.mulf %14, %17 : vector<8x512xf32>
    %19 = arith.addf %12, %18 : vector<8x512xf32>
    %c3 = arith.constant 3 : index
    %c0_15 = arith.constant 0 : index
    %c0_16 = arith.constant 0 : index
    %20 = vector.load %arg0[%c3, %c0_15, %c0_16] : memref<9x8x512xf32, #tpu.memory_space<vmem>>, vector<1x8x512xf32>
    %21 = vector.shape_cast %20 : vector<1x8x512xf32> to vector<8x512xf32>
    %c3_17 = arith.constant 3 : index
    %c0_18 = arith.constant 0 : index
    %c0_19 = arith.constant 0 : index
    %22 = vector.load %arg1[%c3_17, %c0_18, %c0_19] : memref<9x8x1xf32, #tpu.memory_space<vmem>>, vector<1x8x1xf32>
    %23 = vector.shape_cast %22 : vector<1x8x1xf32> to vector<8x1xf32>
    %24 = vector.broadcast %23 : vector<8x1xf32> to vector<8x512xf32>
    %25 = arith.mulf %21, %24 : vector<8x512xf32>
    %26 = arith.addf %19, %25 : vector<8x512xf32>
    %c4 = arith.constant 4 : index
    %c0_20 = arith.constant 0 : index
    %c0_21 = arith.constant 0 : index
    %27 = vector.load %arg0[%c4, %c0_20, %c0_21] : memref<9x8x512xf32, #tpu.memory_space<vmem>>, vector<1x8x512xf32>
    %28 = vector.shape_cast %27 : vector<1x8x512xf32> to vector<8x512xf32>
    %c4_22 = arith.constant 4 : index
    %c0_23 = arith.constant 0 : index
    %c0_24 = arith.constant 0 : index
    %29 = vector.load %arg1[%c4_22, %c0_23, %c0_24] : memref<9x8x1xf32, #tpu.memory_space<vmem>>, vector<1x8x1xf32>
    %30 = vector.shape_cast %29 : vector<1x8x1xf32> to vector<8x1xf32>
    %31 = vector.broadcast %30 : vector<8x1xf32> to vector<8x512xf32>
    %32 = arith.mulf %28, %31 : vector<8x512xf32>
    %33 = arith.addf %26, %32 : vector<8x512xf32>
    %c5 = arith.constant 5 : index
    %c0_25 = arith.constant 0 : index
    %c0_26 = arith.constant 0 : index
    %34 = vector.load %arg0[%c5, %c0_25, %c0_26] : memref<9x8x512xf32, #tpu.memory_space<vmem>>, vector<1x8x512xf32>
    %35 = vector.shape_cast %34 : vector<1x8x512xf32> to vector<8x512xf32>
    %c5_27 = arith.constant 5 : index
    %c0_28 = arith.constant 0 : index
    %c0_29 = arith.constant 0 : index
    %36 = vector.load %arg1[%c5_27, %c0_28, %c0_29] : memref<9x8x1xf32, #tpu.memory_space<vmem>>, vector<1x8x1xf32>
    %37 = vector.shape_cast %36 : vector<1x8x1xf32> to vector<8x1xf32>
    %38 = vector.broadcast %37 : vector<8x1xf32> to vector<8x512xf32>
    %39 = arith.mulf %35, %38 : vector<8x512xf32>
    %40 = arith.addf %33, %39 : vector<8x512xf32>
    %c6 = arith.constant 6 : index
    %c0_30 = arith.constant 0 : index
    %c0_31 = arith.constant 0 : index
    %41 = vector.load %arg0[%c6, %c0_30, %c0_31] : memref<9x8x512xf32, #tpu.memory_space<vmem>>, vector<1x8x512xf32>
    %42 = vector.shape_cast %41 : vector<1x8x512xf32> to vector<8x512xf32>
    %c6_32 = arith.constant 6 : index
    %c0_33 = arith.constant 0 : index
    %c0_34 = arith.constant 0 : index
    %43 = vector.load %arg1[%c6_32, %c0_33, %c0_34] : memref<9x8x1xf32, #tpu.memory_space<vmem>>, vector<1x8x1xf32>
    %44 = vector.shape_cast %43 : vector<1x8x1xf32> to vector<8x1xf32>
    %45 = vector.broadcast %44 : vector<8x1xf32> to vector<8x512xf32>
    %46 = arith.mulf %42, %45 : vector<8x512xf32>
    %47 = arith.addf %40, %46 : vector<8x512xf32>
    %c7 = arith.constant 7 : index
    %c0_35 = arith.constant 0 : index
    %c0_36 = arith.constant 0 : index
    %48 = vector.load %arg0[%c7, %c0_35, %c0_36] : memref<9x8x512xf32, #tpu.memory_space<vmem>>, vector<1x8x512xf32>
    %49 = vector.shape_cast %48 : vector<1x8x512xf32> to vector<8x512xf32>
    %c7_37 = arith.constant 7 : index
    %c0_38 = arith.constant 0 : index
    %c0_39 = arith.constant 0 : index
    %50 = vector.load %arg1[%c7_37, %c0_38, %c0_39] : memref<9x8x1xf32, #tpu.memory_space<vmem>>, vector<1x8x1xf32>
    %51 = vector.shape_cast %50 : vector<1x8x1xf32> to vector<8x1xf32>
    %52 = vector.broadcast %51 : vector<8x1xf32> to vector<8x512xf32>
    %53 = arith.mulf %49, %52 : vector<8x512xf32>
    %54 = arith.addf %47, %53 : vector<8x512xf32>
    %c8 = arith.constant 8 : index
    %c0_40 = arith.constant 0 : index
    %c0_41 = arith.constant 0 : index
    %55 = vector.load %arg0[%c8, %c0_40, %c0_41] : memref<9x8x512xf32, #tpu.memory_space<vmem>>, vector<1x8x512xf32>
    %56 = vector.shape_cast %55 : vector<1x8x512xf32> to vector<8x512xf32>
    %c8_42 = arith.constant 8 : index
    %c0_43 = arith.constant 0 : index
    %c0_44 = arith.constant 0 : index
    %57 = vector.load %arg1[%c8_42, %c0_43, %c0_44] : memref<9x8x1xf32, #tpu.memory_space<vmem>>, vector<1x8x1xf32>
    %58 = vector.shape_cast %57 : vector<1x8x1xf32> to vector<8x1xf32>
    %59 = vector.broadcast %58 : vector<8x1xf32> to vector<8x512xf32>
    %60 = arith.mulf %56, %59 : vector<8x512xf32>
    %61 = arith.addf %54, %60 : vector<8x512xf32>
    %c0_45 = arith.constant 0 : index
    %c0_46 = arith.constant 0 : index
    %62 = vector.load %arg2[%c0_45, %c0_46] : memref<8x8xf32, #tpu.memory_space<vmem>>, vector<8x8xf32>
    %cst = arith.constant dense<0.000000e+00> : vector<8x512xf32>
    %63 = tpu.matmul %62, %61, %cst {dimension_numbers = #tpu.dot_dimension_numbers<[1], [0], [0], [1], [0, 0, 1, 1], [], []>} : vector<8x8xf32>, vector<8x512xf32>, vector<8x512xf32> -> vector<8x512xf32>
    %c0_47 = arith.constant 0 : index
    %c0_48 = arith.constant 0 : index
    %64 = vector.load %arg3[%c0_47, %c0_48] : memref<8x512xf32, #tpu.memory_space<vmem>>, vector<8x512xf32>
    tpu.vector_store %arg3[%c0_47, %c0_48], %63 {strides = array<i32>} : memref<8x512xf32, #tpu.memory_space<vmem>>, vector<8x512xf32>,
    return
  }
}

module attributes {stable_mosaic.version = 11 : i64} {
  func.func @_dsconv_add_kernel(%arg0: memref<9x8x128xf32, #tpu.memory_space<vmem>>, %arg1: memref<9x8x1xf32, #tpu.memory_space<vmem>>, %arg2: memref<8x8xf32, #tpu.memory_space<vmem>>, %arg3: memref<8x128xf32, #tpu.memory_space<vmem>>, %arg4: memref<8x128xf32, #tpu.memory_space<vmem>>) attributes {dimension_semantics = [], scalar_prefetch = 0 : i64, scratch_operands = 0 : i64, tpu.core_type = #tpu.core_type<tc>} {
    %c0 = arith.constant 0 : index
    %c0_0 = arith.constant 0 : index
    %c0_1 = arith.constant 0 : index
    %0 = vector.load %arg0[%c0, %c0_0, %c0_1] : memref<9x8x128xf32, #tpu.memory_space<vmem>>, vector<1x8x128xf32>
    %1 = vector.shape_cast %0 : vector<1x8x128xf32> to vector<8x128xf32>
    %c0_2 = arith.constant 0 : index
    %c0_3 = arith.constant 0 : index
    %c0_4 = arith.constant 0 : index
    %2 = vector.load %arg1[%c0_2, %c0_3, %c0_4] : memref<9x8x1xf32, #tpu.memory_space<vmem>>, vector<1x8x1xf32>
    %3 = vector.shape_cast %2 : vector<1x8x1xf32> to vector<8x1xf32>
    %4 = vector.broadcast %3 : vector<8x1xf32> to vector<8x128xf32>
    %5 = arith.mulf %1, %4 : vector<8x128xf32>
    %c1 = arith.constant 1 : index
    %c0_5 = arith.constant 0 : index
    %c0_6 = arith.constant 0 : index
    %6 = vector.load %arg0[%c1, %c0_5, %c0_6] : memref<9x8x128xf32, #tpu.memory_space<vmem>>, vector<1x8x128xf32>
    %7 = vector.shape_cast %6 : vector<1x8x128xf32> to vector<8x128xf32>
    %c1_7 = arith.constant 1 : index
    %c0_8 = arith.constant 0 : index
    %c0_9 = arith.constant 0 : index
    %8 = vector.load %arg1[%c1_7, %c0_8, %c0_9] : memref<9x8x1xf32, #tpu.memory_space<vmem>>, vector<1x8x1xf32>
    %9 = vector.shape_cast %8 : vector<1x8x1xf32> to vector<8x1xf32>
    %10 = vector.broadcast %9 : vector<8x1xf32> to vector<8x128xf32>
    %11 = arith.mulf %7, %10 : vector<8x128xf32>
    %12 = arith.addf %5, %11 : vector<8x128xf32>
    %c2 = arith.constant 2 : index
    %c0_10 = arith.constant 0 : index
    %c0_11 = arith.constant 0 : index
    %13 = vector.load %arg0[%c2, %c0_10, %c0_11] : memref<9x8x128xf32, #tpu.memory_space<vmem>>, vector<1x8x128xf32>
    %14 = vector.shape_cast %13 : vector<1x8x128xf32> to vector<8x128xf32>
    %c2_12 = arith.constant 2 : index
    %c0_13 = arith.constant 0 : index
    %c0_14 = arith.constant 0 : index
    %15 = vector.load %arg1[%c2_12, %c0_13, %c0_14] : memref<9x8x1xf32, #tpu.memory_space<vmem>>, vector<1x8x1xf32>
    %16 = vector.shape_cast %15 : vector<1x8x1xf32> to vector<8x1xf32>
    %17 = vector.broadcast %16 : vector<8x1xf32> to vector<8x128xf32>
    %18 = arith.mulf %14, %17 : vector<8x128xf32>
    %19 = arith.addf %12, %18 : vector<8x128xf32>
    %c3 = arith.constant 3 : index
    %c0_15 = arith.constant 0 : index
    %c0_16 = arith.constant 0 : index
    %20 = vector.load %arg0[%c3, %c0_15, %c0_16] : memref<9x8x128xf32, #tpu.memory_space<vmem>>, vector<1x8x128xf32>
    %21 = vector.shape_cast %20 : vector<1x8x128xf32> to vector<8x128xf32>
    %c3_17 = arith.constant 3 : index
    %c0_18 = arith.constant 0 : index
    %c0_19 = arith.constant 0 : index
    %22 = vector.load %arg1[%c3_17, %c0_18, %c0_19] : memref<9x8x1xf32, #tpu.memory_space<vmem>>, vector<1x8x1xf32>
    %23 = vector.shape_cast %22 : vector<1x8x1xf32> to vector<8x1xf32>
    %24 = vector.broadcast %23 : vector<8x1xf32> to vector<8x128xf32>
    %25 = arith.mulf %21, %24 : vector<8x128xf32>
    %26 = arith.addf %19, %25 : vector<8x128xf32>
    %c4 = arith.constant 4 : index
    %c0_20 = arith.constant 0 : index
    %c0_21 = arith.constant 0 : index
    %27 = vector.load %arg0[%c4, %c0_20, %c0_21] : memref<9x8x128xf32, #tpu.memory_space<vmem>>, vector<1x8x128xf32>
    %28 = vector.shape_cast %27 : vector<1x8x128xf32> to vector<8x128xf32>
    %c4_22 = arith.constant 4 : index
    %c0_23 = arith.constant 0 : index
    %c0_24 = arith.constant 0 : index
    %29 = vector.load %arg1[%c4_22, %c0_23, %c0_24] : memref<9x8x1xf32, #tpu.memory_space<vmem>>, vector<1x8x1xf32>
    %30 = vector.shape_cast %29 : vector<1x8x1xf32> to vector<8x1xf32>
    %31 = vector.broadcast %30 : vector<8x1xf32> to vector<8x128xf32>
    %32 = arith.mulf %28, %31 : vector<8x128xf32>
    %33 = arith.addf %26, %32 : vector<8x128xf32>
    %c5 = arith.constant 5 : index
    %c0_25 = arith.constant 0 : index
    %c0_26 = arith.constant 0 : index
    %34 = vector.load %arg0[%c5, %c0_25, %c0_26] : memref<9x8x128xf32, #tpu.memory_space<vmem>>, vector<1x8x128xf32>
    %35 = vector.shape_cast %34 : vector<1x8x128xf32> to vector<8x128xf32>
    %c5_27 = arith.constant 5 : index
    %c0_28 = arith.constant 0 : index
    %c0_29 = arith.constant 0 : index
    %36 = vector.load %arg1[%c5_27, %c0_28, %c0_29] : memref<9x8x1xf32, #tpu.memory_space<vmem>>, vector<1x8x1xf32>
    %37 = vector.shape_cast %36 : vector<1x8x1xf32> to vector<8x1xf32>
    %38 = vector.broadcast %37 : vector<8x1xf32> to vector<8x128xf32>
    %39 = arith.mulf %35, %38 : vector<8x128xf32>
    %40 = arith.addf %33, %39 : vector<8x128xf32>
    %c6 = arith.constant 6 : index
    %c0_30 = arith.constant 0 : index
    %c0_31 = arith.constant 0 : index
    %41 = vector.load %arg0[%c6, %c0_30, %c0_31] : memref<9x8x128xf32, #tpu.memory_space<vmem>>, vector<1x8x128xf32>
    %42 = vector.shape_cast %41 : vector<1x8x128xf32> to vector<8x128xf32>
    %c6_32 = arith.constant 6 : index
    %c0_33 = arith.constant 0 : index
    %c0_34 = arith.constant 0 : index
    %43 = vector.load %arg1[%c6_32, %c0_33, %c0_34] : memref<9x8x1xf32, #tpu.memory_space<vmem>>, vector<1x8x1xf32>
    %44 = vector.shape_cast %43 : vector<1x8x1xf32> to vector<8x1xf32>
    %45 = vector.broadcast %44 : vector<8x1xf32> to vector<8x128xf32>
    %46 = arith.mulf %42, %45 : vector<8x128xf32>
    %47 = arith.addf %40, %46 : vector<8x128xf32>
    %c7 = arith.constant 7 : index
    %c0_35 = arith.constant 0 : index
    %c0_36 = arith.constant 0 : index
    %48 = vector.load %arg0[%c7, %c0_35, %c0_36] : memref<9x8x128xf32, #tpu.memory_space<vmem>>, vector<1x8x128xf32>
    %49 = vector.shape_cast %48 : vector<1x8x128xf32> to vector<8x128xf32>
    %c7_37 = arith.constant 7 : index
    %c0_38 = arith.constant 0 : index
    %c0_39 = arith.constant 0 : index
    %50 = vector.load %arg1[%c7_37, %c0_38, %c0_39] : memref<9x8x1xf32, #tpu.memory_space<vmem>>, vector<1x8x1xf32>
    %51 = vector.shape_cast %50 : vector<1x8x1xf32> to vector<8x1xf32>
    %52 = vector.broadcast %51 : vector<8x1xf32> to vector<8x128xf32>
    %53 = arith.mulf %49, %52 : vector<8x128xf32>
    %54 = arith.addf %47, %53 : vector<8x128xf32>
    %c8 = arith.constant 8 : index
    %c0_40 = arith.constant 0 : index
    %c0_41 = arith.constant 0 : index
    %55 = vector.load %arg0[%c8, %c0_40, %c0_41] : memref<9x8x128xf32, #tpu.memory_space<vmem>>, vector<1x8x128xf32>
    %56 = vector.shape_cast %55 : vector<1x8x128xf32> to vector<8x128xf32>
    %c8_42 = arith.constant 8 : index
    %c0_43 = arith.constant 0 : index
    %c0_44 = arith.constant 0 : index
    %57 = vector.load %arg1[%c8_42, %c0_43, %c0_44] : memref<9x8x1xf32, #tpu.memory_space<vmem>>, vector<1x8x1xf32>
    %58 = vector.shape_cast %57 : vector<1x8x1xf32> to vector<8x1xf32>
    %59 = vector.broadcast %58 : vector<8x1xf32> to vector<8x128xf32>
    %60 = arith.mulf %56, %59 : vector<8x128xf32>
    %61 = arith.addf %54, %60 : vector<8x128xf32>
    %c0_45 = arith.constant 0 : index
    %c0_46 = arith.constant 0 : index
    %62 = vector.load %arg3[%c0_45, %c0_46] : memref<8x128xf32, #tpu.memory_space<vmem>>, vector<8x128xf32>
    %c0_47 = arith.constant 0 : index
    %c0_48 = arith.constant 0 : index
    %63 = vector.load %arg2[%c0_47, %c0_48] : memref<8x8xf32, #tpu.memory_space<vmem>>, vector<8x8xf32>
    %cst = arith.constant dense<0.000000e+00> : vector<8x128xf32>
    %64 = tpu.matmul %63, %61, %cst {dimension_numbers = #tpu.dot_dimension_numbers<[1], [0], [0], [1], [0, 0, 1, 1], [], []>} : vector<8x8xf32>, vector<8x128xf32>, vector<8x128xf32> -> vector<8x128xf32>
    %65 = arith.addf %62, %64 : vector<8x128xf32>
    %c0_49 = arith.constant 0 : index
    %c0_50 = arith.constant 0 : index
    %66 = vector.load %arg4[%c0_49, %c0_50] : memref<8x128xf32, #tpu.memory_space<vmem>>, vector<8x128xf32>
    tpu.vector_store %arg4[%c0_49, %c0_50], %65 {strides = array<i32>} : memref<8x128xf32, #tpu.memory_space<vmem>>, vector<8x128xf32>,
    return
  }
}

module attributes {stable_mosaic.version = 11 : i64} {
  func.func @_dsconv_kernel(%arg0: memref<9x8x128xf32, #tpu.memory_space<vmem>>, %arg1: memref<9x8x1xf32, #tpu.memory_space<vmem>>, %arg2: memref<8x8xf32, #tpu.memory_space<vmem>>, %arg3: memref<8x128xf32, #tpu.memory_space<vmem>>) attributes {dimension_semantics = [], scalar_prefetch = 0 : i64, scratch_operands = 0 : i64, tpu.core_type = #tpu.core_type<tc>} {
    %c0 = arith.constant 0 : index
    %c0_0 = arith.constant 0 : index
    %c0_1 = arith.constant 0 : index
    %0 = vector.load %arg0[%c0, %c0_0, %c0_1] : memref<9x8x128xf32, #tpu.memory_space<vmem>>, vector<1x8x128xf32>
    %1 = vector.shape_cast %0 : vector<1x8x128xf32> to vector<8x128xf32>
    %c0_2 = arith.constant 0 : index
    %c0_3 = arith.constant 0 : index
    %c0_4 = arith.constant 0 : index
    %2 = vector.load %arg1[%c0_2, %c0_3, %c0_4] : memref<9x8x1xf32, #tpu.memory_space<vmem>>, vector<1x8x1xf32>
    %3 = vector.shape_cast %2 : vector<1x8x1xf32> to vector<8x1xf32>
    %4 = vector.broadcast %3 : vector<8x1xf32> to vector<8x128xf32>
    %5 = arith.mulf %1, %4 : vector<8x128xf32>
    %c1 = arith.constant 1 : index
    %c0_5 = arith.constant 0 : index
    %c0_6 = arith.constant 0 : index
    %6 = vector.load %arg0[%c1, %c0_5, %c0_6] : memref<9x8x128xf32, #tpu.memory_space<vmem>>, vector<1x8x128xf32>
    %7 = vector.shape_cast %6 : vector<1x8x128xf32> to vector<8x128xf32>
    %c1_7 = arith.constant 1 : index
    %c0_8 = arith.constant 0 : index
    %c0_9 = arith.constant 0 : index
    %8 = vector.load %arg1[%c1_7, %c0_8, %c0_9] : memref<9x8x1xf32, #tpu.memory_space<vmem>>, vector<1x8x1xf32>
    %9 = vector.shape_cast %8 : vector<1x8x1xf32> to vector<8x1xf32>
    %10 = vector.broadcast %9 : vector<8x1xf32> to vector<8x128xf32>
    %11 = arith.mulf %7, %10 : vector<8x128xf32>
    %12 = arith.addf %5, %11 : vector<8x128xf32>
    %c2 = arith.constant 2 : index
    %c0_10 = arith.constant 0 : index
    %c0_11 = arith.constant 0 : index
    %13 = vector.load %arg0[%c2, %c0_10, %c0_11] : memref<9x8x128xf32, #tpu.memory_space<vmem>>, vector<1x8x128xf32>
    %14 = vector.shape_cast %13 : vector<1x8x128xf32> to vector<8x128xf32>
    %c2_12 = arith.constant 2 : index
    %c0_13 = arith.constant 0 : index
    %c0_14 = arith.constant 0 : index
    %15 = vector.load %arg1[%c2_12, %c0_13, %c0_14] : memref<9x8x1xf32, #tpu.memory_space<vmem>>, vector<1x8x1xf32>
    %16 = vector.shape_cast %15 : vector<1x8x1xf32> to vector<8x1xf32>
    %17 = vector.broadcast %16 : vector<8x1xf32> to vector<8x128xf32>
    %18 = arith.mulf %14, %17 : vector<8x128xf32>
    %19 = arith.addf %12, %18 : vector<8x128xf32>
    %c3 = arith.constant 3 : index
    %c0_15 = arith.constant 0 : index
    %c0_16 = arith.constant 0 : index
    %20 = vector.load %arg0[%c3, %c0_15, %c0_16] : memref<9x8x128xf32, #tpu.memory_space<vmem>>, vector<1x8x128xf32>
    %21 = vector.shape_cast %20 : vector<1x8x128xf32> to vector<8x128xf32>
    %c3_17 = arith.constant 3 : index
    %c0_18 = arith.constant 0 : index
    %c0_19 = arith.constant 0 : index
    %22 = vector.load %arg1[%c3_17, %c0_18, %c0_19] : memref<9x8x1xf32, #tpu.memory_space<vmem>>, vector<1x8x1xf32>
    %23 = vector.shape_cast %22 : vector<1x8x1xf32> to vector<8x1xf32>
    %24 = vector.broadcast %23 : vector<8x1xf32> to vector<8x128xf32>
    %25 = arith.mulf %21, %24 : vector<8x128xf32>
    %26 = arith.addf %19, %25 : vector<8x128xf32>
    %c4 = arith.constant 4 : index
    %c0_20 = arith.constant 0 : index
    %c0_21 = arith.constant 0 : index
    %27 = vector.load %arg0[%c4, %c0_20, %c0_21] : memref<9x8x128xf32, #tpu.memory_space<vmem>>, vector<1x8x128xf32>
    %28 = vector.shape_cast %27 : vector<1x8x128xf32> to vector<8x128xf32>
    %c4_22 = arith.constant 4 : index
    %c0_23 = arith.constant 0 : index
    %c0_24 = arith.constant 0 : index
    %29 = vector.load %arg1[%c4_22, %c0_23, %c0_24] : memref<9x8x1xf32, #tpu.memory_space<vmem>>, vector<1x8x1xf32>
    %30 = vector.shape_cast %29 : vector<1x8x1xf32> to vector<8x1xf32>
    %31 = vector.broadcast %30 : vector<8x1xf32> to vector<8x128xf32>
    %32 = arith.mulf %28, %31 : vector<8x128xf32>
    %33 = arith.addf %26, %32 : vector<8x128xf32>
    %c5 = arith.constant 5 : index
    %c0_25 = arith.constant 0 : index
    %c0_26 = arith.constant 0 : index
    %34 = vector.load %arg0[%c5, %c0_25, %c0_26] : memref<9x8x128xf32, #tpu.memory_space<vmem>>, vector<1x8x128xf32>
    %35 = vector.shape_cast %34 : vector<1x8x128xf32> to vector<8x128xf32>
    %c5_27 = arith.constant 5 : index
    %c0_28 = arith.constant 0 : index
    %c0_29 = arith.constant 0 : index
    %36 = vector.load %arg1[%c5_27, %c0_28, %c0_29] : memref<9x8x1xf32, #tpu.memory_space<vmem>>, vector<1x8x1xf32>
    %37 = vector.shape_cast %36 : vector<1x8x1xf32> to vector<8x1xf32>
    %38 = vector.broadcast %37 : vector<8x1xf32> to vector<8x128xf32>
    %39 = arith.mulf %35, %38 : vector<8x128xf32>
    %40 = arith.addf %33, %39 : vector<8x128xf32>
    %c6 = arith.constant 6 : index
    %c0_30 = arith.constant 0 : index
    %c0_31 = arith.constant 0 : index
    %41 = vector.load %arg0[%c6, %c0_30, %c0_31] : memref<9x8x128xf32, #tpu.memory_space<vmem>>, vector<1x8x128xf32>
    %42 = vector.shape_cast %41 : vector<1x8x128xf32> to vector<8x128xf32>
    %c6_32 = arith.constant 6 : index
    %c0_33 = arith.constant 0 : index
    %c0_34 = arith.constant 0 : index
    %43 = vector.load %arg1[%c6_32, %c0_33, %c0_34] : memref<9x8x1xf32, #tpu.memory_space<vmem>>, vector<1x8x1xf32>
    %44 = vector.shape_cast %43 : vector<1x8x1xf32> to vector<8x1xf32>
    %45 = vector.broadcast %44 : vector<8x1xf32> to vector<8x128xf32>
    %46 = arith.mulf %42, %45 : vector<8x128xf32>
    %47 = arith.addf %40, %46 : vector<8x128xf32>
    %c7 = arith.constant 7 : index
    %c0_35 = arith.constant 0 : index
    %c0_36 = arith.constant 0 : index
    %48 = vector.load %arg0[%c7, %c0_35, %c0_36] : memref<9x8x128xf32, #tpu.memory_space<vmem>>, vector<1x8x128xf32>
    %49 = vector.shape_cast %48 : vector<1x8x128xf32> to vector<8x128xf32>
    %c7_37 = arith.constant 7 : index
    %c0_38 = arith.constant 0 : index
    %c0_39 = arith.constant 0 : index
    %50 = vector.load %arg1[%c7_37, %c0_38, %c0_39] : memref<9x8x1xf32, #tpu.memory_space<vmem>>, vector<1x8x1xf32>
    %51 = vector.shape_cast %50 : vector<1x8x1xf32> to vector<8x1xf32>
    %52 = vector.broadcast %51 : vector<8x1xf32> to vector<8x128xf32>
    %53 = arith.mulf %49, %52 : vector<8x128xf32>
    %54 = arith.addf %47, %53 : vector<8x128xf32>
    %c8 = arith.constant 8 : index
    %c0_40 = arith.constant 0 : index
    %c0_41 = arith.constant 0 : index
    %55 = vector.load %arg0[%c8, %c0_40, %c0_41] : memref<9x8x128xf32, #tpu.memory_space<vmem>>, vector<1x8x128xf32>
    %56 = vector.shape_cast %55 : vector<1x8x128xf32> to vector<8x128xf32>
    %c8_42 = arith.constant 8 : index
    %c0_43 = arith.constant 0 : index
    %c0_44 = arith.constant 0 : index
    %57 = vector.load %arg1[%c8_42, %c0_43, %c0_44] : memref<9x8x1xf32, #tpu.memory_space<vmem>>, vector<1x8x1xf32>
    %58 = vector.shape_cast %57 : vector<1x8x1xf32> to vector<8x1xf32>
    %59 = vector.broadcast %58 : vector<8x1xf32> to vector<8x128xf32>
    %60 = arith.mulf %56, %59 : vector<8x128xf32>
    %61 = arith.addf %54, %60 : vector<8x128xf32>
    %c0_45 = arith.constant 0 : index
    %c0_46 = arith.constant 0 : index
    %62 = vector.load %arg2[%c0_45, %c0_46] : memref<8x8xf32, #tpu.memory_space<vmem>>, vector<8x8xf32>
    %cst = arith.constant dense<0.000000e+00> : vector<8x128xf32>
    %63 = tpu.matmul %62, %61, %cst {dimension_numbers = #tpu.dot_dimension_numbers<[1], [0], [0], [1], [0, 0, 1, 1], [], []>} : vector<8x8xf32>, vector<8x128xf32>, vector<8x128xf32> -> vector<8x128xf32>
    %c0_47 = arith.constant 0 : index
    %c0_48 = arith.constant 0 : index
    %64 = vector.load %arg3[%c0_47, %c0_48] : memref<8x128xf32, #tpu.memory_space<vmem>>, vector<8x128xf32>
    tpu.vector_store %arg3[%c0_47, %c0_48], %63 {strides = array<i32>} : memref<8x128xf32, #tpu.memory_space<vmem>>, vector<8x128xf32>,
    return
  }
}

module attributes {stable_mosaic.version = 11 : i64} {
  func.func @_dsconv_add_kernel(%arg0: memref<9x8x32xf32, #tpu.memory_space<vmem>>, %arg1: memref<9x8x1xf32, #tpu.memory_space<vmem>>, %arg2: memref<8x8xf32, #tpu.memory_space<vmem>>, %arg3: memref<8x32xf32, #tpu.memory_space<vmem>>, %arg4: memref<8x32xf32, #tpu.memory_space<vmem>>) attributes {dimension_semantics = [], scalar_prefetch = 0 : i64, scratch_operands = 0 : i64, tpu.core_type = #tpu.core_type<tc>} {
    %c0 = arith.constant 0 : index
    %c0_0 = arith.constant 0 : index
    %c0_1 = arith.constant 0 : index
    %0 = vector.load %arg0[%c0, %c0_0, %c0_1] : memref<9x8x32xf32, #tpu.memory_space<vmem>>, vector<1x8x32xf32>
    %1 = vector.shape_cast %0 : vector<1x8x32xf32> to vector<8x32xf32>
    %c0_2 = arith.constant 0 : index
    %c0_3 = arith.constant 0 : index
    %c0_4 = arith.constant 0 : index
    %2 = vector.load %arg1[%c0_2, %c0_3, %c0_4] : memref<9x8x1xf32, #tpu.memory_space<vmem>>, vector<1x8x1xf32>
    %3 = vector.shape_cast %2 : vector<1x8x1xf32> to vector<8x1xf32>
    %4 = vector.broadcast %3 : vector<8x1xf32> to vector<8x32xf32>
    %5 = arith.mulf %1, %4 : vector<8x32xf32>
    %c1 = arith.constant 1 : index
    %c0_5 = arith.constant 0 : index
    %c0_6 = arith.constant 0 : index
    %6 = vector.load %arg0[%c1, %c0_5, %c0_6] : memref<9x8x32xf32, #tpu.memory_space<vmem>>, vector<1x8x32xf32>
    %7 = vector.shape_cast %6 : vector<1x8x32xf32> to vector<8x32xf32>
    %c1_7 = arith.constant 1 : index
    %c0_8 = arith.constant 0 : index
    %c0_9 = arith.constant 0 : index
    %8 = vector.load %arg1[%c1_7, %c0_8, %c0_9] : memref<9x8x1xf32, #tpu.memory_space<vmem>>, vector<1x8x1xf32>
    %9 = vector.shape_cast %8 : vector<1x8x1xf32> to vector<8x1xf32>
    %10 = vector.broadcast %9 : vector<8x1xf32> to vector<8x32xf32>
    %11 = arith.mulf %7, %10 : vector<8x32xf32>
    %12 = arith.addf %5, %11 : vector<8x32xf32>
    %c2 = arith.constant 2 : index
    %c0_10 = arith.constant 0 : index
    %c0_11 = arith.constant 0 : index
    %13 = vector.load %arg0[%c2, %c0_10, %c0_11] : memref<9x8x32xf32, #tpu.memory_space<vmem>>, vector<1x8x32xf32>
    %14 = vector.shape_cast %13 : vector<1x8x32xf32> to vector<8x32xf32>
    %c2_12 = arith.constant 2 : index
    %c0_13 = arith.constant 0 : index
    %c0_14 = arith.constant 0 : index
    %15 = vector.load %arg1[%c2_12, %c0_13, %c0_14] : memref<9x8x1xf32, #tpu.memory_space<vmem>>, vector<1x8x1xf32>
    %16 = vector.shape_cast %15 : vector<1x8x1xf32> to vector<8x1xf32>
    %17 = vector.broadcast %16 : vector<8x1xf32> to vector<8x32xf32>
    %18 = arith.mulf %14, %17 : vector<8x32xf32>
    %19 = arith.addf %12, %18 : vector<8x32xf32>
    %c3 = arith.constant 3 : index
    %c0_15 = arith.constant 0 : index
    %c0_16 = arith.constant 0 : index
    %20 = vector.load %arg0[%c3, %c0_15, %c0_16] : memref<9x8x32xf32, #tpu.memory_space<vmem>>, vector<1x8x32xf32>
    %21 = vector.shape_cast %20 : vector<1x8x32xf32> to vector<8x32xf32>
    %c3_17 = arith.constant 3 : index
    %c0_18 = arith.constant 0 : index
    %c0_19 = arith.constant 0 : index
    %22 = vector.load %arg1[%c3_17, %c0_18, %c0_19] : memref<9x8x1xf32, #tpu.memory_space<vmem>>, vector<1x8x1xf32>
    %23 = vector.shape_cast %22 : vector<1x8x1xf32> to vector<8x1xf32>
    %24 = vector.broadcast %23 : vector<8x1xf32> to vector<8x32xf32>
    %25 = arith.mulf %21, %24 : vector<8x32xf32>
    %26 = arith.addf %19, %25 : vector<8x32xf32>
    %c4 = arith.constant 4 : index
    %c0_20 = arith.constant 0 : index
    %c0_21 = arith.constant 0 : index
    %27 = vector.load %arg0[%c4, %c0_20, %c0_21] : memref<9x8x32xf32, #tpu.memory_space<vmem>>, vector<1x8x32xf32>
    %28 = vector.shape_cast %27 : vector<1x8x32xf32> to vector<8x32xf32>
    %c4_22 = arith.constant 4 : index
    %c0_23 = arith.constant 0 : index
    %c0_24 = arith.constant 0 : index
    %29 = vector.load %arg1[%c4_22, %c0_23, %c0_24] : memref<9x8x1xf32, #tpu.memory_space<vmem>>, vector<1x8x1xf32>
    %30 = vector.shape_cast %29 : vector<1x8x1xf32> to vector<8x1xf32>
    %31 = vector.broadcast %30 : vector<8x1xf32> to vector<8x32xf32>
    %32 = arith.mulf %28, %31 : vector<8x32xf32>
    %33 = arith.addf %26, %32 : vector<8x32xf32>
    %c5 = arith.constant 5 : index
    %c0_25 = arith.constant 0 : index
    %c0_26 = arith.constant 0 : index
    %34 = vector.load %arg0[%c5, %c0_25, %c0_26] : memref<9x8x32xf32, #tpu.memory_space<vmem>>, vector<1x8x32xf32>
    %35 = vector.shape_cast %34 : vector<1x8x32xf32> to vector<8x32xf32>
    %c5_27 = arith.constant 5 : index
    %c0_28 = arith.constant 0 : index
    %c0_29 = arith.constant 0 : index
    %36 = vector.load %arg1[%c5_27, %c0_28, %c0_29] : memref<9x8x1xf32, #tpu.memory_space<vmem>>, vector<1x8x1xf32>
    %37 = vector.shape_cast %36 : vector<1x8x1xf32> to vector<8x1xf32>
    %38 = vector.broadcast %37 : vector<8x1xf32> to vector<8x32xf32>
    %39 = arith.mulf %35, %38 : vector<8x32xf32>
    %40 = arith.addf %33, %39 : vector<8x32xf32>
    %c6 = arith.constant 6 : index
    %c0_30 = arith.constant 0 : index
    %c0_31 = arith.constant 0 : index
    %41 = vector.load %arg0[%c6, %c0_30, %c0_31] : memref<9x8x32xf32, #tpu.memory_space<vmem>>, vector<1x8x32xf32>
    %42 = vector.shape_cast %41 : vector<1x8x32xf32> to vector<8x32xf32>
    %c6_32 = arith.constant 6 : index
    %c0_33 = arith.constant 0 : index
    %c0_34 = arith.constant 0 : index
    %43 = vector.load %arg1[%c6_32, %c0_33, %c0_34] : memref<9x8x1xf32, #tpu.memory_space<vmem>>, vector<1x8x1xf32>
    %44 = vector.shape_cast %43 : vector<1x8x1xf32> to vector<8x1xf32>
    %45 = vector.broadcast %44 : vector<8x1xf32> to vector<8x32xf32>
    %46 = arith.mulf %42, %45 : vector<8x32xf32>
    %47 = arith.addf %40, %46 : vector<8x32xf32>
    %c7 = arith.constant 7 : index
    %c0_35 = arith.constant 0 : index
    %c0_36 = arith.constant 0 : index
    %48 = vector.load %arg0[%c7, %c0_35, %c0_36] : memref<9x8x32xf32, #tpu.memory_space<vmem>>, vector<1x8x32xf32>
    %49 = vector.shape_cast %48 : vector<1x8x32xf32> to vector<8x32xf32>
    %c7_37 = arith.constant 7 : index
    %c0_38 = arith.constant 0 : index
    %c0_39 = arith.constant 0 : index
    %50 = vector.load %arg1[%c7_37, %c0_38, %c0_39] : memref<9x8x1xf32, #tpu.memory_space<vmem>>, vector<1x8x1xf32>
    %51 = vector.shape_cast %50 : vector<1x8x1xf32> to vector<8x1xf32>
    %52 = vector.broadcast %51 : vector<8x1xf32> to vector<8x32xf32>
    %53 = arith.mulf %49, %52 : vector<8x32xf32>
    %54 = arith.addf %47, %53 : vector<8x32xf32>
    %c8 = arith.constant 8 : index
    %c0_40 = arith.constant 0 : index
    %c0_41 = arith.constant 0 : index
    %55 = vector.load %arg0[%c8, %c0_40, %c0_41] : memref<9x8x32xf32, #tpu.memory_space<vmem>>, vector<1x8x32xf32>
    %56 = vector.shape_cast %55 : vector<1x8x32xf32> to vector<8x32xf32>
    %c8_42 = arith.constant 8 : index
    %c0_43 = arith.constant 0 : index
    %c0_44 = arith.constant 0 : index
    %57 = vector.load %arg1[%c8_42, %c0_43, %c0_44] : memref<9x8x1xf32, #tpu.memory_space<vmem>>, vector<1x8x1xf32>
    %58 = vector.shape_cast %57 : vector<1x8x1xf32> to vector<8x1xf32>
    %59 = vector.broadcast %58 : vector<8x1xf32> to vector<8x32xf32>
    %60 = arith.mulf %56, %59 : vector<8x32xf32>
    %61 = arith.addf %54, %60 : vector<8x32xf32>
    %c0_45 = arith.constant 0 : index
    %c0_46 = arith.constant 0 : index
    %62 = vector.load %arg3[%c0_45, %c0_46] : memref<8x32xf32, #tpu.memory_space<vmem>>, vector<8x32xf32>
    %c0_47 = arith.constant 0 : index
    %c0_48 = arith.constant 0 : index
    %63 = vector.load %arg2[%c0_47, %c0_48] : memref<8x8xf32, #tpu.memory_space<vmem>>, vector<8x8xf32>
    %cst = arith.constant dense<0.000000e+00> : vector<8x32xf32>
    %64 = tpu.matmul %63, %61, %cst {dimension_numbers = #tpu.dot_dimension_numbers<[1], [0], [0], [1], [0, 0, 1, 1], [], []>} : vector<8x8xf32>, vector<8x32xf32>, vector<8x32xf32> -> vector<8x32xf32>
    %65 = arith.addf %62, %64 : vector<8x32xf32>
    %c0_49 = arith.constant 0 : index
    %c0_50 = arith.constant 0 : index
    %66 = vector.load %arg4[%c0_49, %c0_50] : memref<8x32xf32, #tpu.memory_space<vmem>>, vector<8x32xf32>
    tpu.vector_store %arg4[%c0_49, %c0_50], %65 {strides = array<i32>} : memref<8x32xf32, #tpu.memory_space<vmem>>, vector<8x32xf32>,
    return
  }
}

module attributes {stable_mosaic.version = 11 : i64} {
  func.func @_dsconv_kernel(%arg0: memref<9x8x32xf32, #tpu.memory_space<vmem>>, %arg1: memref<9x8x1xf32, #tpu.memory_space<vmem>>, %arg2: memref<8x8xf32, #tpu.memory_space<vmem>>, %arg3: memref<8x32xf32, #tpu.memory_space<vmem>>) attributes {dimension_semantics = [], scalar_prefetch = 0 : i64, scratch_operands = 0 : i64, tpu.core_type = #tpu.core_type<tc>} {
    %c0 = arith.constant 0 : index
    %c0_0 = arith.constant 0 : index
    %c0_1 = arith.constant 0 : index
    %0 = vector.load %arg0[%c0, %c0_0, %c0_1] : memref<9x8x32xf32, #tpu.memory_space<vmem>>, vector<1x8x32xf32>
    %1 = vector.shape_cast %0 : vector<1x8x32xf32> to vector<8x32xf32>
    %c0_2 = arith.constant 0 : index
    %c0_3 = arith.constant 0 : index
    %c0_4 = arith.constant 0 : index
    %2 = vector.load %arg1[%c0_2, %c0_3, %c0_4] : memref<9x8x1xf32, #tpu.memory_space<vmem>>, vector<1x8x1xf32>
    %3 = vector.shape_cast %2 : vector<1x8x1xf32> to vector<8x1xf32>
    %4 = vector.broadcast %3 : vector<8x1xf32> to vector<8x32xf32>
    %5 = arith.mulf %1, %4 : vector<8x32xf32>
    %c1 = arith.constant 1 : index
    %c0_5 = arith.constant 0 : index
    %c0_6 = arith.constant 0 : index
    %6 = vector.load %arg0[%c1, %c0_5, %c0_6] : memref<9x8x32xf32, #tpu.memory_space<vmem>>, vector<1x8x32xf32>
    %7 = vector.shape_cast %6 : vector<1x8x32xf32> to vector<8x32xf32>
    %c1_7 = arith.constant 1 : index
    %c0_8 = arith.constant 0 : index
    %c0_9 = arith.constant 0 : index
    %8 = vector.load %arg1[%c1_7, %c0_8, %c0_9] : memref<9x8x1xf32, #tpu.memory_space<vmem>>, vector<1x8x1xf32>
    %9 = vector.shape_cast %8 : vector<1x8x1xf32> to vector<8x1xf32>
    %10 = vector.broadcast %9 : vector<8x1xf32> to vector<8x32xf32>
    %11 = arith.mulf %7, %10 : vector<8x32xf32>
    %12 = arith.addf %5, %11 : vector<8x32xf32>
    %c2 = arith.constant 2 : index
    %c0_10 = arith.constant 0 : index
    %c0_11 = arith.constant 0 : index
    %13 = vector.load %arg0[%c2, %c0_10, %c0_11] : memref<9x8x32xf32, #tpu.memory_space<vmem>>, vector<1x8x32xf32>
    %14 = vector.shape_cast %13 : vector<1x8x32xf32> to vector<8x32xf32>
    %c2_12 = arith.constant 2 : index
    %c0_13 = arith.constant 0 : index
    %c0_14 = arith.constant 0 : index
    %15 = vector.load %arg1[%c2_12, %c0_13, %c0_14] : memref<9x8x1xf32, #tpu.memory_space<vmem>>, vector<1x8x1xf32>
    %16 = vector.shape_cast %15 : vector<1x8x1xf32> to vector<8x1xf32>
    %17 = vector.broadcast %16 : vector<8x1xf32> to vector<8x32xf32>
    %18 = arith.mulf %14, %17 : vector<8x32xf32>
    %19 = arith.addf %12, %18 : vector<8x32xf32>
    %c3 = arith.constant 3 : index
    %c0_15 = arith.constant 0 : index
    %c0_16 = arith.constant 0 : index
    %20 = vector.load %arg0[%c3, %c0_15, %c0_16] : memref<9x8x32xf32, #tpu.memory_space<vmem>>, vector<1x8x32xf32>
    %21 = vector.shape_cast %20 : vector<1x8x32xf32> to vector<8x32xf32>
    %c3_17 = arith.constant 3 : index
    %c0_18 = arith.constant 0 : index
    %c0_19 = arith.constant 0 : index
    %22 = vector.load %arg1[%c3_17, %c0_18, %c0_19] : memref<9x8x1xf32, #tpu.memory_space<vmem>>, vector<1x8x1xf32>
    %23 = vector.shape_cast %22 : vector<1x8x1xf32> to vector<8x1xf32>
    %24 = vector.broadcast %23 : vector<8x1xf32> to vector<8x32xf32>
    %25 = arith.mulf %21, %24 : vector<8x32xf32>
    %26 = arith.addf %19, %25 : vector<8x32xf32>
    %c4 = arith.constant 4 : index
    %c0_20 = arith.constant 0 : index
    %c0_21 = arith.constant 0 : index
    %27 = vector.load %arg0[%c4, %c0_20, %c0_21] : memref<9x8x32xf32, #tpu.memory_space<vmem>>, vector<1x8x32xf32>
    %28 = vector.shape_cast %27 : vector<1x8x32xf32> to vector<8x32xf32>
    %c4_22 = arith.constant 4 : index
    %c0_23 = arith.constant 0 : index
    %c0_24 = arith.constant 0 : index
    %29 = vector.load %arg1[%c4_22, %c0_23, %c0_24] : memref<9x8x1xf32, #tpu.memory_space<vmem>>, vector<1x8x1xf32>
    %30 = vector.shape_cast %29 : vector<1x8x1xf32> to vector<8x1xf32>
    %31 = vector.broadcast %30 : vector<8x1xf32> to vector<8x32xf32>
    %32 = arith.mulf %28, %31 : vector<8x32xf32>
    %33 = arith.addf %26, %32 : vector<8x32xf32>
    %c5 = arith.constant 5 : index
    %c0_25 = arith.constant 0 : index
    %c0_26 = arith.constant 0 : index
    %34 = vector.load %arg0[%c5, %c0_25, %c0_26] : memref<9x8x32xf32, #tpu.memory_space<vmem>>, vector<1x8x32xf32>
    %35 = vector.shape_cast %34 : vector<1x8x32xf32> to vector<8x32xf32>
    %c5_27 = arith.constant 5 : index
    %c0_28 = arith.constant 0 : index
    %c0_29 = arith.constant 0 : index
    %36 = vector.load %arg1[%c5_27, %c0_28, %c0_29] : memref<9x8x1xf32, #tpu.memory_space<vmem>>, vector<1x8x1xf32>
    %37 = vector.shape_cast %36 : vector<1x8x1xf32> to vector<8x1xf32>
    %38 = vector.broadcast %37 : vector<8x1xf32> to vector<8x32xf32>
    %39 = arith.mulf %35, %38 : vector<8x32xf32>
    %40 = arith.addf %33, %39 : vector<8x32xf32>
    %c6 = arith.constant 6 : index
    %c0_30 = arith.constant 0 : index
    %c0_31 = arith.constant 0 : index
    %41 = vector.load %arg0[%c6, %c0_30, %c0_31] : memref<9x8x32xf32, #tpu.memory_space<vmem>>, vector<1x8x32xf32>
    %42 = vector.shape_cast %41 : vector<1x8x32xf32> to vector<8x32xf32>
    %c6_32 = arith.constant 6 : index
    %c0_33 = arith.constant 0 : index
    %c0_34 = arith.constant 0 : index
    %43 = vector.load %arg1[%c6_32, %c0_33, %c0_34] : memref<9x8x1xf32, #tpu.memory_space<vmem>>, vector<1x8x1xf32>
    %44 = vector.shape_cast %43 : vector<1x8x1xf32> to vector<8x1xf32>
    %45 = vector.broadcast %44 : vector<8x1xf32> to vector<8x32xf32>
    %46 = arith.mulf %42, %45 : vector<8x32xf32>
    %47 = arith.addf %40, %46 : vector<8x32xf32>
    %c7 = arith.constant 7 : index
    %c0_35 = arith.constant 0 : index
    %c0_36 = arith.constant 0 : index
    %48 = vector.load %arg0[%c7, %c0_35, %c0_36] : memref<9x8x32xf32, #tpu.memory_space<vmem>>, vector<1x8x32xf32>
    %49 = vector.shape_cast %48 : vector<1x8x32xf32> to vector<8x32xf32>
    %c7_37 = arith.constant 7 : index
    %c0_38 = arith.constant 0 : index
    %c0_39 = arith.constant 0 : index
    %50 = vector.load %arg1[%c7_37, %c0_38, %c0_39] : memref<9x8x1xf32, #tpu.memory_space<vmem>>, vector<1x8x1xf32>
    %51 = vector.shape_cast %50 : vector<1x8x1xf32> to vector<8x1xf32>
    %52 = vector.broadcast %51 : vector<8x1xf32> to vector<8x32xf32>
    %53 = arith.mulf %49, %52 : vector<8x32xf32>
    %54 = arith.addf %47, %53 : vector<8x32xf32>
    %c8 = arith.constant 8 : index
    %c0_40 = arith.constant 0 : index
    %c0_41 = arith.constant 0 : index
    %55 = vector.load %arg0[%c8, %c0_40, %c0_41] : memref<9x8x32xf32, #tpu.memory_space<vmem>>, vector<1x8x32xf32>
    %56 = vector.shape_cast %55 : vector<1x8x32xf32> to vector<8x32xf32>
    %c8_42 = arith.constant 8 : index
    %c0_43 = arith.constant 0 : index
    %c0_44 = arith.constant 0 : index
    %57 = vector.load %arg1[%c8_42, %c0_43, %c0_44] : memref<9x8x1xf32, #tpu.memory_space<vmem>>, vector<1x8x1xf32>
    %58 = vector.shape_cast %57 : vector<1x8x1xf32> to vector<8x1xf32>
    %59 = vector.broadcast %58 : vector<8x1xf32> to vector<8x32xf32>
    %60 = arith.mulf %56, %59 : vector<8x32xf32>
    %61 = arith.addf %54, %60 : vector<8x32xf32>
    %c0_45 = arith.constant 0 : index
    %c0_46 = arith.constant 0 : index
    %62 = vector.load %arg2[%c0_45, %c0_46] : memref<8x8xf32, #tpu.memory_space<vmem>>, vector<8x8xf32>
    %cst = arith.constant dense<0.000000e+00> : vector<8x32xf32>
    %63 = tpu.matmul %62, %61, %cst {dimension_numbers = #tpu.dot_dimension_numbers<[1], [0], [0], [1], [0, 0, 1, 1], [], []>} : vector<8x8xf32>, vector<8x32xf32>, vector<8x32xf32> -> vector<8x32xf32>
    %c0_47 = arith.constant 0 : index
    %c0_48 = arith.constant 0 : index
    %64 = vector.load %arg3[%c0_47, %c0_48] : memref<8x32xf32, #tpu.memory_space<vmem>>, vector<8x32xf32>
    tpu.vector_store %arg3[%c0_47, %c0_48], %63 {strides = array<i32>} : memref<8x32xf32, #tpu.memory_space<vmem>>, vector<8x32xf32>,
    return
  }
}

</mosaic_0001>

<bundles_post_ra>
// kernel: _lambda_.14
= control target key start
LH: loop header
LB: loop body
LE: loop exit
PB: predicated region body
PF: predicated region fallthrough
CT: control target
= control target key end

     0   :  { %v253_v0 = vmov 0.0|0.0   ;;  %vm42_vm0 = vcmask 130048   ;;  %v254_v32 = vmov 0   ;;  %s393_s0 = inlined_call_operand.vmem [shape: f32[144,128], index: 0, kind: input, shape index: {}]   ;;  %s394_s1 = inlined_call_operand.vmem [shape: f32[16,144], index: 1, kind: input, shape index: {}]   ;;  %s395_s2 = inlined_call_operand.vmem [shape: f32[16,1], index: 2, kind: input, shape index: {}]   ;;  %s396_s3 = inlined_call_operand.vmem [shape: f32[16,1], index: 3, kind: input, shape index: {}]   ;;  %s397_s4 = inlined_call_operand.vmem [shape: f32[16,1], index: 4, kind: input, shape index: {}]   ;;  %s398_s5 = inlined_call_operand.vmem [shape: f32[16,128], index: 5, kind: output, shape index: {}]  }
   0x1   :  { %200 = vmatprep.subr.bf16.mxu0 %v253_v0  ;;  %v24_v1 = vld [vmem:[%s393_s0] sm:$0xff]  ;;  %v25_v2 = vld [vmem:[%s393_s0 + $0x8] sm:$0xff]  ;;  %227 = vmatprep.subr.bf16.mxu1 %v253_v0  ;;  %v26_v3 = vld [vmem:[%s393_s0 + $0x10] sm:$0xff] }
   0x2   :  { %v201_v4 = vpack.c.bf16 %v25_v2, %v24_v1  ;;  %v27_v5 = vld [vmem:[%s393_s0 + $0x18] sm:$0xff]  ;;  %v28_v7 = vld [vmem:[%s393_s0 + $0x20] sm:$0xff]  ;;  %v29_v8 = vld [vmem:[%s393_s0 + $0x28] sm:$0xff]  ;;  %248 = vset.pattern.permute.xlu1 %v254_v32  ;;  %247 = vset.pattern.permute.xlu0 %v254_v32 }
   0x3   :  { %v204_v6 = vpack.c.bf16 %v27_v5, %v26_v3  ;;  %v21_v9 = vld [vmem:[%s394_s1 + $0x8] sm:$0xff]  ;;  %v23_v10 = vld [vmem:[%s394_s1 + $0x18] sm:$0xff]  ;;  %v207_v11 = vpack.c.bf16 %v29_v8, %v28_v7  ;;  %v30_v12 = vld [vmem:[%s393_s0 + $0x30] sm:$0xff] }
   0x4   :  { %202 = vmatpush1.bf16.msra.mxu0 %v201_v4  ;;  %236 = vmatpush1.bf16.msra.mxu1 %v201_v4  ;;  %v31_v13 = vld [vmem:[%s393_s0 + $0x38] sm:$0xff]  ;;  %v32_v15 = vld [vmem:[%s393_s0 + $0x40] sm:$0xff]  ;;  %v33_v16 = vld [vmem:[%s393_s0 + $0x48] sm:$0xff] }
   0x5   :  { %203 = vmatprep.subr.bf16.mxu0 %v253_v0  ;;  %228 = vmatprep.subr.bf16.mxu1 %v253_v0  ;;  %v210_v14 = vpack.c.bf16 %v31_v13, %v30_v12  ;;  %v213_v17 = vpack.c.bf16 %v33_v16, %v32_v15  ;;  %v34_v18 = vld [vmem:[%s393_s0 + $0x50] sm:$0xff]  ;;  %v35_v19 = vld [vmem:[%s393_s0 + $0x58] sm:$0xff]  ;;  %v36_v21 = vld [vmem:[%s393_s0 + $0x60] sm:$0xff] }
   0x6   :  { %198 = vmatprep.mubr.msk.f32.mxu0 %vm42_vm0, %v21_v9  ;;  %199 = vmatprep.mubr.msk.f32.mxu1 %vm42_vm0, %v23_v10  ;;  %v216_v20 = vpack.c.bf16 %v35_v19, %v34_v18  ;;  %v37_v22 = vld [vmem:[%s393_s0 + $0x68] sm:$0xff]  ;;  %v38_v24 = vld [vmem:[%s393_s0 + $0x70] sm:$0xff]  ;;  %v39_v25 = vld [vmem:[%s393_s0 + $0x78] sm:$0xff] }
   0x7   :  { %v219_v23 = vpack.c.bf16 %v37_v22, %v36_v21  ;;  %v222_v26 = vpack.c.bf16 %v39_v25, %v38_v24  ;;  %v40_v27 = vld [vmem:[%s393_s0 + $0x80] sm:$0xff]  ;;  %v41_v28 = vld [vmem:[%s393_s0 + $0x88] sm:$0xff]  ;;  %v22_v31 = vld [vmem:[%s394_s1 + $0x10] sm:$0xff] }
   0x8   :  { %205 = vmatpush1.bf16.msra.mxu0 %v204_v6  ;;  %237 = vmatpush1.bf16.msra.mxu1 %v204_v6  ;;  %v225_v29 = vpack.c.bf16 %v41_v28, %v40_v27  ;;  %v20_v30 = vld [vmem:[%s394_s1] sm:$0xff]  ;;  %v141_v33 = vld [vmem:[%s395_s2 + $0x8] sm:$0xff] }
   0x9   :  { %206 = vmatprep.subr.bf16.mxu0 %v253_v0  ;;  %229 = vmatprep.subr.bf16.mxu1 %v253_v0  ;;  %v160_v34 = vld [vmem:[%s396_s3] sm:$0xff]  ;;  %v161_v35 = vld [vmem:[%s396_s3 + $0x8] sm:$0xff] }
   0xa   :  { %149 = vperm.xlu1 %248, %v141_v33   ;;  %v176_v36 = vld [vmem:[%s397_s4] sm:$0xff]  ;;  %v177_v50 = vld [vmem:[%s397_s4 + $0x8] sm:$0xff] }
   0xb   :  { %v140_v41 = vld [vmem:[%s395_s2] sm:$0xff] }
   0xc   :  { %208 = vmatpush1.bf16.msra.mxu0 %v207_v11  ;;  %238 = vmatpush1.bf16.msra.mxu1 %v207_v11 }
   0xd   :  { %209 = vmatprep.subr.bf16.mxu0 %v253_v0  ;;  %230 = vmatprep.subr.bf16.mxu1 %v253_v0 }
   0xe   :  { %164 = vperm.xlu1 %248, %v160_v34  }
  0x10   :  { %211 = vmatpush1.bf16.msra.mxu0 %v210_v14  ;;  %239 = vmatpush1.bf16.msra.mxu1 %v210_v14 }
  0x11   :  { %212 = vmatprep.subr.bf16.mxu0 %v253_v0  ;;  %231 = vmatprep.subr.bf16.mxu1 %v253_v0 }
  0x12   :  { %169 = vperm.xlu1 %248, %v161_v35  }
  0x14   :  { %214 = vmatpush1.bf16.msra.mxu0 %v213_v17  ;;  %240 = vmatpush1.bf16.msra.mxu1 %v213_v17 }
  0x15   :  { %215 = vmatprep.subr.bf16.mxu0 %v253_v0  ;;  %232 = vmatprep.subr.bf16.mxu1 %v253_v0 }
  0x16   :  { %180 = vperm.xlu1 %248, %v176_v36  }
  0x18   :  { %217 = vmatpush1.bf16.msra.mxu0 %v216_v20  ;;  %241 = vmatpush1.bf16.msra.mxu1 %v216_v20 }
  0x19   :  { %218 = vmatprep.subr.bf16.mxu0 %v253_v0  ;;  %233 = vmatprep.subr.bf16.mxu1 %v253_v0 }
  0x1c   :  { %220 = vmatpush1.bf16.msra.mxu0 %v219_v23  ;;  %242 = vmatpush1.bf16.msra.mxu1 %v219_v23 }
  0x1d   :  { %221 = vmatprep.subr.bf16.mxu0 %v253_v0  ;;  %234 = vmatprep.subr.bf16.mxu1 %v253_v0 }
  0x20   :  { %223 = vmatpush1.bf16.msra.mxu0 %v222_v26  ;;  %243 = vmatpush1.bf16.msra.mxu1 %v222_v26 }
  0x21   :  { %224 = vmatprep.subr.bf16.mxu0 %v253_v0  ;;  %235 = vmatprep.subr.bf16.mxu1 %v253_v0 }
  0x24   :  { %226 = vmatpush1.bf16.msra.mxu0 %v225_v29  ;;  %244 = vmatpush1.bf16.msra.mxu1 %v225_v29 }
  0x27   :  { %114 = vmatmul.mubr.f32.vlgmr.msra.gmra.mrb[0].mxu0 %v20_v30  ;;  %119 = vmatmul.mubr.f32.vlgmr.msra.gmra.mrb[0].mxu1 %v22_v31 }
  0x89   :  { %v150_v51 = vpop.permute.xlu1 %149 }
  0x8d   :  { %v165_v52 = vpop.permute.xlu1 %164 }
  0x91   :  { %v170_v53 = vpop.permute.xlu1 %169 }
  0x95   :  { %v181_v54 = vpop.permute.xlu1 %180 }
  0xfa   :  { %v115_v37 = vpop.f32.mrb[0].mxu0  ;;  %v120_v38 = vpop.f32.mrb[0].mxu1 }
  0xfb   :  { %124 = vadd.xlane.f32.xlu0 %v115_v37  ;;  %v117_v39 = vpop.f32.mrb[1].mxu0  ;;  %v122_v40 = vpop.f32.mrb[1].mxu1 }
  0xff   :  { %126 = vadd.xlane.f32.xlu0 %v120_v38 }
 0x115   :  { %144 = vperm.xlu0 %247, %v140_v41  }
 0x188   :  { %v125_v42 = vpop.xlane.xlu0 %124 }
 0x189   :  { %v128_v43 = vmul.f32 0.0078125, %v125_v42 }
 0x18b   :  { %v130_v44 = vsub.f32 %v115_v37, %v128_v43 }
 0x18c   :  { %v127_v45 = vpop.xlane.xlu0 %126 }
 0x18d   :  { %v129_v46 = vmul.f32 0.0078125, %v127_v45  ;;  %v132_v47 = vmul.f32 %v130_v44, %v130_v44 }
 0x18f   :  { %134 = vadd.xlane.f32.xlu1 %v132_v47  ;;  %v131_v48 = vsub.f32 %v120_v38, %v129_v46 }
 0x191   :  { %v133_v49 = vmul.f32 %v131_v48, %v131_v48  ;;  %v153_v1 = vmul.f32 %v150_v51, %v131_v48 }
 0x193   :  { %136 = vadd.xlane.f32.xlu1 %v133_v49 }
 0x194   :  { %v145_v61 = vpop.permute.xlu0 %144 }
 0x195   :  { %v152_v62 = vmul.f32 %v145_v61, %v130_v44 }
 0x1a4   :  { %185 = vperm.xlu1 %248, %v177_v50  }
 0x21c   :  { %v135_v55 = vpop.xlane.xlu1 %134 }
 0x21d   :  { %v138_v56 = vmul.f32 0.0078125, %v135_v55 }
 0x21f   :  { %v154_v57 = vadd.f32 1e-05, %v138_v56 }
 0x220   :  { %v137_v58 = vpop.xlane.xlu1 %136 }
 0x221   :  { %249 = vrsqrt.f32 %v154_v57  ;;  %v139_v59 = vmul.f32 0.0078125, %v137_v58 }
 0x223   :  { %v155_v60 = vadd.f32 1e-05, %v139_v59 }
 0x224   :  { %v186_v8 = vpop.permute.xlu1 %185 }
 0x225   :  { %251 = vrsqrt.f32 %v155_v60 }
 0x22b   :  { %v250_v63 = vpop.eup %249 }
 0x22c   :  { %v158_v0 = vmul.f32 %v250_v63, %v152_v62 }
 0x22e   :  { %v172_v2 = vadd.f32 %v165_v52, %v158_v0 }
 0x22f   :  { %v252_v3 = vpop.eup %251 }
 0x230   :  { %v159_v4 = vmul.f32 %v252_v3, %v153_v1  ;;  %vm174_vm1 = vcmp.ge.f32.partialorder %v172_v2, 0.0  ;;  %v188_v5 = vmul.f32 %v181_v54, %v172_v2 }
 0x232   :  { %v173_v6 = vadd.f32 %v170_v53, %v159_v4  ;;  %v190_v7 = vsel %vm174_vm1, %v172_v2, %v188_v5 }
 0x233   :  { %192 = vst [vmem:[%s398_s5] sm:$0xff] %v190_v7 }
 0x234   :  { %vm175_vm2 = vcmp.ge.f32.partialorder %v173_v6, 0.0  ;;  %v189_v9 = vmul.f32 %v186_v8, %v173_v6 }
 0x236   :  { %v191_v10 = vsel %vm175_vm2, %v173_v6, %v189_v9 }
 0x237   :  { %193 = vst [vmem:[%s398_s5 + $0x8] sm:$0xff] %v191_v10 }

// kernel: _lambda_.17
= control target key start
LH: loop header
LB: loop body
LE: loop exit
PB: predicated region body
PF: predicated region fallthrough
CT: control target
= control target key end

     0   :  { %v122_v0 = vmov 0.0|0.0   ;;  %vm123_vm0 = vmmov 0   ;;  %v124_v3 = vmov 0.0   ;;  %v125_v5 = vmov 0   ;;  %s161_s0 = inlined_call_operand.vmem [shape: f32[16,32], index: 0, kind: input, shape index: {}]   ;;  %s162_s2 = inlined_call_operand.vmem [shape: f32[8,1], index: 2, kind: input, shape index: {}]   ;;  %s163_s1 = inlined_call_operand.vmem [shape: f32[8,16], index: 1, kind: input, shape index: {}]   ;;  %s164_s3 = inlined_call_operand.vmem [shape: f32[8,32], index: 3, kind: output, shape index: {}]  }
   0x1   :  { %114 = vmatprep.subr.bf16.mxu0 %v122_v0  ;;  %v15_v1 = vld [vmem:[%s161_s0] sm:$0xff]  ;;  %v16_v2 = vld [vmem:[%s161_s0 + $0x8] sm:$0xff]  ;;  %111 = vmatprep.mubr.msk.f32.mxu0 %vm123_vm0, %v124_v3  ;;  %vm23_vm1 = vcmask 130048   ;;  %vm97_vm2 = vcmask 261120  }
   0x2   :  { %v115_v4 = vpack.c.bf16 %v16_v2, %v15_v1  ;;  %121 = vset.pattern.permute.xlu0 %v125_v5  ;;  %v17_v6 = vld [vmem:[%s162_s2] sm:$0xff] }
   0x3   :  { %20 = vperm.xlu0 %121, %v17_v6   ;;  %v14_v7 = vld [vmem:[%s163_s1] sm:$0xff] }
   0x4   :  { %116 = vmatpush3.bf16.msra.mxu0 %v115_v4 }
   0x7   :  { %112 = vmatmul.mubr.msk.f32.vlgmr.msra.gmra.mrb[0].mxu0 %vm23_vm1, %v14_v7 }
  0x82   :  { %v21_v8 = vpop.permute.xlu0 %20 }
  0xda   :  { %v93_v9 = vpop.f32.mrb[0].mxu0 }
  0xdb   :  { %v94_v10 = vadd.f32 %v93_v9, %v21_v8  ;;  %v113_v11 = vpop.f32.mrb[1].mxu0 }
  0xdd   :  { %98 = vst.msk [vmem:[%s164_s3] sm:$0xff] %vm97_vm2, %v94_v10 }

// kernel: _lambda_.15
= control target key start
LH: loop header
LB: loop body
LE: loop exit
PB: predicated region body
PF: predicated region fallthrough
CT: control target
= control target key end

     0   :  { %v258_v0 = vmov 0.0|0.0   ;;  %vm42_vm0 = vcmask 130048   ;;  %v259_v32 = vmov 0   ;;  %vm124_vm1 = vcmask 261120   ;;  %s404_s0 = inlined_call_operand.vmem [shape: f32[144,32], index: 0, kind: input, shape index: {}]   ;;  %s405_s1 = inlined_call_operand.vmem [shape: f32[16,144], index: 1, kind: input, shape index: {}]   ;;  %s406_s2 = inlined_call_operand.vmem [shape: f32[16,1], index: 2, kind: input, shape index: {}]   ;;  %s407_s3 = inlined_call_operand.vmem [shape: f32[16,1], index: 3, kind: input, shape index: {}]   ;;  %s408_s4 = inlined_call_operand.vmem [shape: f32[16,1], index: 4, kind: input, shape index: {}]   ;;  %s409_s5 = inlined_call_operand.vmem [shape: f32[16,32], index: 5, kind: output, shape index: {}]  }
   0x1   :  { %205 = vmatprep.subr.bf16.mxu0 %v258_v0  ;;  %v24_v1 = vld [vmem:[%s404_s0] sm:$0xff]  ;;  %v25_v2 = vld [vmem:[%s404_s0 + $0x8] sm:$0xff]  ;;  %232 = vmatprep.subr.bf16.mxu1 %v258_v0  ;;  %v26_v3 = vld [vmem:[%s404_s0 + $0x10] sm:$0xff] }
   0x2   :  { %v206_v4 = vpack.c.bf16 %v25_v2, %v24_v1  ;;  %v27_v5 = vld [vmem:[%s404_s0 + $0x18] sm:$0xff]  ;;  %v28_v7 = vld [vmem:[%s404_s0 + $0x20] sm:$0xff]  ;;  %v29_v8 = vld [vmem:[%s404_s0 + $0x28] sm:$0xff]  ;;  %253 = vset.pattern.permute.xlu1 %v259_v32  ;;  %252 = vset.pattern.permute.xlu0 %v259_v32 }
   0x3   :  { %v209_v6 = vpack.c.bf16 %v27_v5, %v26_v3  ;;  %v21_v9 = vld [vmem:[%s405_s1 + $0x8] sm:$0xff]  ;;  %v23_v10 = vld [vmem:[%s405_s1 + $0x18] sm:$0xff]  ;;  %v212_v11 = vpack.c.bf16 %v29_v8, %v28_v7  ;;  %v30_v12 = vld [vmem:[%s404_s0 + $0x30] sm:$0xff] }
   0x4   :  { %207 = vmatpush1.bf16.msra.mxu0 %v206_v4  ;;  %241 = vmatpush1.bf16.msra.mxu1 %v206_v4  ;;  %v31_v13 = vld [vmem:[%s404_s0 + $0x38] sm:$0xff]  ;;  %v32_v15 = vld [vmem:[%s404_s0 + $0x40] sm:$0xff]  ;;  %v33_v16 = vld [vmem:[%s404_s0 + $0x48] sm:$0xff] }
   0x5   :  { %208 = vmatprep.subr.bf16.mxu0 %v258_v0  ;;  %233 = vmatprep.subr.bf16.mxu1 %v258_v0  ;;  %v215_v14 = vpack.c.bf16 %v31_v13, %v30_v12  ;;  %v218_v17 = vpack.c.bf16 %v33_v16, %v32_v15  ;;  %v34_v18 = vld [vmem:[%s404_s0 + $0x50] sm:$0xff]  ;;  %v35_v19 = vld [vmem:[%s404_s0 + $0x58] sm:$0xff]  ;;  %v36_v21 = vld [vmem:[%s404_s0 + $0x60] sm:$0xff] }
   0x6   :  { %203 = vmatprep.mubr.msk.f32.mxu0 %vm42_vm0, %v21_v9  ;;  %204 = vmatprep.mubr.msk.f32.mxu1 %vm42_vm0, %v23_v10  ;;  %v221_v20 = vpack.c.bf16 %v35_v19, %v34_v18  ;;  %v37_v22 = vld [vmem:[%s404_s0 + $0x68] sm:$0xff]  ;;  %v38_v24 = vld [vmem:[%s404_s0 + $0x70] sm:$0xff]  ;;  %v39_v25 = vld [vmem:[%s404_s0 + $0x78] sm:$0xff] }
   0x7   :  { %v224_v23 = vpack.c.bf16 %v37_v22, %v36_v21  ;;  %v227_v26 = vpack.c.bf16 %v39_v25, %v38_v24  ;;  %v40_v27 = vld [vmem:[%s404_s0 + $0x80] sm:$0xff]  ;;  %v41_v28 = vld [vmem:[%s404_s0 + $0x88] sm:$0xff]  ;;  %v22_v31 = vld [vmem:[%s405_s1 + $0x10] sm:$0xff] }
   0x8   :  { %210 = vmatpush1.bf16.msra.mxu0 %v209_v6  ;;  %242 = vmatpush1.bf16.msra.mxu1 %v209_v6  ;;  %v230_v29 = vpack.c.bf16 %v41_v28, %v40_v27  ;;  %v20_v30 = vld [vmem:[%s405_s1] sm:$0xff]  ;;  %v146_v33 = vld [vmem:[%s406_s2 + $0x8] sm:$0xff] }
   0x9   :  { %211 = vmatprep.subr.bf16.mxu0 %v258_v0  ;;  %234 = vmatprep.subr.bf16.mxu1 %v258_v0  ;;  %v165_v34 = vld [vmem:[%s407_s3] sm:$0xff]  ;;  %v166_v35 = vld [vmem:[%s407_s3 + $0x8] sm:$0xff] }
   0xa   :  { %154 = vperm.xlu1 %253, %v146_v33   ;;  %v181_v36 = vld [vmem:[%s408_s4] sm:$0xff]  ;;  %v182_v54 = vld [vmem:[%s408_s4 + $0x8] sm:$0xff] }
   0xb   :  { %v145_v43 = vld [vmem:[%s406_s2] sm:$0xff] }
   0xc   :  { %213 = vmatpush1.bf16.msra.mxu0 %v212_v11  ;;  %243 = vmatpush1.bf16.msra.mxu1 %v212_v11 }
   0xd   :  { %214 = vmatprep.subr.bf16.mxu0 %v258_v0  ;;  %235 = vmatprep.subr.bf16.mxu1 %v258_v0 }
   0xe   :  { %169 = vperm.xlu1 %253, %v165_v34  }
  0x10   :  { %216 = vmatpush1.bf16.msra.mxu0 %v215_v14  ;;  %244 = vmatpush1.bf16.msra.mxu1 %v215_v14 }
  0x11   :  { %217 = vmatprep.subr.bf16.mxu0 %v258_v0  ;;  %236 = vmatprep.subr.bf16.mxu1 %v258_v0 }
  0x12   :  { %174 = vperm.xlu1 %253, %v166_v35  }
  0x14   :  { %219 = vmatpush1.bf16.msra.mxu0 %v218_v17  ;;  %245 = vmatpush1.bf16.msra.mxu1 %v218_v17 }
  0x15   :  { %220 = vmatprep.subr.bf16.mxu0 %v258_v0  ;;  %237 = vmatprep.subr.bf16.mxu1 %v258_v0 }
  0x16   :  { %185 = vperm.xlu1 %253, %v181_v36  }
  0x18   :  { %222 = vmatpush1.bf16.msra.mxu0 %v221_v20  ;;  %246 = vmatpush1.bf16.msra.mxu1 %v221_v20 }
  0x19   :  { %223 = vmatprep.subr.bf16.mxu0 %v258_v0  ;;  %238 = vmatprep.subr.bf16.mxu1 %v258_v0 }
  0x1c   :  { %225 = vmatpush1.bf16.msra.mxu0 %v224_v23  ;;  %247 = vmatpush1.bf16.msra.mxu1 %v224_v23 }
  0x1d   :  { %226 = vmatprep.subr.bf16.mxu0 %v258_v0  ;;  %239 = vmatprep.subr.bf16.mxu1 %v258_v0 }
  0x20   :  { %228 = vmatpush1.bf16.msra.mxu0 %v227_v26  ;;  %248 = vmatpush1.bf16.msra.mxu1 %v227_v26 }
  0x21   :  { %229 = vmatprep.subr.bf16.mxu0 %v258_v0  ;;  %240 = vmatprep.subr.bf16.mxu1 %v258_v0 }
  0x24   :  { %231 = vmatpush1.bf16.msra.mxu0 %v230_v29  ;;  %249 = vmatpush1.bf16.msra.mxu1 %v230_v29 }
  0x27   :  { %114 = vmatmul.mubr.f32.vlgmr.msra.gmra.mrb[0].mxu0 %v20_v30  ;;  %119 = vmatmul.mubr.f32.vlgmr.msra.gmra.mrb[0].mxu1 %v22_v31 }
  0x89   :  { %v155_v55 = vpop.permute.xlu1 %154 }
  0x8d   :  { %v170_v56 = vpop.permute.xlu1 %169 }
  0x91   :  { %v175_v57 = vpop.permute.xlu1 %174 }
  0x95   :  { %v186_v58 = vpop.permute.xlu1 %185 }
  0xfa   :  { %v115_v37 = vpop.f32.mrb[0].mxu0  ;;  %v120_v38 = vpop.f32.mrb[0].mxu1 }
  0xfb   :  { %v117_v39 = vpop.f32.mrb[1].mxu0  ;;  %v125_v40 = vsel %vm124_vm1, %v115_v37, 0.0  ;;  %v122_v41 = vpop.f32.mrb[1].mxu1  ;;  %v128_v42 = vsel %vm124_vm1, %v120_v38, 0.0 }
  0xfc   :  { %126 = vadd.xlane.f32.xlu0 %v125_v40 }
 0x100   :  { %129 = vadd.xlane.f32.xlu0 %v128_v42 }
 0x116   :  { %149 = vperm.xlu0 %252, %v145_v43  }
 0x189   :  { %v127_v44 = vpop.xlane.xlu0 %126 }
 0x18a   :  { %v131_v45 = vmul.f32 0.03125, %v127_v44 }
 0x18c   :  { %v133_v46 = vsub.f32 %v115_v37, %v131_v45 }
 0x18d   :  { %v130_v47 = vpop.xlane.xlu0 %129 }
 0x18e   :  { %v132_v48 = vmul.f32 0.03125, %v130_v47  ;;  %v135_v49 = vmul.f32 %v133_v46, %v133_v46 }
 0x190   :  { %v134_v50 = vsub.f32 %v120_v38, %v132_v48  ;;  %v137_v51 = vsel %vm124_vm1, %v135_v49, 0.0 }
 0x191   :  { %138 = vadd.xlane.f32.xlu1 %v137_v51 }
 0x192   :  { %v136_v52 = vmul.f32 %v134_v50, %v134_v50  ;;  %v158_v5 = vmul.f32 %v155_v55, %v134_v50 }
 0x194   :  { %v140_v53 = vsel %vm124_vm1, %v136_v52, 0.0 }
 0x195   :  { %141 = vadd.xlane.f32.xlu1 %v140_v53  ;;  %v150_v1 = vpop.permute.xlu0 %149 }
 0x196   :  { %v157_v2 = vmul.f32 %v150_v1, %v133_v46 }
 0x1a6   :  { %190 = vperm.xlu1 %253, %v182_v54  }
 0x21e   :  { %v139_v59 = vpop.xlane.xlu1 %138 }
 0x21f   :  { %v143_v60 = vmul.f32 0.03125, %v139_v59 }
 0x221   :  { %v159_v61 = vadd.f32 1e-05, %v143_v60 }
 0x222   :  { %v142_v62 = vpop.xlane.xlu1 %141 }
 0x223   :  { %254 = vrsqrt.f32 %v159_v61  ;;  %v144_v63 = vmul.f32 0.03125, %v142_v62 }
 0x225   :  { %v160_v0 = vadd.f32 1e-05, %v144_v63 }
 0x226   :  { %v191_v12 = vpop.permute.xlu1 %190 }
 0x227   :  { %256 = vrsqrt.f32 %v160_v0 }
 0x22d   :  { %v255_v3 = vpop.eup %254 }
 0x22e   :  { %v163_v4 = vmul.f32 %v255_v3, %v157_v2 }
 0x230   :  { %v177_v6 = vadd.f32 %v170_v56, %v163_v4 }
 0x231   :  { %v257_v7 = vpop.eup %256 }
 0x232   :  { %v164_v8 = vmul.f32 %v257_v7, %v158_v5  ;;  %vm179_vm2 = vcmp.ge.f32.partialorder %v177_v6, 0.0  ;;  %v193_v9 = vmul.f32 %v186_v58, %v177_v6 }
 0x234   :  { %v178_v10 = vadd.f32 %v175_v57, %v164_v8  ;;  %v195_v11 = vsel %vm179_vm2, %v177_v6, %v193_v9 }
 0x235   :  { %197 = vst.msk [vmem:[%s409_s5] sm:$0xff] %vm124_vm1, %v195_v11 }
 0x236   :  { %vm180_vm3 = vcmp.ge.f32.partialorder %v178_v10, 0.0  ;;  %v194_v13 = vmul.f32 %v191_v12, %v178_v10 }
 0x238   :  { %v196_v14 = vsel %vm180_vm3, %v178_v10, %v194_v13 }
 0x239   :  { %198 = vst.msk [vmem:[%s409_s5 + $0x8] sm:$0xff] %vm124_vm1, %v196_v14 }

// kernel: _lambda_.18
= control target key start
LH: loop header
LB: loop body
LE: loop exit
PB: predicated region body
PF: predicated region fallthrough
CT: control target
= control target key end

     0   :  { %v232_v0 = vmov 0.0|0.0   ;;  %vm233_vm0 = vmmov 0   ;;  %v234_v6 = vmov 0.0   ;;  %v235_v10 = vmov 0   ;;  %s296_s4 = inlined_call_operand.vmem [shape: f32[32,128], index: 4, kind: input, shape index: {}]   ;;  %s297_s0 = inlined_call_operand.vmem [shape: f32[16,128], index: 0, kind: input, shape index: {}]   ;;  %s298_s2 = inlined_call_operand.vmem [shape: f32[8,1], index: 2, kind: input, shape index: {}]   ;;  %s299_s1 = inlined_call_operand.vmem [shape: f32[8,16], index: 1, kind: input, shape index: {}]   ;;  %s300_s3 = inlined_call_operand.vmem [shape: f32[8,32], index: 3, kind: input, shape index: {}]   ;;  %s301_s5 = inlined_call_operand.vmem [shape: f32[8,128], index: 5, kind: output, shape index: {}]  }
   0x1   :  { %219 = vmatprep.subr.bf16.mxu0 %v232_v0  ;;  %216 = vmatprep.subr.bf16.mxu1 %v232_v0  ;;  %v104_v1 = vld [vmem:[%s296_s4] sm:$0xff]  ;;  %v105_v2 = vld [vmem:[%s296_s4 + $0x8] sm:$0xff]  ;;  %v106_v7 = vld [vmem:[%s296_s4 + $0x10] sm:$0xff]  ;;  %vm29_vm1 = vcmask 130048   ;;  %vm108_vm2 = vcmask 261120  }
   0x2   :  { %v21_v3 = vld [vmem:[%s297_s0] sm:$0xff]  ;;  %v220_v4 = vpack.c.bf16 %v105_v2, %v104_v1  ;;  %v22_v5 = vld [vmem:[%s297_s0 + $0x8] sm:$0xff]  ;;  %202 = vmatprep.mubr.msk.f32.mxu1 %vm233_vm0, %v234_v6  ;;  %213 = vmatprep.mubr.msk.f32.mxu0 %vm233_vm0, %v234_v6  ;;  %v107_v9 = vld [vmem:[%s296_s4 + $0x18] sm:$0xff] }
   0x3   :  { %v217_v8 = vpack.c.bf16 %v22_v5, %v21_v3  ;;  %231 = vset.pattern.permute.xlu0 %v235_v10  ;;  %v23_v11 = vld [vmem:[%s298_s2] sm:$0xff]  ;;  %v223_v12 = vpack.c.bf16 %v107_v9, %v106_v7 }
   0x4   :  { %221 = vmatpush3.bf16.msra.mxu0 %v220_v4  ;;  %26 = vperm.xlu0 %231, %v23_v11   ;;  %v20_v13 = vld [vmem:[%s299_s1] sm:$0xff] }
   0x5   :  { %218 = vmatpush3.bf16.msra.mxu1 %v217_v8  ;;  %222 = vmatprep.subr.bf16.mxu0 %v232_v0  ;;  %v103_v14 = vld [vmem:[%s300_s3] sm:$0xff] }
   0x8   :  { %203 = vmatmul.mubr.msk.f32.vlgmr.msra.gmra.mrb[0].mxu1 %vm29_vm1, %v20_v13  ;;  %224 = vmatpush3.bf16.msra.mxu0 %v223_v12 }
   0xb   :  { %214 = vmatmul.mubr.msk.f32.vlgmr.msra.gmra.mrb[0].mxu0 %vm108_vm2, %v103_v14 }
  0x83   :  { %v27_v15 = vpop.permute.xlu0 %26 }
  0xdb   :  { %v99_v16 = vpop.f32.mrb[0].mxu1 }
  0xdc   :  { %v100_v17 = vadd.f32 %v99_v16, %v27_v15  ;;  %v204_v18 = vpop.f32.mrb[1].mxu1 }
  0xde   :  { %v178_v19 = vpop.f32.mrb[0].mxu0 }
  0xdf   :  { %v182_v20 = vadd.f32 %v178_v19, %v100_v17  ;;  %v215_v21 = vpop.f32.mrb[1].mxu0 }
  0xe1   :  { %183 = vst [vmem:[%s301_s5] sm:$0xff] %v182_v20 }

// kernel: _lambda_.16
= control target key start
LH: loop header
LB: loop body
LE: loop exit
PB: predicated region body
PF: predicated region fallthrough
CT: control target
= control target key end

     0   :  { %v938_v0 = vmov 0.0|0.0   ;;  %vm939_vm0 = vmmov 0   ;;  %v940_v3 = vmov 0.0   ;;  %v941_v5 = vmov 0   ;;  %s946_s16 = smov 31   ;;  %s947_s17 = smov 127   ;;  %s1292_s0 = inlined_call_operand.vmem [shape: f32[16,32], index: 0, kind: input, shape index: {}]   ;;  %s1293_s2 = inlined_call_operand.vmem [shape: f32[8,1], index: 2, kind: input, shape index: {}]   ;;  %s1294_s6 = inlined_call_operand.vmem [shape: s32[1,32], index: 6, kind: input, shape index: {}]   ;;  %s1295_s1 = inlined_call_operand.vmem [shape: f32[8,16], index: 1, kind: input, shape index: {}]   ;;  %s1296_s5 = inlined_call_operand.vmem [shape: s32[1,32], index: 5, kind: input, shape index: {}]   ;;  %s1297_s7 = inlined_call_operand.vmem [shape: s32[1,32], index: 7, kind: input, shape index: {}]   ;;  %s1298_s3 = inlined_call_operand.vmem [shape: f32[4,16,8], index: 3, kind: input, shape index: {}]   ;;  %s1299_s4 = inlined_call_operand.vmem [shape: f32[16,1], index: 4, kind: input, shape index: {}]   ;;  %s1300_s8 = inlined_call_operand.vmem [shape: f32[16,32], index: 8, kind: output, shape index: {}]  }
   0x1   :  { %904 = vmatprep.subr.bf16.mxu0 %v938_v0  ;;  %v30_v1 = vld [vmem:[%s1292_s0] sm:$0xff]  ;;  %v31_v2 = vld [vmem:[%s1292_s0 + $0x8] sm:$0xff]  ;;  %881 = vmatprep.mubr.msk.f32.mxu0 %vm939_vm0, %v940_v3  ;;  %s942_s0 = smov 32   ;;  %vm38_vm1 = vcmask 130048   ;;  %v128_v10 = vlaneseq  ;;  %vm1301_vm2 = vcmask 1047808   ;;  %v1310_v59 = vmov 0 }
   0x2   :  { %v905_v4 = vpack.c.bf16 %v31_v2, %v30_v1  ;;  %936 = vset.pattern.permute.xlu0 %v941_v5  ;;  %v32_v6 = vld [vmem:[%s1293_s2] sm:$0xff]  ;;  %937 = vset.pattern.permute.xlu1 %v941_v5  ;;  %v1312_v60 = vmov 0  ;;  %s948_s18 = smov 97   ;;  %v1314_v63 = vmov 0  ;;  %v1316_v0 = vmov 0  ;;  %s949_s19 = smov 126  }
   0x3   :  { %v1017_v7 = vld [vmem:[%s1294_s6] sm:$0x1]  ;;  %35 = vperm.xlu0 %936, %v32_v6   ;;  %v129_v11 = vshrl.u32 %v128_v10, 7  ;;  %s945_s6 = smov 30   ;;  %s950_s20 = smov 98  }
   0x4   :  { %116 = vrot.lane.b32.xlu1 %v1017_v7, %s942_s0  ;;  %906 = vmatpush3.bf16.msra.mxu0 %v905_v4  ;;  %v29_v8 = vld [vmem:[%s1295_s1] sm:$0xff]  ;;  %s943_s1 = smov 1   ;;  %s951_s23 = smov 28  }
   0x5   :  { %v112_v9 = vld [vmem:[%s1296_s5] sm:$0x1]  ;;  %v1029_v13 = vsub.s32 0, %v129_v11  ;;  %s944_s5 = smov 2   ;;  %s953_s24 = smov 24  }
   0x6   :  { %v114_v3 = vld [vmem:[%s1297_s7] sm:$0x1]  ;;  %s952_s7 = smov 4   ;;  %s954_s25 = smov 8  }
   0x7   :  { %882 = vmatmul.mubr.msk.f32.vlgmr.msra.gmra.mrb[0].mxu0 %vm38_vm1, %v29_v8  ;;  %122 = vrot.lane.b32.xlu0 %v112_v9, %s942_s0  ;;  %v1033_v16 = vrot.slane %v112_v9, %v1029_v13  ;;  %v1042_v19 = vrot.slane %v1017_v7, %v1029_v13  ;;  %s955_s26 = smov 100   ;;  %s956_s27 = smov 124  }
   0x8   :  { %s957_s28 = smov 104   ;;  %s958_s29 = smov 120  }
  0x76   :  { %v117_v17 = vpop.permute.xlu1 %116 }
  0x77   :  { %v118_v18 = vsel %vm1301_vm2, %v117_v17, %v1017_v7  ;;  %v189_v17 = vrot.slane %v114_v3, %v1029_v13 }
  0x82   :  { %v36_v12 = vpop.permute.xlu0 %35 }
  0x86   :  { %v123_v14 = vpop.permute.xlu0 %122 }
  0x87   :  { %v124_v15 = vsel %vm1301_vm2, %v123_v14, %v112_v9 }
  0x88   :  { %125 = vrot.lane.b32.xlu0 %v124_v15, %s942_s0 }
  0x8c   :  { %150 = vrot.lane.b32.xlu0 %v1033_v16, %s943_s1 }
  0x90   :  { %119 = vrot.lane.b32.xlu0 %v118_v18, %s942_s0 }
  0x94   :  { %172 = vrot.lane.b32.xlu0 %v1033_v16, %s944_s5 }
  0x98   :  { %158 = vrot.lane.b32.xlu0 %v1042_v19, %s945_s6 }
  0x9c   :  { %169 = vrot.lane.b32.xlu0 %v1042_v19, %s944_s5 }
  0xda   :  { %v108_v20 = vpop.f32.mrb[0].mxu0 }
  0xdb   :  { %v1047_v21 = vadd.f32 %v108_v20, %v36_v12  ;;  %v883_v22 = vpop.f32.mrb[1].mxu0 }
  0xdd   :  { %346 = vrot.lane.b32.xlu1 %v1047_v21, %s942_s0  ;;  %884 = vmatprep.subr.mxu0 %v1047_v21 }
  0xde   :  { %885 = vmatpush3.msra.mxu0 %v1047_v21 }
  0xe1   :  { %139 = vrot.lane.b32.xlu1 %v1033_v16, %s946_s16 }
  0xe5   :  { %161 = vrot.lane.b32.xlu1 %v1033_v16, %s945_s6 }
  0xe9   :  { %132 = vrot.lane.b32.xlu1 %v1042_v19, %s946_s16 }
  0xed   :  { %147 = vrot.lane.b32.xlu1 %v1042_v19, %s943_s1 }
  0xfa   :  { %v126_v25 = vpop.permute.xlu0 %125 }
  0xfb   :  { %v1061_v29 = vsel %vm1301_vm2, %v126_v25, %v112_v9 }
  0xfe   :  { %v151_v26 = vpop.permute.xlu0 %150 }
  0xff   :  { %v152_v32 = vsub.s32 %v1061_v29, %v151_v26 }
 0x101   :  { %v154_v37 = vsub.s32 0, %v152_v32 }
 0x102   :  { %v120_v28 = vpop.permute.xlu0 %119 }
 0x103   :  { %v841_v42 = vmin.u32 %v154_v37, %v152_v32  ;;  %v1069_v43 = vsel %vm1301_vm2, %v120_v28, %v1017_v7 }
 0x105   :  { %vm156_vm5 = vcmp.eq.s32.totalorder %v841_v42, 1 }
 0x106   :  { %v173_v33 = vpop.permute.xlu0 %172 }
 0x107   :  { %v174_v35 = vsub.s32 %v1061_v29, %v173_v33 }
 0x109   :  { %v176_v41 = vsub.s32 0, %v174_v35 }
 0x10a   :  { %v159_v39 = vpop.permute.xlu0 %158 }
 0x10b   :  { %v843_v46 = vmin.u32 %v176_v41, %v174_v35  ;;  %vm160_vm11 = vcmp.eq.s32.totalorder %v1069_v43, %v159_v39 }
 0x10d   :  { %vm178_vm8 = vcmp.eq.s32.totalorder %v843_v46, 2 }
 0x10e   :  { %v170_v48 = vpop.permute.xlu0 %169 }
 0x10f   :  { %vm171_vm9 = vcmp.eq.s32.totalorder %v1069_v43, %v170_v48 }
 0x110   :  { %vm179_vm13 = vmand %vm171_vm9, %vm178_vm8 }
 0x111   :  { %v388_v52 = vsel %vm179_vm13, 1, %v941_v5 }
 0x112   :  { %v392_v55 = vrot.slane %v388_v52, %v1029_v13 }
 0x114   :  { %vm1099_vm1 = vcmp.eq.s32.totalorder %v392_v55, 1 }
 0x115   :  { %v1315_v63 = vsel %vm1099_vm1, 4294967295, %v1314_v63 }
 0x14f   :  { %v347_v23 = vpop.permute.xlu1 %346 }
 0x150   :  { %v348_v24 = vsel %vm1301_vm2, %v347_v23, %v1047_v21 }
 0x151   :  { %349 = vrot.lane.b32.xlu1 %v348_v24, %s942_s0 }
 0x153   :  { %v140_v27 = vpop.permute.xlu1 %139 }
 0x154   :  { %v141_v31 = vsub.s32 %v1061_v29, %v140_v27 }
 0x156   :  { %v143_v34 = vsub.s32 0, %v141_v31 }
 0x157   :  { %v162_v30 = vpop.permute.xlu1 %161 }
 0x158   :  { %v163_v38 = vsub.s32 %v1061_v29, %v162_v30  ;;  %v840_v40 = vmin.u32 %v143_v34, %v141_v31 }
 0x15a   :  { %v165_v44 = vsub.s32 0, %v163_v38  ;;  %vm145_vm3 = vcmp.eq.s32.totalorder %v840_v40, 1 }
 0x15b   :  { %v133_v36 = vpop.permute.xlu1 %132 }
 0x15c   :  { %vm134_vm4 = vcmp.eq.s32.totalorder %v1069_v43, %v133_v36  ;;  %v842_v47 = vmin.u32 %v165_v44, %v163_v38 }
 0x15d   :  { %vm146_vm7 = vmand %vm134_vm4, %vm145_vm3 }
 0x15e   :  { %vm167_vm12 = vcmp.eq.s32.totalorder %v842_v47, 2  ;;  %v352_v49 = vsel %vm146_vm7, 1, %v941_v5 }
 0x15f   :  { %v148_v45 = vpop.permute.xlu1 %147  ;;  %vm168_vm14 = vmand %vm160_vm11, %vm167_vm12  ;;  %v356_v51 = vrot.slane %v352_v49, %v1029_v13 }
 0x160   :  { %vm149_vm6 = vcmp.eq.s32.totalorder %v1069_v43, %v148_v45  ;;  %v376_v54 = vsel %vm168_vm14, 1, %v941_v5 }
 0x161   :  { %vm157_vm10 = vmand %vm149_vm6, %vm156_vm5  ;;  %v380_v57 = vrot.slane %v376_v54, %v1029_v13  ;;  %vm1089_vm0 = vcmp.eq.s32.totalorder %v356_v51, 1  ;;  %v253_v54 = vld [vmem:[%s1299_s4 + $0x8] sm:$0xff] }
 0x162   :  { %v364_v50 = vsel %vm157_vm10, 1, %v941_v5  ;;  %v1313_v60 = vsel %vm1089_vm0, 4294967295, %v1312_v60 }
 0x163   :  { %v368_v53 = vrot.slane %v364_v50, %v1029_v13  ;;  %vm1103_vm3 = vcmp.eq.s32.totalorder %v380_v57, 1 }
 0x164   :  { %v1317_v0 = vsel %vm1103_vm3, 4294967295, %v1316_v0 }
 0x165   :  { %vm1085_vm15 = vcmp.eq.s32.totalorder %v368_v53, 1 }
 0x166   :  { %v1311_v59 = vsel %vm1085_vm15, 4294967295, %v1310_v59 }
 0x1c3   :  { %v350_v56 = vpop.permute.xlu1 %349 }
 0x1c4   :  { %v351_v58 = vsel %vm1301_vm2, %v350_v56, %v1047_v21 }
 0x1c5   :  { %v370_v61 = vsel %vm1085_vm15, %v351_v58, -inf  ;;  %v358_v62 = vsel %vm1089_vm0, %v351_v58, -inf  ;;  %v394_v1 = vsel %vm1099_vm1, %v351_v58, -inf  ;;  %v382_v2 = vsel %vm1103_vm3, %v351_v58, -inf }
 0x1c6   :  { %372 = vrot.lane.b32.xlu0 %v370_v61, %s947_s17  ;;  %360 = vrot.lane.b32.xlu1 %v358_v62, %s948_s18 }
 0x1ca   :  { %396 = vrot.lane.b32.xlu0 %v394_v1, %s949_s19  ;;  %384 = vrot.lane.b32.xlu1 %v382_v2, %s950_s20 }
 0x1ce   :  { %180 = vrot.lane.b32.xlu1 %v114_v3, %s942_s0 }
 0x1d2   :  { %197 = vrot.lane.b32.xlu1 %v1042_v19, %s951_s23 }
 0x238   :  { %v373_v4 = vpop.permute.xlu0 %372  ;;  %v361_v6 = vpop.permute.xlu1 %360 }
 0x239   :  { %v363_v7 = vmax.f32 %v1047_v21, %v361_v6 }
 0x23b   :  { %v375_v8 = vmax.f32 %v363_v7, %v373_v4 }
 0x23c   :  { %v385_v9 = vpop.permute.xlu1 %384  ;;  %v397_v11 = vpop.permute.xlu0 %396 }
 0x23d   :  { %v387_v10 = vmax.f32 %v375_v8, %v385_v9 }
 0x23f   :  { %v1119_v12 = vmax.f32 %v387_v10, %v397_v11 }
 0x240   :  { %v181_v14 = vpop.permute.xlu1 %180 }
 0x241   :  { %400 = vrot.lane.b32.xlu0 %v1119_v12, %s942_s0  ;;  %v182_v15 = vsel %vm1301_vm2, %v181_v14, %v114_v3 }
 0x242   :  { %183 = vrot.lane.b32.xlu1 %v182_v15, %s942_s0 }
 0x244   :  { %v198_v21 = vpop.permute.xlu1 %197 }
 0x245   :  { %212 = vrot.lane.b32.xlu0 %v1042_v19, %s952_s7  ;;  %v199_v28 = vsub.s32 %v1069_v43, %v198_v21 }
 0x246   :  { %190 = vrot.lane.b32.xlu1 %v189_v17, %s951_s23 }
 0x247   :  { %v201_v31 = vsub.s32 0, %v199_v28 }
 0x249   :  { %227 = vrot.lane.b32.xlu0 %v1042_v19, %s953_s24  ;;  %v844_v38 = vmin.u32 %v201_v31, %v199_v28  ;;  %v851_v31 = vld [vmem:[%s1298_s3 + $0x18] sm:$0xff] }
 0x24a   :  { %242 = vrot.lane.b32.xlu1 %v1042_v19, %s954_s25 }
 0x24b   :  { %vm203_vm10 = vcmp.eq.s32.totalorder %v844_v38, 1 }
 0x24d   :  { %193 = vrot.lane.b32.xlu0 %v1033_v16, %s951_s23 }
 0x24e   :  { %208 = vrot.lane.b32.xlu1 %v1033_v16, %s952_s7 }
 0x251   :  { %205 = vrot.lane.b32.xlu0 %v189_v17, %s952_s7 }
 0x252   :  { %223 = vrot.lane.b32.xlu1 %v1033_v16, %s953_s24 }
 0x255   :  { %220 = vrot.lane.b32.xlu0 %v189_v17, %s953_s24 }
 0x256   :  { %238 = vrot.lane.b32.xlu1 %v1033_v16, %s954_s25 }
 0x259   :  { %235 = vrot.lane.b32.xlu0 %v189_v17, %s954_s25 }
 0x2b3   :  { %v401_v18 = vpop.permute.xlu0 %400 }
 0x2b4   :  { %v402_v20 = vsel %vm1301_vm2, %v401_v18, %v1119_v12  ;;  %v184_v19 = vpop.permute.xlu1 %183 }
 0x2b5   :  { %403 = vrot.lane.b32.xlu0 %v402_v20, %s942_s0  ;;  %v185_v32 = vsel %vm1301_vm2, %v184_v19, %v114_v3 }
 0x2b7   :  { %v213_v22 = vpop.permute.xlu0 %212 }
 0x2b8   :  { %v191_v24 = vpop.permute.xlu1 %190  ;;  %v214_v16 = vsub.s32 %v1069_v43, %v213_v22 }
 0x2b9   :  { %vm192_vm4 = vcmp.eq.s32.totalorder %v185_v32, %v191_v24 }
 0x2ba   :  { %v216_v34 = vsub.s32 0, %v214_v16 }
 0x2bb   :  { %v228_v23 = vpop.permute.xlu0 %227 }
 0x2bc   :  { %v243_v26 = vpop.permute.xlu1 %242  ;;  %v229_v35 = vsub.s32 %v1069_v43, %v228_v23  ;;  %v845_v39 = vmin.u32 %v216_v34, %v214_v16  ;;  %v850_v16 = vld [vmem:[%s1298_s3 + $0x10] sm:$0xff] }
 0x2bd   :  { %v244_v36 = vsub.s32 %v1069_v43, %v243_v26 }
 0x2be   :  { %v231_v40 = vsub.s32 0, %v229_v35  ;;  %vm218_vm12 = vcmp.eq.s32.totalorder %v845_v39, 1 }
 0x2bf   :  { %v194_v25 = vpop.permute.xlu0 %193  ;;  %v246_v41 = vsub.s32 0, %v244_v36 }
 0x2c0   :  { %v209_v30 = vpop.permute.xlu1 %208  ;;  %vm195_vm5 = vcmp.eq.s32.totalorder %v1061_v29, %v194_v25  ;;  %v846_v45 = vmin.u32 %v231_v40, %v229_v35 }
 0x2c1   :  { %vm196_vm7 = vmand %vm192_vm4, %vm195_vm5  ;;  %vm210_vm8 = vcmp.eq.s32.totalorder %v1061_v29, %v209_v30  ;;  %v847_v43 = vmin.u32 %v246_v41, %v244_v36 }
 0x2c2   :  { %vm204_vm13 = vmand %vm196_vm7, %vm203_vm10  ;;  %vm233_vm4 = vcmp.eq.s32.totalorder %v846_v45, 2  ;;  %vm1329_vm10 = vnez %v1311_v59  ;;  %v250_v59 = vld [vmem:[%s1298_s3] sm:$0xff] }
 0x2c3   :  { %v206_v27 = vpop.permute.xlu0 %205  ;;  %v406_v46 = vsel %vm204_vm13, 1, %v941_v5  ;;  %vm248_vm5 = vcmp.eq.s32.totalorder %v847_v43, 2  ;;  %vm1332_vm13 = vnez %v1317_v0 }
 0x2c4   :  { %v224_v37 = vpop.permute.xlu1 %223  ;;  %vm207_vm6 = vcmp.eq.s32.totalorder %v185_v32, %v206_v27  ;;  %v410_v48 = vrot.slane %v406_v46, %v1029_v13 }
 0x2c5   :  { %vm211_vm9 = vmand %vm207_vm6, %vm210_vm8  ;;  %vm225_vm3 = vcmp.eq.s32.totalorder %v1061_v29, %v224_v37 }
 0x2c6   :  { %vm219_vm2 = vmand %vm211_vm9, %vm218_vm12  ;;  %vm1331_vm12 = vnez %v1315_v63 }
 0x2c7   :  { %v221_v33 = vpop.permute.xlu0 %220  ;;  %v418_v47 = vsel %vm219_vm2, 1, %v941_v5 }
 0x2c8   :  { %vm222_vm11 = vcmp.eq.s32.totalorder %v185_v32, %v221_v33  ;;  %v239_v44 = vpop.permute.xlu1 %238  ;;  %v422_v49 = vrot.slane %v418_v47, %v1029_v13 }
 0x2c9   :  { %vm226_vm1 = vmand %vm222_vm11, %vm225_vm3  ;;  %vm240_vm0 = vcmp.eq.s32.totalorder %v1061_v29, %v239_v44  ;;  %vm1151_vm3 = vcmp.eq.s32.totalorder %v410_v48, 1  ;;  %vm1330_vm11 = vnez %v1313_v60  ;;  %v251_v60 = vld [vmem:[%s1298_s3 + $0x8] sm:$0xff] }
 0x2ca   :  { %vm234_vm6 = vmand %vm226_vm1, %vm233_vm4  ;;  %vm1157_vm7 = vcmp.eq.s32.totalorder %v422_v49, 1  ;;  %vm264_vm4 = vcmask 64512  }
 0x2cb   :  { %v236_v42 = vpop.permute.xlu0 %235  ;;  %v430_v50 = vsel %vm234_vm6, 1, %v941_v5  ;;  %891 = vmatprep.mubr.msk.f32.mxu1 %vm264_vm4, %v850_v16  ;;  %886 = vmatprep.mubr.msk.f32.mxu0 %vm264_vm4, %v250_v59 }
 0x2cc   :  { %vm237_vm14 = vcmp.eq.s32.totalorder %v185_v32, %v236_v42  ;;  %v434_v55 = vrot.slane %v430_v50, %v1029_v13  ;;  %887 = vmatmul.mubr.msk.f32.vlgmr.msra.gmra.mrb[2].mxu0 %vm264_vm4, %v251_v60 }
 0x2cd   :  { %vm241_vm15 = vmand %vm237_vm14, %vm240_vm0  ;;  %vm1320_vm0 = vcmask 1047808  }
 0x2ce   :  { %vm249_vm8 = vmand %vm241_vm15, %vm248_vm5  ;;  %vm1169_vm2 = vcmp.eq.s32.totalorder %v434_v55, 1 }
 0x2cf   :  { %v442_v51 = vsel %vm249_vm8, 1, %v941_v5  ;;  %vm1327_vm1 = vmmov %vm1320_vm0 }
 0x2d0   :  { %v446_v56 = vrot.slane %v442_v51, %v1029_v13  ;;  %vm1328_vm9 = vmmov %vm1320_vm0 }
 0x2d1   :  { %vm1333_vm14 = vmmov %vm1320_vm0 }
 0x2d2   :  { %vm1173_vm15 = vcmp.eq.s32.totalorder %v446_v56, 1  ;;  %vm1334_vm5 = vmmov %vm1320_vm0 }
 0x2d3   :  { %vm1335_vm6 = vmmov %vm1320_vm0 }
 0x2d4   :  { %vm1336_vm8 = vmmov %vm1320_vm0 }
 0x327   :  { %v404_v52 = vpop.permute.xlu0 %403 }
 0x328   :  { %v405_v53 = vsel %vm1320_vm0, %v404_v52, %v1119_v12 }
 0x329   :  { %v412_v57 = vsel %vm1151_vm3, %v405_v53, -inf  ;;  %v424_v5 = vsel %vm1157_vm7, %v405_v53, -inf  ;;  %v436_v13 = vsel %vm1169_vm2, %v405_v53, -inf  ;;  %v448_v62 = vsel %vm1173_vm15, %v405_v53, -inf }
 0x32a   :  { %414 = vrot.lane.b32.xlu1 %v412_v57, %s955_s26  ;;  %426 = vrot.lane.b32.xlu0 %v424_v5, %s956_s27 }
 0x32e   :  { %438 = vrot.lane.b32.xlu1 %v436_v13, %s957_s28  ;;  %450 = vrot.lane.b32.xlu0 %v448_v62, %s958_s29 }
 0x39c   :  { %v427_v1 = vpop.permute.xlu0 %426  ;;  %v415_v2 = vpop.permute.xlu1 %414 }
 0x39d   :  { %v417_v3 = vmax.f32 %v1119_v12, %v415_v2 }
 0x39f   :  { %v429_v4 = vmax.f32 %v417_v3, %v427_v1  ;;  %v854_v3 = vld [vmem:[%s1298_s3 + $0x20] sm:$0xff]  ;;  %v888_v29 = vpop.f32.mrb[2].mxu0 }
 0x3a0   :  { %v439_v6 = vpop.permute.xlu1 %438  ;;  %v451_v8 = vpop.permute.xlu0 %450 }
 0x3a1   :  { %v441_v7 = vmax.f32 %v429_v4, %v439_v6  ;;  %v855_v4 = vld [vmem:[%s1298_s3 + $0x28] sm:$0xff]  ;;  %v858_v6 = vld [vmem:[%s1298_s3 + $0x30] sm:$0xff] }
 0x3a3   :  { %v453_v9 = vmax.f32 %v441_v7, %v451_v8 }
 0x3a5   :  { %540 = vrot.lane.b32.xlu1 %v453_v9, %s942_s0  ;;  %889 = vmatprep.subr.mxu1 %v453_v9 }
 0x3a6   :  { %890 = vmatpush3.msra.mxu1 %v453_v9 }
 0x3a7   :  { %892 = vmatmul.mubr.msk.f32.vlgmr.msra.gmra.mrb[0].mxu1 %vm264_vm4, %v851_v31 }
 0x3a8   :  { %896 = vmatprep.mubr.msk.f32.mxu1 %vm264_vm4, %v854_v3 }
 0x417   :  { %v541_v10 = vpop.permute.xlu1 %540 }
 0x418   :  { %v542_v11 = vsel %vm1327_vm1, %v541_v10, %v453_v9  ;;  %vm1337_vm1 = vmmov %vm1320_vm0 }
 0x419   :  { %543 = vrot.lane.b32.xlu0 %v542_v11, %s942_s0 }
 0x48b   :  { %v544_v14 = vpop.permute.xlu0 %543 }
 0x48c   :  { %v545_v15 = vsel %vm1328_vm9, %v544_v14, %v453_v9 }
 0x48d   :  { %v552_v12 = vsel %vm1329_vm10, %v545_v15, -inf  ;;  %v546_v17 = vsel %vm1330_vm11, %v545_v15, -inf  ;;  %v564_v18 = vsel %vm1331_vm12, %v545_v15, -inf  ;;  %v558_v20 = vsel %vm1332_vm13, %v545_v15, -inf  ;;  %v252_v15 = vld [vmem:[%s1299_s4] sm:$0xff] }
 0x48e   :  { %554 = vrot.lane.b32.xlu0 %v552_v12, %s947_s17  ;;  %548 = vrot.lane.b32.xlu1 %v546_v17, %s948_s18  ;;  %v337_v12 = vpop.f32.mrb[3].mxu0 }
 0x492   :  { %566 = vrot.lane.b32.xlu0 %v564_v18, %s949_s19  ;;  %560 = vrot.lane.b32.xlu1 %v558_v20, %s950_s20 }
 0x500   :  { %v555_v21 = vpop.permute.xlu0 %554  ;;  %v549_v22 = vpop.permute.xlu1 %548 }
 0x501   :  { %v551_v19 = vmax.f32 %v453_v9, %v549_v22 }
 0x503   :  { %v557_v23 = vmax.f32 %v551_v19, %v555_v21 }
 0x504   :  { %v561_v24 = vpop.permute.xlu1 %560  ;;  %v567_v26 = vpop.permute.xlu0 %566 }
 0x505   :  { %v563_v25 = vmax.f32 %v557_v23, %v561_v24  ;;  %v859_v23 = vld [vmem:[%s1298_s3 + $0x38] sm:$0xff] }
 0x507   :  { %v569_v27 = vmax.f32 %v563_v25, %v567_v26 }
 0x509   :  { %570 = vrot.lane.b32.xlu1 %v569_v27, %s942_s0 }
 0x57b   :  { %v571_v28 = vpop.permute.xlu1 %570 }
 0x57c   :  { %v572_v30 = vsel %vm1333_vm14, %v571_v28, %v569_v27 }
 0x57d   :  { %573 = vrot.lane.b32.xlu0 %v572_v30, %s942_s0 }
 0x5ef   :  { %v574_v32 = vpop.permute.xlu0 %573 }
 0x5f0   :  { %v575_v33 = vsel %vm1334_vm5, %v574_v32, %v569_v27 }
 0x5f1   :  { %v582_v34 = vsel %vm1157_vm7, %v575_v33, -inf  ;;  %v576_v35 = vsel %vm1151_vm3, %v575_v33, -inf  ;;  %v594_v36 = vsel %vm1173_vm15, %v575_v33, -inf  ;;  %v588_v37 = vsel %vm1169_vm2, %v575_v33, -inf }
 0x5f2   :  { %584 = vrot.lane.b32.xlu0 %v582_v34, %s956_s27  ;;  %578 = vrot.lane.b32.xlu1 %v576_v35, %s955_s26 }
 0x5f6   :  { %596 = vrot.lane.b32.xlu0 %v594_v36, %s958_s29  ;;  %590 = vrot.lane.b32.xlu1 %v588_v37, %s957_s28 }
 0x664   :  { %v585_v38 = vpop.permute.xlu0 %584  ;;  %v579_v39 = vpop.permute.xlu1 %578 }
 0x665   :  { %v581_v40 = vmax.f32 %v569_v27, %v579_v39 }
 0x667   :  { %v587_v41 = vmax.f32 %v581_v40, %v585_v38 }
 0x668   :  { %v591_v42 = vpop.permute.xlu1 %590  ;;  %v597_v45 = vpop.permute.xlu0 %596 }
 0x669   :  { %v593_v44 = vmax.f32 %v587_v41, %v591_v42 }
 0x66b   :  { %v599_v43 = vmax.f32 %v593_v44, %v597_v45 }
 0x66d   :  { %686 = vrot.lane.b32.xlu1 %v599_v43, %s942_s0  ;;  %894 = vmatprep.subr.mxu1 %v599_v43 }
 0x66e   :  { %895 = vmatpush3.msra.mxu1 %v599_v43 }
 0x66f   :  { %897 = vmatmul.mubr.msk.f32.vlgmr.msra.gmra.mrb[0].mxu1 %vm264_vm4, %v855_v4 }
 0x670   :  { %901 = vmatprep.mubr.msk.f32.mxu1 %vm264_vm4, %v858_v6 }
 0x6df   :  { %v687_v46 = vpop.permute.xlu1 %686 }
 0x6e0   :  { %v688_v47 = vsel %vm1335_vm6, %v687_v46, %v599_v43 }
 0x6e1   :  { %689 = vrot.lane.b32.xlu0 %v688_v47, %s942_s0 }
 0x753   :  { %v690_v48 = vpop.permute.xlu0 %689 }
 0x754   :  { %v691_v49 = vsel %vm1336_vm8, %v690_v48, %v599_v43 }
 0x755   :  { %v698_v50 = vsel %vm1329_vm10, %v691_v49, -inf  ;;  %v692_v51 = vsel %vm1330_vm11, %v691_v49, -inf  ;;  %v710_v52 = vsel %vm1331_vm12, %v691_v49, -inf  ;;  %v704_v53 = vsel %vm1332_vm13, %v691_v49, -inf }
 0x756   :  { %700 = vrot.lane.b32.xlu0 %v698_v50, %s947_s17  ;;  %694 = vrot.lane.b32.xlu1 %v692_v51, %s948_s18 }
 0x75a   :  { %712 = vrot.lane.b32.xlu0 %v710_v52, %s949_s19  ;;  %706 = vrot.lane.b32.xlu1 %v704_v53, %s950_s20 }
 0x7c8   :  { %v701_v63 = vpop.permute.xlu0 %700  ;;  %v695_v55 = vpop.permute.xlu1 %694 }
 0x7c9   :  { %v697_v0 = vmax.f32 %v599_v43, %v695_v55 }
 0x7cb   :  { %v703_v56 = vmax.f32 %v697_v0, %v701_v63 }
 0x7cc   :  { %v707_v57 = vpop.permute.xlu1 %706  ;;  %v713_v13 = vpop.permute.xlu0 %712 }
 0x7cd   :  { %v709_v5 = vmax.f32 %v703_v56, %v707_v57 }
 0x7cf   :  { %v715_v62 = vmax.f32 %v709_v5, %v713_v13 }
 0x7d1   :  { %716 = vrot.lane.b32.xlu1 %v715_v62, %s942_s0 }
 0x843   :  { %v717_v1 = vpop.permute.xlu1 %716 }
 0x844   :  { %v718_v2 = vsel %vm1320_vm0, %v717_v1, %v715_v62 }
 0x845   :  { %719 = vrot.lane.b32.xlu0 %v718_v2, %s942_s0 }
 0x8b7   :  { %v720_v7 = vpop.permute.xlu0 %719 }
 0x8b8   :  { %v721_v8 = vsel %vm1337_vm1, %v720_v7, %v715_v62 }
 0x8b9   :  { %v728_v9 = vsel %vm1157_vm7, %v721_v8, -inf  ;;  %v722_v10 = vsel %vm1151_vm3, %v721_v8, -inf  ;;  %v740_v11 = vsel %vm1173_vm15, %v721_v8, -inf  ;;  %v734_v14 = vsel %vm1169_vm2, %v721_v8, -inf }
 0x8ba   :  { %730 = vrot.lane.b32.xlu0 %v728_v9, %s956_s27  ;;  %724 = vrot.lane.b32.xlu1 %v722_v10, %s955_s26  ;;  %vm832_vm3 = vcmask 261120  }
 0x8be   :  { %742 = vrot.lane.b32.xlu0 %v740_v11, %s958_s29  ;;  %736 = vrot.lane.b32.xlu1 %v734_v14, %s957_s28 }
 0x8c2   :  { %261 = vperm.xlu0 %936, %v253_v54   ;;  %256 = vperm.xlu1 %937, %v252_v15  }
 0x92c   :  { %v731_v61 = vpop.permute.xlu0 %730  ;;  %v725_v17 = vpop.permute.xlu1 %724 }
 0x92d   :  { %v727_v58 = vmax.f32 %v715_v62, %v725_v17 }
 0x92f   :  { %v733_v18 = vmax.f32 %v727_v58, %v731_v61 }
 0x930   :  { %v737_v20 = vpop.permute.xlu1 %736  ;;  %v743_v22 = vpop.permute.xlu0 %742 }
 0x931   :  { %v739_v21 = vmax.f32 %v733_v18, %v737_v20 }
 0x933   :  { %v745_v19 = vmax.f32 %v739_v21, %v743_v22 }
 0x935   :  { %899 = vmatprep.subr.mxu1 %v745_v19 }
 0x936   :  { %900 = vmatpush3.msra.mxu1 %v745_v19 }
 0x937   :  { %902 = vmatmul.mubr.msk.f32.vlgmr.msra.gmra.mrb[0].mxu1 %vm264_vm4, %v859_v23 }
 0x941   :  { %v257_v24 = vpop.permute.xlu1 %256  ;;  %v262_v25 = vpop.permute.xlu0 %261 }
 0x942   :  { %v338_v26 = vadd.f32 %v337_v12, %v257_v24  ;;  %v343_v27 = vadd.f32 %v888_v29, %v262_v25 }
 0xa0a   :  { %v903_v28 = vpop.f32.mrb[0].mxu1 }
 0xa0b   :  { %v908_v30 = vadd.f32 %v903_v28, %v343_v27  ;;  %v821_v16 = vpop.f32.mrb[1].mxu1 }
 0xa0c   :  { %v910_v31 = vadd.f32 %v821_v16, %v338_v26 }
 0xa0d   :  { %834 = vst.msk [vmem:[%s1300_s8 + $0x8] sm:$0xff] %vm832_vm3, %v908_v30 }
 0xa0e   :  { %833 = vst.msk [vmem:[%s1300_s8] sm:$0xff] %vm832_vm3, %v910_v31 }

// kernel: _lambda_.19
= control target key start
LH: loop header
LB: loop body
LE: loop exit
PB: predicated region body
PF: predicated region fallthrough
CT: control target
= control target key end

     0   :  { %v485_v3 = vmov 0.0   ;;  %v486_v8 = vmov 0   ;;  %vm35_vm0 = vcmask 130048   ;;  %s760_s0 = inlined_call_operand.vmem [shape: f32[16,512], index: 0, kind: input, shape index: {}]   ;;  %s761_s4 = inlined_call_operand.vmem [shape: f32[128,512], index: 4, kind: input, shape index: {}]   ;;  %s762_s1 = inlined_call_operand.vmem [shape: f32[8,16], index: 1, kind: input, shape index: {}]   ;;  %s763_s2 = inlined_call_operand.vmem [shape: f32[8,1], index: 2, kind: input, shape index: {}]   ;;  %s764_s3 = inlined_call_operand.vmem [shape: f32[8,128], index: 3, kind: input, shape index: {}]   ;;  %s765_s5 = inlined_call_operand.vmem [shape: f32[8,512], index: 5, kind: output, shape index: {}]  }
   0x1   :  { %v22_v0 = vld [vmem:[%s760_s0 + $0x8] sm:$0xff]  ;;  %v24_v2 = vld [vmem:[%s760_s0 + $0x18] sm:$0xff]  ;;  %103 = vmatprep.mubr.f32.mxu0 %v485_v3  ;;  %174 = vmatprep.mubr.f32.mxu1 %v485_v3  ;;  %v21_v6 = vld [vmem:[%s760_s0] sm:$0xff] }
   0x2   :  { %v26_v1 = vld [vmem:[%s760_s0 + $0x28] sm:$0xff]  ;;  %v28_v5 = vld [vmem:[%s760_s0 + $0x38] sm:$0xff]  ;;  %v25_v7 = vld [vmem:[%s760_s0 + $0x20] sm:$0xff]  ;;  %484 = vset.pattern.permute.xlu0 %v486_v8 }
   0x3   :  { %v402_v4 = vpack.c.bf16 %v26_v1, %v22_v0  ;;  %v406_v9 = vpack.c.bf16 %v28_v5, %v24_v2  ;;  %v404_v10 = vpack.c.bf16 %v25_v7, %v21_v6  ;;  %v23_v11 = vld [vmem:[%s760_s0 + $0x10] sm:$0xff]  ;;  %v183_v13 = vld [vmem:[%s761_s4 + $0x8] sm:$0xff]  ;;  %v185_v16 = vld [vmem:[%s761_s4 + $0x18] sm:$0xff] }
   0x4   :  { %v27_v12 = vld [vmem:[%s760_s0 + $0x30] sm:$0xff]  ;;  %v187_v15 = vld [vmem:[%s761_s4 + $0x28] sm:$0xff]  ;;  %v189_v17 = vld [vmem:[%s761_s4 + $0x38] sm:$0xff] }
   0x5   :  { %403 = vmatprep.subr.bf16.mxu0 %v402_v4  ;;  %v408_v14 = vpack.c.bf16 %v27_v12, %v23_v11  ;;  %407 = vmatprep.subr.bf16.mxu1 %v406_v9  ;;  %v410_v18 = vpack.c.bf16 %v187_v15, %v183_v13  ;;  %v442_v19 = vpack.c.bf16 %v189_v17, %v185_v16  ;;  %v20_v20 = vld [vmem:[%s762_s1] sm:$0xff]  ;;  %v184_v24 = vld [vmem:[%s761_s4 + $0x10] sm:$0xff]  ;;  %v191_v26 = vld [vmem:[%s761_s4 + $0x48] sm:$0xff] }
   0x6   :  { %405 = vmatpush1.bf16.msra.mxu0 %v404_v10  ;;  %v182_v21 = vld [vmem:[%s761_s4] sm:$0xff]  ;;  %v188_v25 = vld [vmem:[%s761_s4 + $0x30] sm:$0xff]  ;;  %v195_v28 = vld [vmem:[%s761_s4 + $0x68] sm:$0xff] }
   0x7   :  { %v186_v22 = vld [vmem:[%s761_s4 + $0x20] sm:$0xff]  ;;  %409 = vmatpush1.bf16.msra.mxu1 %v408_v14  ;;  %411 = vmatprep.subr.bf16.mxu0 %v410_v18  ;;  %v444_v27 = vpack.c.bf16 %v188_v25, %v184_v24  ;;  %v193_v29 = vld [vmem:[%s761_s4 + $0x58] sm:$0xff]  ;;  %v414_v31 = vpack.c.bf16 %v195_v28, %v191_v26  ;;  %v192_v35 = vld [vmem:[%s761_s4 + $0x50] sm:$0xff] }
   0x8   :  { %v412_v23 = vpack.c.bf16 %v186_v22, %v182_v21  ;;  %443 = vmatprep.subr.bf16.mxu1 %v442_v19  ;;  %v197_v30 = vld [vmem:[%s761_s4 + $0x78] sm:$0xff]  ;;  %v190_v33 = vld [vmem:[%s761_s4 + $0x40] sm:$0xff]  ;;  %v196_v37 = vld [vmem:[%s761_s4 + $0x70] sm:$0xff] }
   0x9   :  { %400 = vmatmul.mubr.msk.f32.vlgmr.msra.gmra.mrb[0].mxu0 %vm35_vm0, %v20_v20  ;;  %v446_v32 = vpack.c.bf16 %v197_v30, %v193_v29  ;;  %v194_v34 = vld [vmem:[%s761_s4 + $0x60] sm:$0xff]  ;;  %v199_v38 = vld [vmem:[%s761_s4 + $0x88] sm:$0xff]  ;;  %v448_v40 = vpack.c.bf16 %v196_v37, %v192_v35  ;;  %v201_v42 = vld [vmem:[%s761_s4 + $0x98] sm:$0xff] }
   0xa   :  { %401 = vmatmul.mubr.msk.f32.vlgmr.msra.gmra.mrb[0].mxu1 %vm35_vm0, %v20_v20  ;;  %413 = vmatpush1.bf16.msra.mxu0 %v412_v23  ;;  %v416_v36 = vpack.c.bf16 %v194_v34, %v190_v33  ;;  %v203_v39 = vld [vmem:[%s761_s4 + $0xa8] sm:$0xff]  ;;  %v205_v43 = vld [vmem:[%s761_s4 + $0xb8] sm:$0xff]  ;;  %v198_v44 = vld [vmem:[%s761_s4 + $0x80] sm:$0xff] }
   0xb   :  { %445 = vmatpush1.bf16.msra.mxu1 %v444_v27  ;;  %415 = vmatprep.subr.bf16.mxu0 %v414_v31  ;;  %v418_v41 = vpack.c.bf16 %v203_v39, %v199_v38  ;;  %v450_v45 = vpack.c.bf16 %v205_v43, %v201_v42  ;;  %v202_v46 = vld [vmem:[%s761_s4 + $0xa0] sm:$0xff]  ;;  %v200_v47 = vld [vmem:[%s761_s4 + $0x90] sm:$0xff]  ;;  %v207_v49 = vld [vmem:[%s761_s4 + $0xc8] sm:$0xff] }
   0xc   :  { %447 = vmatprep.subr.bf16.mxu1 %v446_v32  ;;  %v204_v48 = vld [vmem:[%s761_s4 + $0xb0] sm:$0xff]  ;;  %310 = vmatprep.mubr.f32.mxu0 %v485_v3  ;;  %v211_v50 = vld [vmem:[%s761_s4 + $0xe8] sm:$0xff]  ;;  %v209_v51 = vld [vmem:[%s761_s4 + $0xd8] sm:$0xff]  ;;  %v420_v52 = vpack.c.bf16 %v202_v46, %v198_v44 }
   0xd   :  { %381 = vmatprep.mubr.f32.mxu1 %v485_v3  ;;  %v213_v53 = vld [vmem:[%s761_s4 + $0xf8] sm:$0xff]  ;;  %v452_v54 = vpack.c.bf16 %v204_v48, %v200_v47  ;;  %v422_v55 = vpack.c.bf16 %v211_v50, %v207_v49  ;;  %v206_v56 = vld [vmem:[%s761_s4 + $0xc0] sm:$0xff]  ;;  %v208_v58 = vld [vmem:[%s761_s4 + $0xd0] sm:$0xff] }
   0xe   :  { %417 = vmatpush1.bf16.msra.mxu0 %v416_v36  ;;  %v210_v57 = vld [vmem:[%s761_s4 + $0xe0] sm:$0xff]  ;;  %v454_v59 = vpack.c.bf16 %v213_v53, %v209_v51  ;;  %v212_v60 = vld [vmem:[%s761_s4 + $0xf0] sm:$0xff]  ;;  %v215_v61 = vld [vmem:[%s761_s4 + $0x108] sm:$0xff] }
   0xf   :  { %449 = vmatpush1.bf16.msra.mxu1 %v448_v40  ;;  %419 = vmatprep.subr.bf16.mxu0 %v418_v41  ;;  %v219_v62 = vld [vmem:[%s761_s4 + $0x128] sm:$0xff]  ;;  %v217_v63 = vld [vmem:[%s761_s4 + $0x118] sm:$0xff]  ;;  %v424_v1 = vpack.c.bf16 %v210_v57, %v206_v56  ;;  %v456_v2 = vpack.c.bf16 %v212_v60, %v208_v58  ;;  %v214_v4 = vld [vmem:[%s761_s4 + $0x100] sm:$0xff] }
  0x10   :  { %451 = vmatprep.subr.bf16.mxu1 %v450_v45  ;;  %v221_v0 = vld [vmem:[%s761_s4 + $0x138] sm:$0xff]  ;;  %v426_v3 = vpack.c.bf16 %v219_v62, %v215_v61  ;;  %v218_v5 = vld [vmem:[%s761_s4 + $0x120] sm:$0xff]  ;;  %v216_v6 = vld [vmem:[%s761_s4 + $0x110] sm:$0xff] }
  0x11   :  { %v458_v7 = vpack.c.bf16 %v221_v0, %v217_v63  ;;  %v220_v8 = vld [vmem:[%s761_s4 + $0x130] sm:$0xff]  ;;  %v223_v9 = vld [vmem:[%s761_s4 + $0x148] sm:$0xff]  ;;  %v225_v11 = vld [vmem:[%s761_s4 + $0x158] sm:$0xff]  ;;  %v428_v13 = vpack.c.bf16 %v218_v5, %v214_v4 }
  0x12   :  { %421 = vmatpush1.bf16.msra.mxu0 %v420_v52  ;;  %v227_v10 = vld [vmem:[%s761_s4 + $0x168] sm:$0xff]  ;;  %v229_v12 = vld [vmem:[%s761_s4 + $0x178] sm:$0xff]  ;;  %v460_v14 = vpack.c.bf16 %v220_v8, %v216_v6  ;;  %v222_v16 = vld [vmem:[%s761_s4 + $0x140] sm:$0xff] }
  0x13   :  { %453 = vmatpush1.bf16.msra.mxu1 %v452_v54  ;;  %423 = vmatprep.subr.bf16.mxu0 %v422_v55  ;;  %v430_v15 = vpack.c.bf16 %v227_v10, %v223_v9  ;;  %v226_v17 = vld [vmem:[%s761_s4 + $0x160] sm:$0xff]  ;;  %v224_v18 = vld [vmem:[%s761_s4 + $0x150] sm:$0xff]  ;;  %v462_v19 = vpack.c.bf16 %v229_v12, %v225_v11  ;;  %v231_v21 = vld [vmem:[%s761_s4 + $0x188] sm:$0xff] }
  0x14   :  { %455 = vmatprep.subr.bf16.mxu1 %v454_v59  ;;  %v228_v20 = vld [vmem:[%s761_s4 + $0x170] sm:$0xff]  ;;  %v235_v22 = vld [vmem:[%s761_s4 + $0x1a8] sm:$0xff]  ;;  %v233_v23 = vld [vmem:[%s761_s4 + $0x198] sm:$0xff]  ;;  %v432_v25 = vpack.c.bf16 %v226_v17, %v222_v16 }
  0x15   :  { %v237_v24 = vld [vmem:[%s761_s4 + $0x1b8] sm:$0xff]  ;;  %v29_v26 = vld [vmem:[%s763_s2] sm:$0xff]  ;;  %v464_v27 = vpack.c.bf16 %v228_v20, %v224_v18  ;;  %v434_v28 = vpack.c.bf16 %v235_v22, %v231_v21  ;;  %v232_v31 = vld [vmem:[%s761_s4 + $0x190] sm:$0xff] }
  0x16   :  { %425 = vmatpush1.bf16.msra.mxu0 %v424_v1  ;;  %v230_v29 = vld [vmem:[%s761_s4 + $0x180] sm:$0xff]  ;;  %v466_v32 = vpack.c.bf16 %v237_v24, %v233_v23  ;;  %v236_v33 = vld [vmem:[%s761_s4 + $0x1b0] sm:$0xff]  ;;  %v239_v34 = vld [vmem:[%s761_s4 + $0x1c8] sm:$0xff]  ;;  %32 = vperm.xlu0 %484, %v29_v26  }
  0x17   :  { %457 = vmatpush1.bf16.msra.mxu1 %v456_v2  ;;  %427 = vmatprep.subr.bf16.mxu0 %v426_v3  ;;  %v234_v30 = vld [vmem:[%s761_s4 + $0x1a0] sm:$0xff]  ;;  %v243_v35 = vld [vmem:[%s761_s4 + $0x1e8] sm:$0xff]  ;;  %v241_v36 = vld [vmem:[%s761_s4 + $0x1d8] sm:$0xff]  ;;  %v468_v39 = vpack.c.bf16 %v236_v33, %v232_v31 }
  0x18   :  { %459 = vmatprep.subr.bf16.mxu1 %v458_v7  ;;  %v245_v37 = vld [vmem:[%s761_s4 + $0x1f8] sm:$0xff]  ;;  %v436_v38 = vpack.c.bf16 %v234_v30, %v230_v29  ;;  %v438_v40 = vpack.c.bf16 %v243_v35, %v239_v34  ;;  %v238_v41 = vld [vmem:[%s761_s4 + $0x1c0] sm:$0xff]  ;;  %v240_v44 = vld [vmem:[%s761_s4 + $0x1d0] sm:$0xff] }
  0x19   :  { %v242_v42 = vld [vmem:[%s761_s4 + $0x1e0] sm:$0xff]  ;;  %v470_v43 = vpack.c.bf16 %v245_v37, %v241_v36  ;;  %v244_v45 = vld [vmem:[%s761_s4 + $0x1f0] sm:$0xff] }
  0x1a   :  { %429 = vmatpush1.bf16.msra.mxu0 %v428_v13  ;;  %v440_v46 = vpack.c.bf16 %v242_v42, %v238_v41  ;;  %v472_v47 = vpack.c.bf16 %v244_v45, %v240_v44  ;;  %v181_v48 = vld [vmem:[%s764_s3] sm:$0xff] }
  0x1b   :  { %461 = vmatpush1.bf16.msra.mxu1 %v460_v14  ;;  %431 = vmatprep.subr.bf16.mxu0 %v430_v15 }
  0x1c   :  { %463 = vmatprep.subr.bf16.mxu1 %v462_v19 }
  0x1e   :  { %433 = vmatpush1.bf16.msra.mxu0 %v432_v25 }
  0x1f   :  { %465 = vmatpush1.bf16.msra.mxu1 %v464_v27  ;;  %435 = vmatprep.subr.bf16.mxu0 %v434_v28 }
  0x20   :  { %467 = vmatprep.subr.bf16.mxu1 %v466_v32 }
  0x22   :  { %437 = vmatpush1.bf16.msra.mxu0 %v436_v38 }
  0x23   :  { %469 = vmatpush1.bf16.msra.mxu1 %v468_v39  ;;  %439 = vmatprep.subr.bf16.mxu0 %v438_v40 }
  0x24   :  { %471 = vmatprep.subr.bf16.mxu1 %v470_v43 }
  0x26   :  { %441 = vmatpush1.bf16.msra.mxu0 %v440_v46 }
  0x27   :  { %473 = vmatpush1.bf16.msra.mxu1 %v472_v47 }
  0x29   :  { %311 = vmatmul.mubr.f32.vlgmr.msra.gmra.mrb[0].mxu0 %v181_v48 }
  0x2a   :  { %382 = vmatmul.mubr.f32.vlgmr.msra.gmra.mrb[0].mxu1 %v181_v48 }
  0x95   :  { %v33_v49 = vpop.permute.xlu0 %32 }
  0xfc   :  { %v312_v50 = vpop.f32.mrb[0].mxu0 }
  0xfd   :  { %v474_v51 = vadd.f32 %v312_v50, %v33_v49  ;;  %v383_v52 = vpop.f32.mrb[0].mxu1  ;;  %v314_v53 = vpop.f32.mrb[1].mxu0 }
  0xfe   :  { %v476_v54 = vadd.f32 %v383_v52, %v33_v49  ;;  %v475_v55 = vadd.f32 %v314_v53, %v33_v49  ;;  %v385_v56 = vpop.f32.mrb[1].mxu1 }
  0xff   :  { %392 = vst [vmem:[%s765_s5] sm:$0xff] %v474_v51  ;;  %v477_v57 = vadd.f32 %v385_v56, %v33_v49 }
 0x100   :  { %394 = vst [vmem:[%s765_s5 + $0x10] sm:$0xff] %v476_v54  ;;  %393 = vst [vmem:[%s765_s5 + $0x8] sm:$0xff] %v475_v55 }
 0x101   :  { %395 = vst [vmem:[%s765_s5 + $0x18] sm:$0xff] %v477_v57 }

// kernel: _lambda_.22
= control target key start
LH: loop header
LB: loop body
LE: loop exit
PB: predicated region body
PF: predicated region fallthrough
CT: control target
= control target key end

     0   :  { %v389_v0 = vmov 0   ;;  %v390_v10 = vmov 0.0   ;;  %vm189_vm0 = vcmask 64512   ;;  %s561_s1 = inlined_call_operand.vmem [shape: f32[9,8,1], index: 1, kind: input, shape index: {}]   ;;  %s562_s0 = inlined_call_operand.vmem [shape: f32[9,8,512], index: 0, kind: input, shape index: {}]   ;;  %s563_s2 = inlined_call_operand.vmem [shape: f32[8,8], index: 2, kind: input, shape index: {}]   ;;  %s564_s3 = inlined_call_operand.vmem [shape: f32[8,512], index: 3, kind: output, shape index: {}]  }
   0x1   :  { %388 = vset.pattern.permute.xlu1 %v389_v0  ;;  %387 = vset.pattern.permute.xlu0 %v389_v0  ;;  %v352_v1 = vld [vmem:[%s561_s1 + $0x10] sm:$0xff]  ;;  %v18_v2 = vld [vmem:[%s561_s1] sm:$0xff]  ;;  %v357_v3 = vld [vmem:[%s561_s1 + $0x18] sm:$0xff] }
   0x2   :  { %57 = vperm.xlu1 %388, %v352_v1   ;;  %21 = vperm.xlu0 %387, %v18_v2   ;;  %v347_v4 = vld [vmem:[%s561_s1 + $0x8] sm:$0xff]  ;;  %v362_v6 = vld [vmem:[%s561_s1 + $0x20] sm:$0xff]  ;;  %v377_v7 = vld [vmem:[%s561_s1 + $0x38] sm:$0xff] }
   0x3   :  { %v367_v5 = vld [vmem:[%s561_s1 + $0x28] sm:$0xff]  ;;  %v372_v8 = vld [vmem:[%s561_s1 + $0x30] sm:$0xff]  ;;  %v382_v9 = vld [vmem:[%s561_s1 + $0x40] sm:$0xff]  ;;  %257 = vmatprep.mubr.f32.mxu0 %v390_v10  ;;  %328 = vmatprep.mubr.f32.mxu1 %v390_v10 }
   0x4   :  { %v14_v13 = vld [vmem:[%s562_s0] sm:$0xff]  ;;  %v15_v14 = vld [vmem:[%s562_s0 + $0x8] sm:$0xff]  ;;  %v16_v16 = vld [vmem:[%s562_s0 + $0x10] sm:$0xff] }
   0x5   :  { %v348_v15 = vld [vmem:[%s562_s0 + $0x40] sm:$0xff]  ;;  %v17_v17 = vld [vmem:[%s562_s0 + $0x18] sm:$0xff]  ;;  %v344_v19 = vld [vmem:[%s562_s0 + $0x28] sm:$0xff] }
   0x6   :  { %77 = vperm.xlu1 %388, %v357_v3   ;;  %37 = vperm.xlu0 %387, %v347_v4   ;;  %v343_v18 = vld [vmem:[%s562_s0 + $0x20] sm:$0xff]  ;;  %v345_v20 = vld [vmem:[%s562_s0 + $0x30] sm:$0xff]  ;;  %v346_v21 = vld [vmem:[%s562_s0 + $0x38] sm:$0xff] }
   0x7   :  { %v349_v22 = vld [vmem:[%s562_s0 + $0x48] sm:$0xff]  ;;  %v350_v23 = vld [vmem:[%s562_s0 + $0x50] sm:$0xff]  ;;  %v351_v24 = vld [vmem:[%s562_s0 + $0x58] sm:$0xff] }
   0x8   :  { %v353_v31 = vld [vmem:[%s562_s0 + $0x60] sm:$0xff]  ;;  %v354_v32 = vld [vmem:[%s562_s0 + $0x68] sm:$0xff]  ;;  %v355_v33 = vld [vmem:[%s562_s0 + $0x70] sm:$0xff] }
   0x9   :  { %v356_v34 = vld [vmem:[%s562_s0 + $0x78] sm:$0xff]  ;;  %v358_v43 = vld [vmem:[%s562_s0 + $0x80] sm:$0xff]  ;;  %v359_v50 = vld [vmem:[%s562_s0 + $0x88] sm:$0xff] }
   0xa   :  { %117 = vperm.xlu1 %388, %v367_v5   ;;  %97 = vperm.xlu0 %387, %v362_v6   ;;  %v360_v51 = vld [vmem:[%s562_s0 + $0x90] sm:$0xff]  ;;  %v361_v52 = vld [vmem:[%s562_s0 + $0x98] sm:$0xff]  ;;  %v363_v57 = vld [vmem:[%s562_s0 + $0xa0] sm:$0xff] }
   0xb   :  { %v364_v62 = vld [vmem:[%s562_s0 + $0xa8] sm:$0xff]  ;;  %v365_v63 = vld [vmem:[%s562_s0 + $0xb0] sm:$0xff]  ;;  %v366_v0 = vld [vmem:[%s562_s0 + $0xb8] sm:$0xff] }
   0xc   :  { %v368_v5 = vld [vmem:[%s562_s0 + $0xc0] sm:$0xff] }
   0xe   :  { %157 = vperm.xlu1 %388, %v377_v7   ;;  %137 = vperm.xlu0 %387, %v372_v8  }
  0x12   :  { %177 = vperm.xlu0 %387, %v382_v9  }
  0x81   :  { %v58_v11 = vpop.permute.xlu1 %57  ;;  %v22_v12 = vpop.permute.xlu0 %21 }
  0x82   :  { %v24_v27 = vmul.f32 %v22_v12, %v14_v13  ;;  %v25_v28 = vmul.f32 %v22_v12, %v15_v14  ;;  %v26_v29 = vmul.f32 %v22_v12, %v16_v16  ;;  %v27_v30 = vmul.f32 %v22_v12, %v17_v17  ;;  %v370_v12 = vld [vmem:[%s562_s0 + $0xd0] sm:$0xff]  ;;  %v371_v13 = vld [vmem:[%s562_s0 + $0xd8] sm:$0xff] }
  0x83   :  { %v60_v39 = vmul.f32 %v348_v15, %v58_v11  ;;  %v61_v40 = vmul.f32 %v349_v22, %v58_v11  ;;  %v62_v41 = vmul.f32 %v350_v23, %v58_v11  ;;  %v63_v42 = vmul.f32 %v351_v24, %v58_v11  ;;  %v369_v11 = vld [vmem:[%s562_s0 + $0xc8] sm:$0xff] }
  0x84   :  { %v374_v24 = vld [vmem:[%s562_s0 + $0xe8] sm:$0xff] }
  0x85   :  { %v78_v25 = vpop.permute.xlu1 %77  ;;  %v38_v26 = vpop.permute.xlu0 %37 }
  0x86   :  { %v40_v35 = vmul.f32 %v343_v18, %v38_v26  ;;  %v41_v36 = vmul.f32 %v344_v19, %v38_v26  ;;  %v42_v37 = vmul.f32 %v345_v20, %v38_v26  ;;  %v43_v38 = vmul.f32 %v346_v21, %v38_v26  ;;  %v373_v18 = vld [vmem:[%s562_s0 + $0xe0] sm:$0xff]  ;;  %v376_v26 = vld [vmem:[%s562_s0 + $0xf8] sm:$0xff] }
  0x87   :  { %v80_v53 = vmul.f32 %v353_v31, %v78_v25  ;;  %v81_v54 = vmul.f32 %v354_v32, %v78_v25  ;;  %v82_v55 = vmul.f32 %v355_v33, %v78_v25  ;;  %v83_v56 = vmul.f32 %v356_v34, %v78_v25  ;;  %v375_v25 = vld [vmem:[%s562_s0 + $0xf0] sm:$0xff]  ;;  %v379_v31 = vld [vmem:[%s562_s0 + $0x108] sm:$0xff] }
  0x88   :  { %v44_v44 = vadd.f32 %v40_v35, %v24_v27  ;;  %v45_v45 = vadd.f32 %v41_v36, %v25_v28  ;;  %v46_v46 = vadd.f32 %v42_v37, %v26_v29  ;;  %v47_v47 = vadd.f32 %v43_v38, %v27_v30  ;;  %v381_v35 = vld [vmem:[%s562_s0 + $0x118] sm:$0xff]  ;;  %v378_v37 = vld [vmem:[%s562_s0 + $0x100] sm:$0xff] }
  0x89   :  { %v118_v48 = vpop.permute.xlu1 %117  ;;  %v98_v49 = vpop.permute.xlu0 %97 }
  0x8a   :  { %v64_v58 = vadd.f32 %v60_v39, %v44_v44  ;;  %v65_v59 = vadd.f32 %v61_v40, %v45_v45  ;;  %v66_v60 = vadd.f32 %v62_v41, %v46_v46  ;;  %v67_v61 = vadd.f32 %v63_v42, %v47_v47  ;;  %v380_v39 = vld [vmem:[%s562_s0 + $0x110] sm:$0xff] }
  0x8b   :  { %v100_v1 = vmul.f32 %v358_v43, %v98_v49  ;;  %v101_v2 = vmul.f32 %v359_v50, %v98_v49  ;;  %v102_v3 = vmul.f32 %v360_v51, %v98_v49  ;;  %v103_v4 = vmul.f32 %v361_v52, %v98_v49 }
  0x8c   :  { %v84_v6 = vadd.f32 %v80_v53, %v64_v58  ;;  %v85_v7 = vadd.f32 %v81_v54, %v65_v59  ;;  %v86_v8 = vadd.f32 %v82_v55, %v66_v60  ;;  %v87_v9 = vadd.f32 %v83_v56, %v67_v61  ;;  %v188_v60 = vld [vmem:[%s563_s2] sm:$0xff] }
  0x8d   :  { %v138_v10 = vpop.permute.xlu0 %137  ;;  %v120_v14 = vmul.f32 %v363_v57, %v118_v48  ;;  %v121_v15 = vmul.f32 %v364_v62, %v118_v48  ;;  %v122_v16 = vmul.f32 %v365_v63, %v118_v48  ;;  %v123_v17 = vmul.f32 %v366_v0, %v118_v48  ;;  %v158_v23 = vpop.permute.xlu1 %157 }
  0x8e   :  { %v104_v19 = vadd.f32 %v100_v1, %v84_v6  ;;  %v105_v20 = vadd.f32 %v101_v2, %v85_v7  ;;  %v106_v21 = vadd.f32 %v102_v3, %v86_v8  ;;  %v107_v22 = vadd.f32 %v103_v4, %v87_v9 }
  0x8f   :  { %v140_v27 = vmul.f32 %v368_v5, %v138_v10  ;;  %v141_v28 = vmul.f32 %v369_v11, %v138_v10  ;;  %v142_v29 = vmul.f32 %v370_v12, %v138_v10  ;;  %v143_v30 = vmul.f32 %v371_v13, %v138_v10 }
  0x90   :  { %v125_v33 = vadd.f32 %v121_v15, %v105_v20  ;;  %v127_v34 = vadd.f32 %v123_v17, %v107_v22  ;;  %v124_v36 = vadd.f32 %v120_v14, %v104_v19  ;;  %v126_v38 = vadd.f32 %v122_v16, %v106_v21 }
  0x91   :  { %v178_v32 = vpop.permute.xlu0 %177  ;;  %v160_v40 = vmul.f32 %v373_v18, %v158_v23  ;;  %v161_v41 = vmul.f32 %v374_v24, %v158_v23  ;;  %v162_v42 = vmul.f32 %v375_v25, %v158_v23  ;;  %v163_v43 = vmul.f32 %v376_v26, %v158_v23 }
  0x92   :  { %v145_v44 = vadd.f32 %v141_v28, %v125_v33  ;;  %v147_v45 = vadd.f32 %v143_v30, %v127_v34  ;;  %v144_v46 = vadd.f32 %v140_v27, %v124_v36  ;;  %v146_v47 = vadd.f32 %v142_v29, %v126_v38 }
  0x93   :  { %v181_v48 = vmul.f32 %v379_v31, %v178_v32  ;;  %v183_v49 = vmul.f32 %v381_v35, %v178_v32  ;;  %v180_v50 = vmul.f32 %v378_v37, %v178_v32  ;;  %v182_v51 = vmul.f32 %v380_v39, %v178_v32 }
  0x94   :  { %v165_v52 = vadd.f32 %v161_v41, %v145_v44  ;;  %v167_v53 = vadd.f32 %v163_v43, %v147_v45  ;;  %v164_v54 = vadd.f32 %v160_v40, %v144_v46  ;;  %v166_v55 = vadd.f32 %v162_v42, %v146_v47 }
  0x96   :  { %v185_v56 = vadd.f32 %v181_v48, %v165_v52  ;;  %v187_v57 = vadd.f32 %v183_v49, %v167_v53  ;;  %v184_v58 = vadd.f32 %v180_v50, %v164_v54  ;;  %v186_v59 = vadd.f32 %v182_v51, %v166_v55 }
  0x98   :  { %193 = vmatprep.subr.mxu0 %v185_v56  ;;  %264 = vmatprep.subr.mxu1 %v187_v57 }
  0x99   :  { %194 = vmatpush1.msra.mxu0 %v184_v58  ;;  %265 = vmatpush1.msra.mxu1 %v186_v59 }
  0x9a   :  { %383 = vmatmul.mubr.msk.f32.vlgmr.msra.gmra.mrb[0].mxu0 %vm189_vm0, %v188_v60  ;;  %384 = vmatmul.mubr.msk.f32.vlgmr.msra.gmra.mrb[0].mxu1 %vm189_vm0, %v188_v60 }
 0x16d   :  { %v259_v61 = vpop.f32.mrb[0].mxu0  ;;  %v330_v62 = vpop.f32.mrb[0].mxu1 }
 0x16e   :  { %335 = vst [vmem:[%s564_s3] sm:$0xff] %v259_v61  ;;  %337 = vst [vmem:[%s564_s3 + $0x10] sm:$0xff] %v330_v62  ;;  %v261_v63 = vpop.f32.mrb[1].mxu0  ;;  %v332_v0 = vpop.f32.mrb[1].mxu1 }
 0x16f   :  { %336 = vst [vmem:[%s564_s3 + $0x8] sm:$0xff] %v261_v63  ;;  %338 = vst [vmem:[%s564_s3 + $0x18] sm:$0xff] %v332_v0 }

// kernel: _lambda_.23
= control target key start
LH: loop header
LB: loop body
LE: loop exit
PB: predicated region body
PF: predicated region fallthrough
CT: control target
= control target key end

     0   :  { %v224_v0 = vmov 0   ;;  %v225_v10 = vmov 0.0   ;;  %vm226_vm0 = vmmov 0   ;;  %vm115_vm1 = vcmask 64512   ;;  %s315_s1 = inlined_call_operand.vmem [shape: f32[9,8,1], index: 1, kind: input, shape index: {}]   ;;  %s316_s0 = inlined_call_operand.vmem [shape: f32[9,8,128], index: 0, kind: input, shape index: {}]   ;;  %s317_s2 = inlined_call_operand.vmem [shape: f32[8,8], index: 2, kind: input, shape index: {}]   ;;  %s318_s3 = inlined_call_operand.vmem [shape: f32[8,128], index: 3, kind: input, shape index: {}]   ;;  %s319_s4 = inlined_call_operand.vmem [shape: f32[8,128], index: 4, kind: output, shape index: {}]  }
   0x1   :  { %223 = vset.pattern.permute.xlu1 %v224_v0  ;;  %222 = vset.pattern.permute.xlu0 %v224_v0  ;;  %v198_v1 = vld [vmem:[%s315_s1 + $0x10] sm:$0xff]  ;;  %v18_v2 = vld [vmem:[%s315_s1] sm:$0xff]  ;;  %v200_v3 = vld [vmem:[%s315_s1 + $0x18] sm:$0xff] }
   0x2   :  { %42 = vperm.xlu1 %223, %v198_v1   ;;  %21 = vperm.xlu0 %222, %v18_v2   ;;  %v196_v4 = vld [vmem:[%s315_s1 + $0x8] sm:$0xff]  ;;  %v202_v6 = vld [vmem:[%s315_s1 + $0x20] sm:$0xff]  ;;  %v208_v7 = vld [vmem:[%s315_s1 + $0x38] sm:$0xff] }
   0x3   :  { %v204_v5 = vld [vmem:[%s315_s1 + $0x28] sm:$0xff]  ;;  %v206_v8 = vld [vmem:[%s315_s1 + $0x30] sm:$0xff]  ;;  %v210_v9 = vld [vmem:[%s315_s1 + $0x40] sm:$0xff]  ;;  %214 = vmatprep.subr.mxu0 %v225_v10  ;;  %216 = vmatprep.mubr.msk.f32.mxu0 %vm226_vm0, %v225_v10 }
   0x4   :  { %v17_v13 = vld [vmem:[%s316_s0] sm:$0xff]  ;;  %v195_v14 = vld [vmem:[%s316_s0 + $0x8] sm:$0xff]  ;;  %v197_v15 = vld [vmem:[%s316_s0 + $0x10] sm:$0xff] }
   0x5   :  { %v199_v20 = vld [vmem:[%s316_s0 + $0x18] sm:$0xff]  ;;  %v201_v25 = vld [vmem:[%s316_s0 + $0x20] sm:$0xff]  ;;  %v203_v28 = vld [vmem:[%s316_s0 + $0x28] sm:$0xff] }
   0x6   :  { %53 = vperm.xlu1 %223, %v200_v3   ;;  %31 = vperm.xlu0 %222, %v196_v4   ;;  %v205_v32 = vld [vmem:[%s316_s0 + $0x30] sm:$0xff]  ;;  %v207_v36 = vld [vmem:[%s316_s0 + $0x38] sm:$0xff]  ;;  %v209_v40 = vld [vmem:[%s316_s0 + $0x40] sm:$0xff] }
   0x7   :  { %v114_v46 = vld [vmem:[%s317_s2] sm:$0xff] }
   0x8   :  { %v113_v47 = vld [vmem:[%s318_s3] sm:$0xff] }
   0xa   :  { %75 = vperm.xlu1 %223, %v204_v5   ;;  %64 = vperm.xlu0 %222, %v202_v6  }
   0xe   :  { %97 = vperm.xlu1 %223, %v208_v7   ;;  %86 = vperm.xlu0 %222, %v206_v8  }
  0x12   :  { %108 = vperm.xlu0 %222, %v210_v9  }
  0x81   :  { %v43_v11 = vpop.permute.xlu1 %42  ;;  %v22_v12 = vpop.permute.xlu0 %21 }
  0x82   :  { %v24_v18 = vmul.f32 %v22_v12, %v17_v13  ;;  %v45_v21 = vmul.f32 %v197_v15, %v43_v11 }
  0x85   :  { %v54_v16 = vpop.permute.xlu1 %53  ;;  %v32_v17 = vpop.permute.xlu0 %31 }
  0x86   :  { %v34_v19 = vmul.f32 %v195_v14, %v32_v17  ;;  %v56_v26 = vmul.f32 %v199_v20, %v54_v16 }
  0x88   :  { %v35_v22 = vadd.f32 %v34_v19, %v24_v18 }
  0x89   :  { %v76_v23 = vpop.permute.xlu1 %75  ;;  %v65_v24 = vpop.permute.xlu0 %64 }
  0x8a   :  { %v46_v27 = vadd.f32 %v45_v21, %v35_v22  ;;  %v67_v30 = vmul.f32 %v201_v25, %v65_v24  ;;  %v78_v33 = vmul.f32 %v203_v28, %v76_v23 }
  0x8c   :  { %v57_v29 = vadd.f32 %v56_v26, %v46_v27 }
  0x8d   :  { %v87_v31 = vpop.permute.xlu0 %86  ;;  %v98_v35 = vpop.permute.xlu1 %97 }
  0x8e   :  { %v68_v34 = vadd.f32 %v67_v30, %v57_v29  ;;  %v89_v38 = vmul.f32 %v205_v32, %v87_v31  ;;  %v100_v41 = vmul.f32 %v207_v36, %v98_v35 }
  0x90   :  { %v79_v37 = vadd.f32 %v78_v33, %v68_v34 }
  0x91   :  { %v109_v39 = vpop.permute.xlu0 %108 }
  0x92   :  { %v90_v42 = vadd.f32 %v89_v38, %v79_v37  ;;  %v111_v43 = vmul.f32 %v209_v40, %v109_v39 }
  0x94   :  { %v101_v44 = vadd.f32 %v100_v41, %v90_v42 }
  0x96   :  { %v112_v45 = vadd.f32 %v111_v43, %v101_v44 }
  0x98   :  { %215 = vmatpush3.msra.mxu0 %v112_v45 }
  0x99   :  { %217 = vmatmul.mubr.msk.f32.vlgmr.msra.gmra.mrb[0].mxu0 %vm115_vm1, %v114_v46 }
 0x16c   :  { %v185_v48 = vpop.f32.mrb[0].mxu0 }
 0x16d   :  { %v189_v49 = vadd.f32 %v185_v48, %v113_v47  ;;  %v218_v50 = vpop.f32.mrb[1].mxu0 }
 0x16f   :  { %190 = vst [vmem:[%s319_s4] sm:$0xff] %v189_v49 }

// kernel: _lambda_.21
= control target key start
LH: loop header
LB: loop body
LE: loop exit
PB: predicated region body
PF: predicated region fallthrough
CT: control target
= control target key end

     0   :  { %v219_v0 = vmov 0   ;;  %v220_v10 = vmov 0.0   ;;  %vm221_vm0 = vmmov 0   ;;  %vm111_vm1 = vcmask 64512   ;;  %s302_s1 = inlined_call_operand.vmem [shape: f32[9,8,1], index: 1, kind: input, shape index: {}]   ;;  %s303_s0 = inlined_call_operand.vmem [shape: f32[9,8,128], index: 0, kind: input, shape index: {}]   ;;  %s304_s2 = inlined_call_operand.vmem [shape: f32[8,8], index: 2, kind: input, shape index: {}]   ;;  %s305_s3 = inlined_call_operand.vmem [shape: f32[8,128], index: 3, kind: output, shape index: {}]  }
   0x1   :  { %218 = vset.pattern.permute.xlu1 %v219_v0  ;;  %217 = vset.pattern.permute.xlu0 %v219_v0  ;;  %v193_v1 = vld [vmem:[%s302_s1 + $0x10] sm:$0xff]  ;;  %v15_v2 = vld [vmem:[%s302_s1] sm:$0xff]  ;;  %v195_v3 = vld [vmem:[%s302_s1 + $0x18] sm:$0xff] }
   0x2   :  { %39 = vperm.xlu1 %218, %v193_v1   ;;  %18 = vperm.xlu0 %217, %v15_v2   ;;  %v191_v4 = vld [vmem:[%s302_s1 + $0x8] sm:$0xff]  ;;  %v197_v6 = vld [vmem:[%s302_s1 + $0x20] sm:$0xff]  ;;  %v203_v7 = vld [vmem:[%s302_s1 + $0x38] sm:$0xff] }
   0x3   :  { %v199_v5 = vld [vmem:[%s302_s1 + $0x28] sm:$0xff]  ;;  %v201_v8 = vld [vmem:[%s302_s1 + $0x30] sm:$0xff]  ;;  %v205_v9 = vld [vmem:[%s302_s1 + $0x40] sm:$0xff]  ;;  %209 = vmatprep.subr.mxu0 %v220_v10  ;;  %211 = vmatprep.mubr.msk.f32.mxu0 %vm221_vm0, %v220_v10 }
   0x4   :  { %v14_v13 = vld [vmem:[%s303_s0] sm:$0xff]  ;;  %v190_v14 = vld [vmem:[%s303_s0 + $0x8] sm:$0xff]  ;;  %v192_v15 = vld [vmem:[%s303_s0 + $0x10] sm:$0xff] }
   0x5   :  { %v194_v20 = vld [vmem:[%s303_s0 + $0x18] sm:$0xff]  ;;  %v196_v25 = vld [vmem:[%s303_s0 + $0x20] sm:$0xff]  ;;  %v198_v28 = vld [vmem:[%s303_s0 + $0x28] sm:$0xff] }
   0x6   :  { %50 = vperm.xlu1 %218, %v195_v3   ;;  %28 = vperm.xlu0 %217, %v191_v4   ;;  %v200_v32 = vld [vmem:[%s303_s0 + $0x30] sm:$0xff]  ;;  %v202_v36 = vld [vmem:[%s303_s0 + $0x38] sm:$0xff]  ;;  %v204_v40 = vld [vmem:[%s303_s0 + $0x40] sm:$0xff] }
   0x7   :  { %v110_v46 = vld [vmem:[%s304_s2] sm:$0xff] }
   0xa   :  { %72 = vperm.xlu1 %218, %v199_v5   ;;  %61 = vperm.xlu0 %217, %v197_v6  }
   0xe   :  { %94 = vperm.xlu1 %218, %v203_v7   ;;  %83 = vperm.xlu0 %217, %v201_v8  }
  0x12   :  { %105 = vperm.xlu0 %217, %v205_v9  }
  0x81   :  { %v40_v11 = vpop.permute.xlu1 %39  ;;  %v19_v12 = vpop.permute.xlu0 %18 }
  0x82   :  { %v21_v18 = vmul.f32 %v19_v12, %v14_v13  ;;  %v42_v21 = vmul.f32 %v192_v15, %v40_v11 }
  0x85   :  { %v51_v16 = vpop.permute.xlu1 %50  ;;  %v29_v17 = vpop.permute.xlu0 %28 }
  0x86   :  { %v31_v19 = vmul.f32 %v190_v14, %v29_v17  ;;  %v53_v26 = vmul.f32 %v194_v20, %v51_v16 }
  0x88   :  { %v32_v22 = vadd.f32 %v31_v19, %v21_v18 }
  0x89   :  { %v73_v23 = vpop.permute.xlu1 %72  ;;  %v62_v24 = vpop.permute.xlu0 %61 }
  0x8a   :  { %v43_v27 = vadd.f32 %v42_v21, %v32_v22  ;;  %v64_v30 = vmul.f32 %v196_v25, %v62_v24  ;;  %v75_v33 = vmul.f32 %v198_v28, %v73_v23 }
  0x8c   :  { %v54_v29 = vadd.f32 %v53_v26, %v43_v27 }
  0x8d   :  { %v84_v31 = vpop.permute.xlu0 %83  ;;  %v95_v35 = vpop.permute.xlu1 %94 }
  0x8e   :  { %v65_v34 = vadd.f32 %v64_v30, %v54_v29  ;;  %v86_v38 = vmul.f32 %v200_v32, %v84_v31  ;;  %v97_v41 = vmul.f32 %v202_v36, %v95_v35 }
  0x90   :  { %v76_v37 = vadd.f32 %v75_v33, %v65_v34 }
  0x91   :  { %v106_v39 = vpop.permute.xlu0 %105 }
  0x92   :  { %v87_v42 = vadd.f32 %v86_v38, %v76_v37  ;;  %v108_v43 = vmul.f32 %v204_v40, %v106_v39 }
  0x94   :  { %v98_v44 = vadd.f32 %v97_v41, %v87_v42 }
  0x96   :  { %v109_v45 = vadd.f32 %v108_v43, %v98_v44 }
  0x98   :  { %210 = vmatpush3.msra.mxu0 %v109_v45 }
  0x99   :  { %212 = vmatmul.mubr.msk.f32.vlgmr.msra.gmra.mrb[0].mxu0 %vm111_vm1, %v110_v46 }
 0x16c   :  { %v181_v47 = vpop.f32.mrb[0].mxu0 }
 0x16d   :  { %185 = vst [vmem:[%s305_s3] sm:$0xff] %v181_v47  ;;  %v213_v48 = vpop.f32.mrb[1].mxu0 }

// kernel: _lambda_.24
= control target key start
LH: loop header
LB: loop body
LE: loop exit
PB: predicated region body
PF: predicated region fallthrough
CT: control target
= control target key end

     0   :  { %v225_v0 = vmov 0   ;;  %v226_v10 = vmov 0.0   ;;  %vm227_vm0 = vmmov 0   ;;  %vm115_vm1 = vcmask 64512   ;;  %s316_s1 = inlined_call_operand.vmem [shape: f32[9,8,1], index: 1, kind: input, shape index: {}]   ;;  %s317_s0 = inlined_call_operand.vmem [shape: f32[9,8,32], index: 0, kind: input, shape index: {}]   ;;  %s318_s2 = inlined_call_operand.vmem [shape: f32[8,8], index: 2, kind: input, shape index: {}]   ;;  %s319_s3 = inlined_call_operand.vmem [shape: f32[8,32], index: 3, kind: input, shape index: {}]   ;;  %s320_s4 = inlined_call_operand.vmem [shape: f32[8,32], index: 4, kind: output, shape index: {}]  }
   0x1   :  { %224 = vset.pattern.permute.xlu1 %v225_v0  ;;  %223 = vset.pattern.permute.xlu0 %v225_v0  ;;  %v199_v1 = vld [vmem:[%s316_s1 + $0x10] sm:$0xff]  ;;  %v18_v2 = vld [vmem:[%s316_s1] sm:$0xff]  ;;  %v201_v3 = vld [vmem:[%s316_s1 + $0x18] sm:$0xff]  ;;  %vm190_vm2 = vcmask 261120  }
   0x2   :  { %42 = vperm.xlu1 %224, %v199_v1   ;;  %21 = vperm.xlu0 %223, %v18_v2   ;;  %v197_v4 = vld [vmem:[%s316_s1 + $0x8] sm:$0xff]  ;;  %v203_v6 = vld [vmem:[%s316_s1 + $0x20] sm:$0xff]  ;;  %v209_v7 = vld [vmem:[%s316_s1 + $0x38] sm:$0xff] }
   0x3   :  { %v205_v5 = vld [vmem:[%s316_s1 + $0x28] sm:$0xff]  ;;  %v207_v8 = vld [vmem:[%s316_s1 + $0x30] sm:$0xff]  ;;  %v211_v9 = vld [vmem:[%s316_s1 + $0x40] sm:$0xff]  ;;  %215 = vmatprep.subr.mxu0 %v226_v10  ;;  %217 = vmatprep.mubr.msk.f32.mxu0 %vm227_vm0, %v226_v10 }
   0x4   :  { %v17_v13 = vld [vmem:[%s317_s0] sm:$0xff]  ;;  %v196_v14 = vld [vmem:[%s317_s0 + $0x8] sm:$0xff]  ;;  %v198_v15 = vld [vmem:[%s317_s0 + $0x10] sm:$0xff] }
   0x5   :  { %v200_v20 = vld [vmem:[%s317_s0 + $0x18] sm:$0xff]  ;;  %v202_v25 = vld [vmem:[%s317_s0 + $0x20] sm:$0xff]  ;;  %v204_v28 = vld [vmem:[%s317_s0 + $0x28] sm:$0xff] }
   0x6   :  { %53 = vperm.xlu1 %224, %v201_v3   ;;  %31 = vperm.xlu0 %223, %v197_v4   ;;  %v206_v32 = vld [vmem:[%s317_s0 + $0x30] sm:$0xff]  ;;  %v208_v36 = vld [vmem:[%s317_s0 + $0x38] sm:$0xff]  ;;  %v210_v40 = vld [vmem:[%s317_s0 + $0x40] sm:$0xff] }
   0x7   :  { %v114_v46 = vld [vmem:[%s318_s2] sm:$0xff] }
   0x8   :  { %v113_v47 = vld [vmem:[%s319_s3] sm:$0xff] }
   0xa   :  { %75 = vperm.xlu1 %224, %v205_v5   ;;  %64 = vperm.xlu0 %223, %v203_v6  }
   0xe   :  { %97 = vperm.xlu1 %224, %v209_v7   ;;  %86 = vperm.xlu0 %223, %v207_v8  }
  0x12   :  { %108 = vperm.xlu0 %223, %v211_v9  }
  0x81   :  { %v43_v11 = vpop.permute.xlu1 %42  ;;  %v22_v12 = vpop.permute.xlu0 %21 }
  0x82   :  { %v24_v18 = vmul.f32 %v22_v12, %v17_v13  ;;  %v45_v21 = vmul.f32 %v198_v15, %v43_v11 }
  0x85   :  { %v54_v16 = vpop.permute.xlu1 %53  ;;  %v32_v17 = vpop.permute.xlu0 %31 }
  0x86   :  { %v34_v19 = vmul.f32 %v196_v14, %v32_v17  ;;  %v56_v26 = vmul.f32 %v200_v20, %v54_v16 }
  0x88   :  { %v35_v22 = vadd.f32 %v34_v19, %v24_v18 }
  0x89   :  { %v76_v23 = vpop.permute.xlu1 %75  ;;  %v65_v24 = vpop.permute.xlu0 %64 }
  0x8a   :  { %v46_v27 = vadd.f32 %v45_v21, %v35_v22  ;;  %v67_v30 = vmul.f32 %v202_v25, %v65_v24  ;;  %v78_v33 = vmul.f32 %v204_v28, %v76_v23 }
  0x8c   :  { %v57_v29 = vadd.f32 %v56_v26, %v46_v27 }
  0x8d   :  { %v87_v31 = vpop.permute.xlu0 %86  ;;  %v98_v35 = vpop.permute.xlu1 %97 }
  0x8e   :  { %v68_v34 = vadd.f32 %v67_v30, %v57_v29  ;;  %v89_v38 = vmul.f32 %v206_v32, %v87_v31  ;;  %v100_v41 = vmul.f32 %v208_v36, %v98_v35 }
  0x90   :  { %v79_v37 = vadd.f32 %v78_v33, %v68_v34 }
  0x91   :  { %v109_v39 = vpop.permute.xlu0 %108 }
  0x92   :  { %v90_v42 = vadd.f32 %v89_v38, %v79_v37  ;;  %v111_v43 = vmul.f32 %v210_v40, %v109_v39 }
  0x94   :  { %v101_v44 = vadd.f32 %v100_v41, %v90_v42 }
  0x96   :  { %v112_v45 = vadd.f32 %v111_v43, %v101_v44 }
  0x98   :  { %216 = vmatpush3.msra.mxu0 %v112_v45 }
  0x99   :  { %218 = vmatmul.mubr.msk.f32.vlgmr.msra.gmra.mrb[0].mxu0 %vm115_vm1, %v114_v46 }
 0x16c   :  { %v185_v48 = vpop.f32.mrb[0].mxu0 }
 0x16d   :  { %v189_v49 = vadd.f32 %v185_v48, %v113_v47  ;;  %v219_v50 = vpop.f32.mrb[1].mxu0 }
 0x16f   :  { %191 = vst.msk [vmem:[%s320_s4] sm:$0xff] %vm190_vm2, %v189_v49 }

// kernel: _lambda_.20
= control target key start
LH: loop header
LB: loop body
LE: loop exit
PB: predicated region body
PF: predicated region fallthrough
CT: control target
= control target key end

     0   :  { %v220_v0 = vmov 0   ;;  %v221_v10 = vmov 0.0   ;;  %vm222_vm0 = vmmov 0   ;;  %vm111_vm1 = vcmask 64512   ;;  %s303_s1 = inlined_call_operand.vmem [shape: f32[9,8,1], index: 1, kind: input, shape index: {}]   ;;  %s304_s0 = inlined_call_operand.vmem [shape: f32[9,8,32], index: 0, kind: input, shape index: {}]   ;;  %s305_s2 = inlined_call_operand.vmem [shape: f32[8,8], index: 2, kind: input, shape index: {}]   ;;  %s306_s3 = inlined_call_operand.vmem [shape: f32[8,32], index: 3, kind: output, shape index: {}]  }
   0x1   :  { %219 = vset.pattern.permute.xlu1 %v220_v0  ;;  %218 = vset.pattern.permute.xlu0 %v220_v0  ;;  %v194_v1 = vld [vmem:[%s303_s1 + $0x10] sm:$0xff]  ;;  %v15_v2 = vld [vmem:[%s303_s1] sm:$0xff]  ;;  %v196_v3 = vld [vmem:[%s303_s1 + $0x18] sm:$0xff]  ;;  %vm185_vm2 = vcmask 261120  }
   0x2   :  { %39 = vperm.xlu1 %219, %v194_v1   ;;  %18 = vperm.xlu0 %218, %v15_v2   ;;  %v192_v4 = vld [vmem:[%s303_s1 + $0x8] sm:$0xff]  ;;  %v198_v6 = vld [vmem:[%s303_s1 + $0x20] sm:$0xff]  ;;  %v204_v7 = vld [vmem:[%s303_s1 + $0x38] sm:$0xff] }
   0x3   :  { %v200_v5 = vld [vmem:[%s303_s1 + $0x28] sm:$0xff]  ;;  %v202_v8 = vld [vmem:[%s303_s1 + $0x30] sm:$0xff]  ;;  %v206_v9 = vld [vmem:[%s303_s1 + $0x40] sm:$0xff]  ;;  %210 = vmatprep.subr.mxu0 %v221_v10  ;;  %212 = vmatprep.mubr.msk.f32.mxu0 %vm222_vm0, %v221_v10 }
   0x4   :  { %v14_v13 = vld [vmem:[%s304_s0] sm:$0xff]  ;;  %v191_v14 = vld [vmem:[%s304_s0 + $0x8] sm:$0xff]  ;;  %v193_v15 = vld [vmem:[%s304_s0 + $0x10] sm:$0xff] }
   0x5   :  { %v195_v20 = vld [vmem:[%s304_s0 + $0x18] sm:$0xff]  ;;  %v197_v25 = vld [vmem:[%s304_s0 + $0x20] sm:$0xff]  ;;  %v199_v28 = vld [vmem:[%s304_s0 + $0x28] sm:$0xff] }
   0x6   :  { %50 = vperm.xlu1 %219, %v196_v3   ;;  %28 = vperm.xlu0 %218, %v192_v4   ;;  %v201_v32 = vld [vmem:[%s304_s0 + $0x30] sm:$0xff]  ;;  %v203_v36 = vld [vmem:[%s304_s0 + $0x38] sm:$0xff]  ;;  %v205_v40 = vld [vmem:[%s304_s0 + $0x40] sm:$0xff] }
   0x7   :  { %v110_v46 = vld [vmem:[%s305_s2] sm:$0xff] }
   0xa   :  { %72 = vperm.xlu1 %219, %v200_v5   ;;  %61 = vperm.xlu0 %218, %v198_v6  }
   0xe   :  { %94 = vperm.xlu1 %219, %v204_v7   ;;  %83 = vperm.xlu0 %218, %v202_v8  }
  0x12   :  { %105 = vperm.xlu0 %218, %v206_v9  }
  0x81   :  { %v40_v11 = vpop.permute.xlu1 %39  ;;  %v19_v12 = vpop.permute.xlu0 %18 }
  0x82   :  { %v21_v18 = vmul.f32 %v19_v12, %v14_v13  ;;  %v42_v21 = vmul.f32 %v193_v15, %v40_v11 }
  0x85   :  { %v51_v16 = vpop.permute.xlu1 %50  ;;  %v29_v17 = vpop.permute.xlu0 %28 }
  0x86   :  { %v31_v19 = vmul.f32 %v191_v14, %v29_v17  ;;  %v53_v26 = vmul.f32 %v195_v20, %v51_v16 }
  0x88   :  { %v32_v22 = vadd.f32 %v31_v19, %v21_v18 }
  0x89   :  { %v73_v23 = vpop.permute.xlu1 %72  ;;  %v62_v24 = vpop.permute.xlu0 %61 }
  0x8a   :  { %v43_v27 = vadd.f32 %v42_v21, %v32_v22  ;;  %v64_v30 = vmul.f32 %v197_v25, %v62_v24  ;;  %v75_v33 = vmul.f32 %v199_v28, %v73_v23 }
  0x8c   :  { %v54_v29 = vadd.f32 %v53_v26, %v43_v27 }
  0x8d   :  { %v84_v31 = vpop.permute.xlu0 %83  ;;  %v95_v35 = vpop.permute.xlu1 %94 }
  0x8e   :  { %v65_v34 = vadd.f32 %v64_v30, %v54_v29  ;;  %v86_v38 = vmul.f32 %v201_v32, %v84_v31  ;;  %v97_v41 = vmul.f32 %v203_v36, %v95_v35 }
  0x90   :  { %v76_v37 = vadd.f32 %v75_v33, %v65_v34 }
  0x91   :  { %v106_v39 = vpop.permute.xlu0 %105 }
  0x92   :  { %v87_v42 = vadd.f32 %v86_v38, %v76_v37  ;;  %v108_v43 = vmul.f32 %v205_v40, %v106_v39 }
  0x94   :  { %v98_v44 = vadd.f32 %v97_v41, %v87_v42 }
  0x96   :  { %v109_v45 = vadd.f32 %v108_v43, %v98_v44 }
  0x98   :  { %211 = vmatpush3.msra.mxu0 %v109_v45 }
  0x99   :  { %213 = vmatmul.mubr.msk.f32.vlgmr.msra.gmra.mrb[0].mxu0 %vm111_vm1, %v110_v46 }
 0x16c   :  { %v181_v47 = vpop.f32.mrb[0].mxu0 }
 0x16d   :  { %186 = vst.msk [vmem:[%s306_s3] sm:$0xff] %vm185_vm2, %v181_v47  ;;  %v214_v48 = vpop.f32.mrb[1].mxu0 }

</bundles_post_ra>
